<compile_context>
chip_gen: v7x
topology: tpu7x:2x2x1
jax: 0.10.0
libtpu: 0.0.40
codegen_flags: <defaults>
</compile_context>

<pallas_src>
import jax
import jax.numpy as jnp
from jax import lax
from jax.experimental import pallas as pl
from jax.experimental.pallas import tpu as pltpu


def _lstm_encoder_kernel(x_ref, w_ih_ref, w_hh_ref, b_ref, w_fc_ref, b_fc_ref,
                         out_ref, g_scr):
    # x_ref:    [T, Bt, E]   bf16 embedded tokens (time-major)
    # w_ih_ref: [E, 4H]      bf16, gate column order (i, f, o, g)
    # w_hh_ref: [H, 4H]      bf16, gate column order (i, f, o, g)
    # b_ref:    [1, 4H]      f32  (b_ih + b_hh), gate order (i, f, o, g)
    # w_fc_ref: [H, emb]     bf16
    # b_fc_ref: [1, emb]     f32
    # out_ref:  [Bt, emb]    f32
    # g_scr:    [T, Bt, 4H]  f32 scratch: hoisted input projection
    T, Bt, E = x_ref.shape
    H = w_hh_ref.shape[0]

    # ---- Hoisted input projection: one big MXU matmul + bias, off the
    # ---- recurrent critical path. x already arrives as bf16. ----
    x2d = x_ref[...].reshape(T * Bt, E)
    g = jnp.dot(x2d, w_ih_ref[...],
                preferred_element_type=jnp.float32) + b_ref[...]    # f32 [T*Bt, 4H]
    g_scr[...] = g.reshape(T, Bt, 4 * H)

    def cell(gates, c_prev):
        # Gate order (i, f, o, g): one sigmoid over the contiguous [Bt, 3H]
        # slab, one tanh over the trailing [Bt, H].
        sig = jax.nn.sigmoid(gates[:, :3 * H])
        i_g = sig[:, 0 * H:1 * H]
        f_g = sig[:, 1 * H:2 * H]
        o_g = sig[:, 2 * H:3 * H]
        g_g = jnp.tanh(gates[:, 3 * H:4 * H])
        c_new = f_g * c_prev + i_g * g_g
        h_new = o_g * jnp.tanh(c_new)
        return h_new, c_new

    # ---- t = 0 peeled: h0 == c0 == 0, so skip the h @ W_hh matmul and the
    # ---- f * c term entirely. ----
    g0 = g_scr[0]
    c_first = jax.nn.sigmoid(g0[:, 0:H]) * jnp.tanh(g0[:, 3 * H:4 * H])   # i * g
    h_first = jax.nn.sigmoid(g0[:, 2 * H:3 * H]) * jnp.tanh(c_first)      # o * tanh(c)

    def step(t, carry):
        h_prev, c_prev = carry   # f32 [Bt, H], live in vregs (no VMEM round-trip)
        # Read W_hh from its VMEM ref per step (no 512 KiB SSA value kept live
        # across the unrolled loop).
        gates = g_scr[t] + jnp.dot(h_prev.astype(w_hh_ref.dtype), w_hh_ref[...],
                                   preferred_element_type=jnp.float32)
        return cell(gates, c_prev)

    h_last, _ = lax.fori_loop(1, T, step, (h_first, c_first),
                              unroll=max(1, min(T - 1, 8)))

    # fc(hidden[-1])
    out_ref[...] = (jnp.dot(h_last.astype(w_fc_ref.dtype), w_fc_ref[...],
                            preferred_element_type=jnp.float32)
                    + b_fc_ref[...])


def _permute_gates_ifgo_to_ifog(w):
    """Reorder trailing 4H gate columns from PyTorch (i,f,g,o) to (i,f,o,g)."""
    h4 = w.shape[-1]
    h = h4 // 4
    return jnp.concatenate([w[..., :2 * h], w[..., 3 * h:], w[..., 2 * h:3 * h]],
                           axis=-1)


def simple_text_encoder(input_ids, params, *, batch_tile=None):
    """input_ids: int32 [B, T]  ->  [B, emb_size] float32.

    Params use PyTorch nn.LSTM gate order (i, f, g, o); weights are stored
    [in_features, out_features] (already transposed for row-major x @ W).
    """
    emb_table = params["embedding"]          # [V, E]  f32
    w_ih = params["w_ih"]                    # [E, 4H] f32, (i,f,g,o)
    w_hh = params["w_hh"]                    # [H, 4H] f32, (i,f,g,o)
    b = params["b"]                          # [1, 4H] f32, (i,f,g,o) (b_ih + b_hh)
    w_fc = params["w_fc"]                    # [H, emb] f32
    b_fc = params["b_fc"]                    # [1, emb] f32

    B, T = input_ids.shape
    E = emb_table.shape[1]
    H = w_hh.shape[0]
    emb_size = w_fc.shape[1]

    # Layout contract: x is bf16 in the kernel => 16-row sublane packing on the
    # batch axis; lane dims multiples of 128.
    assert B % 16 == 0 and E % 128 == 0 and H % 128 == 0 and emb_size % 128 == 0

    # Single program by default (best on one TensorCore; v5e/v6e have exactly
    # one — a grid there is a serial loop that re-pays per-step overhead for no
    # gain on this latency-bound recurrence).  Only split across v7x's two
    # TensorCores when each core still gets a large M tile.
    if batch_tile is None:
        batch_tile = B
    assert batch_tile % 16 == 0 and B % batch_tile == 0
    if batch_tile < B:
        assert batch_tile >= 128, (
            "batch split only pays on multi-TensorCore chips with >=128 rows "
            "per core; keep batch_tile=B otherwise")

    # Embedding lookup directly into time-major [T, B, E]; cast to bf16 in the
    # wrapper so the kernel's largest input moves half the HBM bytes.
    x_tm = jnp.take(emb_table, input_ids.T, axis=0).astype(jnp.bfloat16)

    # Gate reorder (i,f,g,o) -> (i,f,o,g); bf16 MXU operands, f32 biases.
    w_ih_k = _permute_gates_ifgo_to_ifog(w_ih).astype(jnp.bfloat16)
    w_hh_k = _permute_gates_ifgo_to_ifog(w_hh).astype(jnp.bfloat16)
    b_k = _permute_gates_ifgo_to_ifog(b).astype(jnp.float32)
    w_fc_k = w_fc.astype(jnp.bfloat16)
    b_fc_k = b_fc.astype(jnp.float32)

    grid = (B // batch_tile,)
    out = pl.pallas_call(
        _lstm_encoder_kernel,
        out_shape=jax.ShapeDtypeStruct((B, emb_size), jnp.float32),
        grid_spec=pltpu.PrefetchScalarGridSpec(
            num_scalar_prefetch=0,
            grid=grid,
            in_specs=[
                pl.BlockSpec((T, batch_tile, E), lambda i: (0, i, 0)),
                pl.BlockSpec((E, 4 * H), lambda i: (0, 0)),
                pl.BlockSpec((H, 4 * H), lambda i: (0, 0)),
                pl.BlockSpec((1, 4 * H), lambda i: (0, 0)),
                pl.BlockSpec((H, emb_size), lambda i: (0, 0)),
                pl.BlockSpec((1, emb_size), lambda i: (0, 0)),
            ],
            out_specs=pl.BlockSpec((batch_tile, emb_size), lambda i: (i, 0)),
            scratch_shapes=[
                pltpu.VMEM((T, batch_tile, 4 * H), jnp.float32),  # hoisted x-projection
            ],
        ),
        compiler_params=pltpu.CompilerParams(
            dimension_semantics=("parallel",)),
    )(x_tm, w_ih_k, w_hh_k, b_k, w_fc_k, b_fc_k)
    return out


def reference_forward(input_ids, params, matmul_dtype=jnp.float32):
    """Pure-JAX reference with PyTorch nn.LSTM semantics (gate order i,f,g,o).

    matmul_dtype=bf16 mirrors the kernel's MXU precision (bf16 operands,
    f32 accumulation, f32 gate math / state).
    """
    emb = jnp.take(params["embedding"], input_ids, axis=0)   # [B, T, E]
    B, T, E = emb.shape
    H = params["w_hh"].shape[0]
    w_ih = params["w_ih"].astype(matmul_dtype)
    w_hh = params["w_hh"].astype(matmul_dtype)
    w_fc = params["w_fc"].astype(matmul_dtype)
    b, b_fc = params["b"], params["b_fc"]
    h = jnp.zeros((B, H), jnp.float32)
    c = jnp.zeros((B, H), jnp.float32)
    for t in range(T):
        x_t = emb[:, t, :].astype(matmul_dtype)
        gates = (jnp.dot(x_t, w_ih, preferred_element_type=jnp.float32)
                 + jnp.dot(h.astype(matmul_dtype), w_hh,
                           preferred_element_type=jnp.float32)
                 + b)
        i_g = jax.nn.sigmoid(gates[:, 0:H])
        f_g = jax.nn.sigmoid(gates[:, H:2 * H])
        g_g = jnp.tanh(gates[:, 2 * H:3 * H])
        o_g = jax.nn.sigmoid(gates[:, 3 * H:4 * H])
        c = f_g * c + i_g * g_g
        h = o_g * jnp.tanh(c)
    return (jnp.dot(h.astype(matmul_dtype), w_fc,
                    preferred_element_type=jnp.float32) + b_fc)


def init_params(key, vocab_size, embedding_dim, hidden_dim, emb_size):
    ks = jax.random.split(key, 6)
    scale = 0.1
    return {
        "embedding": scale * jax.random.normal(ks[0], (vocab_size, embedding_dim), jnp.float32),
        "w_ih": scale * jax.random.normal(ks[1], (embedding_dim, 4 * hidden_dim), jnp.float32),
        "w_hh": scale * jax.random.normal(ks[2], (hidden_dim, 4 * hidden_dim), jnp.float32),
        # combined bias b_ih + b_hh, kept 2D for clean VMEM layout
        "b": scale * jax.random.normal(ks[3], (1, 4 * hidden_dim), jnp.float32),
        "w_fc": scale * jax.random.normal(ks[4], (hidden_dim, emb_size), jnp.float32),
        "b_fc": scale * jax.random.normal(ks[5], (1, emb_size), jnp.float32),
    }


if __name__ == "__main__":
    # B multiple of 16 (bf16 x sublane packing); module-default dims otherwise.
    B, T = 16, 8
    vocab_size, embedding_dim, hidden_dim, emb_size = 64, 128, 256, 128

    key = jax.random.PRNGKey(0)
    k_ids, k_params = jax.random.split(key)
    params = init_params(k_params, vocab_size, embedding_dim, hidden_dim, emb_size)
    input_ids = jax.random.randint(k_ids, (B, T), 0, vocab_size, dtype=jnp.int32)

    out = simple_text_encoder(input_ids, params)
    out = jax.block_until_ready(out)
    assert out.shape == (B, emb_size)

    # Tight check vs a reference mirroring the kernel's MXU precision
    # (bf16 matmul operands, f32 accumulation, f32 gate math & state).
    ref_bf16 = reference_forward(input_ids, params, matmul_dtype=jnp.bfloat16)
    assert jnp.allclose(out, ref_bf16, rtol=2e-3, atol=2e-3), "mismatch vs bf16-matmul reference"

    # Loose check vs the full-f32 PyTorch-equivalent reference (semantics).
    ref_f32 = reference_forward(input_ids, params, matmul_dtype=jnp.float32)
    assert jnp.allclose(out, ref_f32, rtol=3e-2, atol=3e-2), "mismatch vs f32 reference"

    print("KERNEL_OK")
</pallas_src>

<mosaic_0001>
module attributes {stable_mosaic.version = 11 : i64} {
  func.func @_lstm_encoder_kernel(%arg0: i32, %arg1: memref<8x16x128xbf16, #tpu.memory_space<vmem>>, %arg2: memref<128x1024xbf16, #tpu.memory_space<vmem>>, %arg3: memref<256x1024xbf16, #tpu.memory_space<vmem>>, %arg4: memref<1x1024xf32, #tpu.memory_space<vmem>>, %arg5: memref<256x128xbf16, #tpu.memory_space<vmem>>, %arg6: memref<1x128xf32, #tpu.memory_space<vmem>>, %arg7: memref<16x128xf32, #tpu.memory_space<vmem>>, %arg8: memref<8x16x1024xf32, #tpu.memory_space<vmem>>) attributes {dimension_semantics = [#tpu.dimension_semantics<parallel>], iteration_bounds = array<i64: 1>, scalar_prefetch = 0 : i64, scratch_operands = 1 : i64, tpu.core_type = #tpu.core_type<tc>, window_params = [{transform_indices = @transform_0, window_bounds = array<i64: 8, 16, 128>}, {pipeline_mode = #tpu.pipeline_mode<synchronous>, transform_indices = @transform_1, window_bounds = array<i64: 128, 1024>}, {pipeline_mode = #tpu.pipeline_mode<synchronous>, transform_indices = @transform_2, window_bounds = array<i64: 256, 1024>}, {pipeline_mode = #tpu.pipeline_mode<synchronous>, transform_indices = @transform_3, window_bounds = array<i64: 1, 1024>}, {pipeline_mode = #tpu.pipeline_mode<synchronous>, transform_indices = @transform_4, window_bounds = array<i64: 256, 128>}, {pipeline_mode = #tpu.pipeline_mode<synchronous>, transform_indices = @transform_5, window_bounds = array<i64: 1, 128>}, {transform_indices = @transform_6, window_bounds = array<i64: 16, 128>}]} {
    %c0 = arith.constant 0 : index
    %c0_0 = arith.constant 0 : index
    %c0_1 = arith.constant 0 : index
    %0 = vector.load %arg1[%c0, %c0_0, %c0_1] : memref<8x16x128xbf16, #tpu.memory_space<vmem>>, vector<8x16x128xbf16>
    %1 = vector.shape_cast %0 : vector<8x16x128xbf16> to vector<128x128xbf16>
    %c0_2 = arith.constant 0 : index
    %c0_3 = arith.constant 0 : index
    %2 = vector.load %arg2[%c0_2, %c0_3] : memref<128x1024xbf16, #tpu.memory_space<vmem>>, vector<128x1024xbf16>
    %cst = arith.constant dense<0.000000e+00> : vector<128x1024xf32>
    %3 = tpu.matmul %1, %2, %cst {dimension_numbers = #tpu.dot_dimension_numbers<[1], [0], [0], [1], [0, 0, 1, 1], [], []>} : vector<128x128xbf16>, vector<128x1024xbf16>, vector<128x1024xf32> -> vector<128x1024xf32>
    %c0_4 = arith.constant 0 : index
    %c0_5 = arith.constant 0 : index
    %4 = vector.load %arg4[%c0_4, %c0_5] : memref<1x1024xf32, #tpu.memory_space<vmem>>, vector<1x1024xf32>
    %5 = vector.broadcast %4 : vector<1x1024xf32> to vector<128x1024xf32>
    %6 = arith.addf %3, %5 : vector<128x1024xf32>
    %7 = vector.shape_cast %6 : vector<128x1024xf32> to vector<8x16x1024xf32>
    %c0_6 = arith.constant 0 : index
    %c0_7 = arith.constant 0 : index
    %c0_8 = arith.constant 0 : index
    %8 = vector.load %arg8[%c0_6, %c0_7, %c0_8] : memref<8x16x1024xf32, #tpu.memory_space<vmem>>, vector<8x16x1024xf32>
    tpu.vector_store %arg8[%c0_6, %c0_7, %c0_8], %7 {strides = array<i32>} : memref<8x16x1024xf32, #tpu.memory_space<vmem>>, vector<8x16x1024xf32>,
    %c0_9 = arith.constant 0 : index
    %c0_10 = arith.constant 0 : index
    %c0_11 = arith.constant 0 : index
    %9 = vector.load %arg8[%c0_9, %c0_10, %c0_11] : memref<8x16x1024xf32, #tpu.memory_space<vmem>>, vector<1x16x1024xf32>
    %10 = vector.shape_cast %9 : vector<1x16x1024xf32> to vector<16x1024xf32>
    %11 = vector.extract_strided_slice %10 {offsets = [0, 0], sizes = [16, 256], strides = [1, 1]} : vector<16x1024xf32> to vector<16x256xf32>
    %12 = arith.negf %11 : vector<16x256xf32>
    %13 = math.exp %12 : vector<16x256xf32>
    %cst_12 = arith.constant 1.000000e+00 : f32
    %14 = vector.broadcast %cst_12 : f32 to vector<16x256xf32>
    %15 = arith.addf %14, %13 : vector<16x256xf32>
    %16 = arith.divf %14, %15 : vector<16x256xf32>
    %17 = vector.extract_strided_slice %10 {offsets = [0, 768], sizes = [16, 256], strides = [1, 1]} : vector<16x1024xf32> to vector<16x256xf32>
    %18 = math.tanh %17 : vector<16x256xf32>
    %19 = arith.mulf %16, %18 : vector<16x256xf32>
    %20 = vector.extract_strided_slice %10 {offsets = [0, 512], sizes = [16, 256], strides = [1, 1]} : vector<16x1024xf32> to vector<16x256xf32>
    %21 = arith.negf %20 : vector<16x256xf32>
    %22 = math.exp %21 : vector<16x256xf32>
    %cst_13 = arith.constant 1.000000e+00 : f32
    %23 = vector.broadcast %cst_13 : f32 to vector<16x256xf32>
    %24 = arith.addf %23, %22 : vector<16x256xf32>
    %25 = arith.divf %23, %24 : vector<16x256xf32>
    %26 = math.tanh %19 : vector<16x256xf32>
    %27 = arith.mulf %25, %26 : vector<16x256xf32>
    %c1_i32 = arith.constant 1 : i32
    %28 = arith.index_cast %c1_i32 : i32 to index
    %c0_14 = arith.constant 0 : index
    %c0_15 = arith.constant 0 : index
    %29 = vector.load %arg8[%28, %c0_14, %c0_15] : memref<8x16x1024xf32, #tpu.memory_space<vmem>>, vector<1x16x1024xf32>
    %30 = vector.shape_cast %29 : vector<1x16x1024xf32> to vector<16x1024xf32>
    %31 = arith.truncf %27 : vector<16x256xf32> to vector<16x256xbf16>
    %c0_16 = arith.constant 0 : index
    %c0_17 = arith.constant 0 : index
    %32 = vector.load %arg3[%c0_16, %c0_17] : memref<256x1024xbf16, #tpu.memory_space<vmem>>, vector<256x1024xbf16>
    %cst_18 = arith.constant dense<0.000000e+00> : vector<16x1024xf32>
    %33 = tpu.matmul %31, %32, %cst_18 {dimension_numbers = #tpu.dot_dimension_numbers<[1], [0], [0], [1], [0, 0, 1, 1], [], []>} : vector<16x256xbf16>, vector<256x1024xbf16>, vector<16x1024xf32> -> vector<16x1024xf32>
    %34 = arith.addf %30, %33 : vector<16x1024xf32>
    %35 = vector.extract_strided_slice %34 {offsets = [0, 0], sizes = [16, 768], strides = [1, 1]} : vector<16x1024xf32> to vector<16x768xf32>
    %36 = arith.negf %35 : vector<16x768xf32>
    %37 = math.exp %36 : vector<16x768xf32>
    %cst_19 = arith.constant 1.000000e+00 : f32
    %38 = vector.broadcast %cst_19 : f32 to vector<16x768xf32>
    %39 = arith.addf %38, %37 : vector<16x768xf32>
    %40 = arith.divf %38, %39 : vector<16x768xf32>
    %41 = vector.extract_strided_slice %40 {offsets = [0, 0], sizes = [16, 256], strides = [1, 1]} : vector<16x768xf32> to vector<16x256xf32>
    %42 = vector.extract_strided_slice %40 {offsets = [0, 256], sizes = [16, 256], strides = [1, 1]} : vector<16x768xf32> to vector<16x256xf32>
    %43 = vector.extract_strided_slice %40 {offsets = [0, 512], sizes = [16, 256], strides = [1, 1]} : vector<16x768xf32> to vector<16x256xf32>
    %44 = vector.extract_strided_slice %34 {offsets = [0, 768], sizes = [16, 256], strides = [1, 1]} : vector<16x1024xf32> to vector<16x256xf32>
    %45 = math.tanh %44 : vector<16x256xf32>
    %46 = arith.mulf %42, %19 : vector<16x256xf32>
    %47 = arith.mulf %41, %45 : vector<16x256xf32>
    %48 = arith.addf %46, %47 : vector<16x256xf32>
    %49 = math.tanh %48 : vector<16x256xf32>
    %50 = arith.mulf %43, %49 : vector<16x256xf32>
    %c2_i32 = arith.constant 2 : i32
    %51 = arith.index_cast %c2_i32 : i32 to index
    %c0_20 = arith.constant 0 : index
    %c0_21 = arith.constant 0 : index
    %52 = vector.load %arg8[%51, %c0_20, %c0_21] : memref<8x16x1024xf32, #tpu.memory_space<vmem>>, vector<1x16x1024xf32>
    %53 = vector.shape_cast %52 : vector<1x16x1024xf32> to vector<16x1024xf32>
    %54 = arith.truncf %50 : vector<16x256xf32> to vector<16x256xbf16>
    %c0_22 = arith.constant 0 : index
    %c0_23 = arith.constant 0 : index
    %55 = vector.load %arg3[%c0_22, %c0_23] : memref<256x1024xbf16, #tpu.memory_space<vmem>>, vector<256x1024xbf16>
    %cst_24 = arith.constant dense<0.000000e+00> : vector<16x1024xf32>
    %56 = tpu.matmul %54, %55, %cst_24 {dimension_numbers = #tpu.dot_dimension_numbers<[1], [0], [0], [1], [0, 0, 1, 1], [], []>} : vector<16x256xbf16>, vector<256x1024xbf16>, vector<16x1024xf32> -> vector<16x1024xf32>
    %57 = arith.addf %53, %56 : vector<16x1024xf32>
    %58 = vector.extract_strided_slice %57 {offsets = [0, 0], sizes = [16, 768], strides = [1, 1]} : vector<16x1024xf32> to vector<16x768xf32>
    %59 = arith.negf %58 : vector<16x768xf32>
    %60 = math.exp %59 : vector<16x768xf32>
    %cst_25 = arith.constant 1.000000e+00 : f32
    %61 = vector.broadcast %cst_25 : f32 to vector<16x768xf32>
    %62 = arith.addf %61, %60 : vector<16x768xf32>
    %63 = arith.divf %61, %62 : vector<16x768xf32>
    %64 = vector.extract_strided_slice %63 {offsets = [0, 0], sizes = [16, 256], strides = [1, 1]} : vector<16x768xf32> to vector<16x256xf32>
    %65 = vector.extract_strided_slice %63 {offsets = [0, 256], sizes = [16, 256], strides = [1, 1]} : vector<16x768xf32> to vector<16x256xf32>
    %66 = vector.extract_strided_slice %63 {offsets = [0, 512], sizes = [16, 256], strides = [1, 1]} : vector<16x768xf32> to vector<16x256xf32>
    %67 = vector.extract_strided_slice %57 {offsets = [0, 768], sizes = [16, 256], strides = [1, 1]} : vector<16x1024xf32> to vector<16x256xf32>
    %68 = math.tanh %67 : vector<16x256xf32>
    %69 = arith.mulf %65, %48 : vector<16x256xf32>
    %70 = arith.mulf %64, %68 : vector<16x256xf32>
    %71 = arith.addf %69, %70 : vector<16x256xf32>
    %72 = math.tanh %71 : vector<16x256xf32>
    %73 = arith.mulf %66, %72 : vector<16x256xf32>
    %c3_i32 = arith.constant 3 : i32
    %74 = arith.index_cast %c3_i32 : i32 to index
    %c0_26 = arith.constant 0 : index
    %c0_27 = arith.constant 0 : index
    %75 = vector.load %arg8[%74, %c0_26, %c0_27] : memref<8x16x1024xf32, #tpu.memory_space<vmem>>, vector<1x16x1024xf32>
    %76 = vector.shape_cast %75 : vector<1x16x1024xf32> to vector<16x1024xf32>
    %77 = arith.truncf %73 : vector<16x256xf32> to vector<16x256xbf16>
    %c0_28 = arith.constant 0 : index
    %c0_29 = arith.constant 0 : index
    %78 = vector.load %arg3[%c0_28, %c0_29] : memref<256x1024xbf16, #tpu.memory_space<vmem>>, vector<256x1024xbf16>
    %cst_30 = arith.constant dense<0.000000e+00> : vector<16x1024xf32>
    %79 = tpu.matmul %77, %78, %cst_30 {dimension_numbers = #tpu.dot_dimension_numbers<[1], [0], [0], [1], [0, 0, 1, 1], [], []>} : vector<16x256xbf16>, vector<256x1024xbf16>, vector<16x1024xf32> -> vector<16x1024xf32>
    %80 = arith.addf %76, %79 : vector<16x1024xf32>
    %81 = vector.extract_strided_slice %80 {offsets = [0, 0], sizes = [16, 768], strides = [1, 1]} : vector<16x1024xf32> to vector<16x768xf32>
    %82 = arith.negf %81 : vector<16x768xf32>
    %83 = math.exp %82 : vector<16x768xf32>
    %cst_31 = arith.constant 1.000000e+00 : f32
    %84 = vector.broadcast %cst_31 : f32 to vector<16x768xf32>
    %85 = arith.addf %84, %83 : vector<16x768xf32>
    %86 = arith.divf %84, %85 : vector<16x768xf32>
    %87 = vector.extract_strided_slice %86 {offsets = [0, 0], sizes = [16, 256], strides = [1, 1]} : vector<16x768xf32> to vector<16x256xf32>
    %88 = vector.extract_strided_slice %86 {offsets = [0, 256], sizes = [16, 256], strides = [1, 1]} : vector<16x768xf32> to vector<16x256xf32>
    %89 = vector.extract_strided_slice %86 {offsets = [0, 512], sizes = [16, 256], strides = [1, 1]} : vector<16x768xf32> to vector<16x256xf32>
    %90 = vector.extract_strided_slice %80 {offsets = [0, 768], sizes = [16, 256], strides = [1, 1]} : vector<16x1024xf32> to vector<16x256xf32>
    %91 = math.tanh %90 : vector<16x256xf32>
    %92 = arith.mulf %88, %71 : vector<16x256xf32>
    %93 = arith.mulf %87, %91 : vector<16x256xf32>
    %94 = arith.addf %92, %93 : vector<16x256xf32>
    %95 = math.tanh %94 : vector<16x256xf32>
    %96 = arith.mulf %89, %95 : vector<16x256xf32>
    %c4_i32 = arith.constant 4 : i32
    %97 = arith.index_cast %c4_i32 : i32 to index
    %c0_32 = arith.constant 0 : index
    %c0_33 = arith.constant 0 : index
    %98 = vector.load %arg8[%97, %c0_32, %c0_33] : memref<8x16x1024xf32, #tpu.memory_space<vmem>>, vector<1x16x1024xf32>
    %99 = vector.shape_cast %98 : vector<1x16x1024xf32> to vector<16x1024xf32>
    %100 = arith.truncf %96 : vector<16x256xf32> to vector<16x256xbf16>
    %c0_34 = arith.constant 0 : index
    %c0_35 = arith.constant 0 : index
    %101 = vector.load %arg3[%c0_34, %c0_35] : memref<256x1024xbf16, #tpu.memory_space<vmem>>, vector<256x1024xbf16>
    %cst_36 = arith.constant dense<0.000000e+00> : vector<16x1024xf32>
    %102 = tpu.matmul %100, %101, %cst_36 {dimension_numbers = #tpu.dot_dimension_numbers<[1], [0], [0], [1], [0, 0, 1, 1], [], []>} : vector<16x256xbf16>, vector<256x1024xbf16>, vector<16x1024xf32> -> vector<16x1024xf32>
    %103 = arith.addf %99, %102 : vector<16x1024xf32>
    %104 = vector.extract_strided_slice %103 {offsets = [0, 0], sizes = [16, 768], strides = [1, 1]} : vector<16x1024xf32> to vector<16x768xf32>
    %105 = arith.negf %104 : vector<16x768xf32>
    %106 = math.exp %105 : vector<16x768xf32>
    %cst_37 = arith.constant 1.000000e+00 : f32
    %107 = vector.broadcast %cst_37 : f32 to vector<16x768xf32>
    %108 = arith.addf %107, %106 : vector<16x768xf32>
    %109 = arith.divf %107, %108 : vector<16x768xf32>
    %110 = vector.extract_strided_slice %109 {offsets = [0, 0], sizes = [16, 256], strides = [1, 1]} : vector<16x768xf32> to vector<16x256xf32>
    %111 = vector.extract_strided_slice %109 {offsets = [0, 256], sizes = [16, 256], strides = [1, 1]} : vector<16x768xf32> to vector<16x256xf32>
    %112 = vector.extract_strided_slice %109 {offsets = [0, 512], sizes = [16, 256], strides = [1, 1]} : vector<16x768xf32> to vector<16x256xf32>
    %113 = vector.extract_strided_slice %103 {offsets = [0, 768], sizes = [16, 256], strides = [1, 1]} : vector<16x1024xf32> to vector<16x256xf32>
    %114 = math.tanh %113 : vector<16x256xf32>
    %115 = arith.mulf %111, %94 : vector<16x256xf32>
    %116 = arith.mulf %110, %114 : vector<16x256xf32>
    %117 = arith.addf %115, %116 : vector<16x256xf32>
    %118 = math.tanh %117 : vector<16x256xf32>
    %119 = arith.mulf %112, %118 : vector<16x256xf32>
    %c5_i32 = arith.constant 5 : i32
    %120 = arith.index_cast %c5_i32 : i32 to index
    %c0_38 = arith.constant 0 : index
    %c0_39 = arith.constant 0 : index
    %121 = vector.load %arg8[%120, %c0_38, %c0_39] : memref<8x16x1024xf32, #tpu.memory_space<vmem>>, vector<1x16x1024xf32>
    %122 = vector.shape_cast %121 : vector<1x16x1024xf32> to vector<16x1024xf32>
    %123 = arith.truncf %119 : vector<16x256xf32> to vector<16x256xbf16>
    %c0_40 = arith.constant 0 : index
    %c0_41 = arith.constant 0 : index
    %124 = vector.load %arg3[%c0_40, %c0_41] : memref<256x1024xbf16, #tpu.memory_space<vmem>>, vector<256x1024xbf16>
    %cst_42 = arith.constant dense<0.000000e+00> : vector<16x1024xf32>
    %125 = tpu.matmul %123, %124, %cst_42 {dimension_numbers = #tpu.dot_dimension_numbers<[1], [0], [0], [1], [0, 0, 1, 1], [], []>} : vector<16x256xbf16>, vector<256x1024xbf16>, vector<16x1024xf32> -> vector<16x1024xf32>
    %126 = arith.addf %122, %125 : vector<16x1024xf32>
    %127 = vector.extract_strided_slice %126 {offsets = [0, 0], sizes = [16, 768], strides = [1, 1]} : vector<16x1024xf32> to vector<16x768xf32>
    %128 = arith.negf %127 : vector<16x768xf32>
    %129 = math.exp %128 : vector<16x768xf32>
    %cst_43 = arith.constant 1.000000e+00 : f32
    %130 = vector.broadcast %cst_43 : f32 to vector<16x768xf32>
    %131 = arith.addf %130, %129 : vector<16x768xf32>
    %132 = arith.divf %130, %131 : vector<16x768xf32>
    %133 = vector.extract_strided_slice %132 {offsets = [0, 0], sizes = [16, 256], strides = [1, 1]} : vector<16x768xf32> to vector<16x256xf32>
    %134 = vector.extract_strided_slice %132 {offsets = [0, 256], sizes = [16, 256], strides = [1, 1]} : vector<16x768xf32> to vector<16x256xf32>
    %135 = vector.extract_strided_slice %132 {offsets = [0, 512], sizes = [16, 256], strides = [1, 1]} : vector<16x768xf32> to vector<16x256xf32>
    %136 = vector.extract_strided_slice %126 {offsets = [0, 768], sizes = [16, 256], strides = [1, 1]} : vector<16x1024xf32> to vector<16x256xf32>
    %137 = math.tanh %136 : vector<16x256xf32>
    %138 = arith.mulf %134, %117 : vector<16x256xf32>
    %139 = arith.mulf %133, %137 : vector<16x256xf32>
    %140 = arith.addf %138, %139 : vector<16x256xf32>
    %141 = math.tanh %140 : vector<16x256xf32>
    %142 = arith.mulf %135, %141 : vector<16x256xf32>
    %c6_i32 = arith.constant 6 : i32
    %143 = arith.index_cast %c6_i32 : i32 to index
    %c0_44 = arith.constant 0 : index
    %c0_45 = arith.constant 0 : index
    %144 = vector.load %arg8[%143, %c0_44, %c0_45] : memref<8x16x1024xf32, #tpu.memory_space<vmem>>, vector<1x16x1024xf32>
    %145 = vector.shape_cast %144 : vector<1x16x1024xf32> to vector<16x1024xf32>
    %146 = arith.truncf %142 : vector<16x256xf32> to vector<16x256xbf16>
    %c0_46 = arith.constant 0 : index
    %c0_47 = arith.constant 0 : index
    %147 = vector.load %arg3[%c0_46, %c0_47] : memref<256x1024xbf16, #tpu.memory_space<vmem>>, vector<256x1024xbf16>
    %cst_48 = arith.constant dense<0.000000e+00> : vector<16x1024xf32>
    %148 = tpu.matmul %146, %147, %cst_48 {dimension_numbers = #tpu.dot_dimension_numbers<[1], [0], [0], [1], [0, 0, 1, 1], [], []>} : vector<16x256xbf16>, vector<256x1024xbf16>, vector<16x1024xf32> -> vector<16x1024xf32>
    %149 = arith.addf %145, %148 : vector<16x1024xf32>
    %150 = vector.extract_strided_slice %149 {offsets = [0, 0], sizes = [16, 768], strides = [1, 1]} : vector<16x1024xf32> to vector<16x768xf32>
    %151 = arith.negf %150 : vector<16x768xf32>
    %152 = math.exp %151 : vector<16x768xf32>
    %cst_49 = arith.constant 1.000000e+00 : f32
    %153 = vector.broadcast %cst_49 : f32 to vector<16x768xf32>
    %154 = arith.addf %153, %152 : vector<16x768xf32>
    %155 = arith.divf %153, %154 : vector<16x768xf32>
    %156 = vector.extract_strided_slice %155 {offsets = [0, 0], sizes = [16, 256], strides = [1, 1]} : vector<16x768xf32> to vector<16x256xf32>
    %157 = vector.extract_strided_slice %155 {offsets = [0, 256], sizes = [16, 256], strides = [1, 1]} : vector<16x768xf32> to vector<16x256xf32>
    %158 = vector.extract_strided_slice %155 {offsets = [0, 512], sizes = [16, 256], strides = [1, 1]} : vector<16x768xf32> to vector<16x256xf32>
    %159 = vector.extract_strided_slice %149 {offsets = [0, 768], sizes = [16, 256], strides = [1, 1]} : vector<16x1024xf32> to vector<16x256xf32>
    %160 = math.tanh %159 : vector<16x256xf32>
    %161 = arith.mulf %157, %140 : vector<16x256xf32>
    %162 = arith.mulf %156, %160 : vector<16x256xf32>
    %163 = arith.addf %161, %162 : vector<16x256xf32>
    %164 = math.tanh %163 : vector<16x256xf32>
    %165 = arith.mulf %158, %164 : vector<16x256xf32>
    %c7_i32 = arith.constant 7 : i32
    %166 = arith.index_cast %c7_i32 : i32 to index
    %c0_50 = arith.constant 0 : index
    %c0_51 = arith.constant 0 : index
    %167 = vector.load %arg8[%166, %c0_50, %c0_51] : memref<8x16x1024xf32, #tpu.memory_space<vmem>>, vector<1x16x1024xf32>
    %168 = vector.shape_cast %167 : vector<1x16x1024xf32> to vector<16x1024xf32>
    %169 = arith.truncf %165 : vector<16x256xf32> to vector<16x256xbf16>
    %c0_52 = arith.constant 0 : index
    %c0_53 = arith.constant 0 : index
    %170 = vector.load %arg3[%c0_52, %c0_53] : memref<256x1024xbf16, #tpu.memory_space<vmem>>, vector<256x1024xbf16>
    %cst_54 = arith.constant dense<0.000000e+00> : vector<16x1024xf32>
    %171 = tpu.matmul %169, %170, %cst_54 {dimension_numbers = #tpu.dot_dimension_numbers<[1], [0], [0], [1], [0, 0, 1, 1], [], []>} : vector<16x256xbf16>, vector<256x1024xbf16>, vector<16x1024xf32> -> vector<16x1024xf32>
    %172 = arith.addf %168, %171 : vector<16x1024xf32>
    %173 = vector.extract_strided_slice %172 {offsets = [0, 0], sizes = [16, 768], strides = [1, 1]} : vector<16x1024xf32> to vector<16x768xf32>
    %174 = arith.negf %173 : vector<16x768xf32>
    %175 = math.exp %174 : vector<16x768xf32>
    %cst_55 = arith.constant 1.000000e+00 : f32
    %176 = vector.broadcast %cst_55 : f32 to vector<16x768xf32>
    %177 = arith.addf %176, %175 : vector<16x768xf32>
    %178 = arith.divf %176, %177 : vector<16x768xf32>
    %179 = vector.extract_strided_slice %178 {offsets = [0, 0], sizes = [16, 256], strides = [1, 1]} : vector<16x768xf32> to vector<16x256xf32>
    %180 = vector.extract_strided_slice %178 {offsets = [0, 256], sizes = [16, 256], strides = [1, 1]} : vector<16x768xf32> to vector<16x256xf32>
    %181 = vector.extract_strided_slice %178 {offsets = [0, 512], sizes = [16, 256], strides = [1, 1]} : vector<16x768xf32> to vector<16x256xf32>
    %182 = vector.extract_strided_slice %172 {offsets = [0, 768], sizes = [16, 256], strides = [1, 1]} : vector<16x1024xf32> to vector<16x256xf32>
    %183 = math.tanh %182 : vector<16x256xf32>
    %184 = arith.mulf %180, %163 : vector<16x256xf32>
    %185 = arith.mulf %179, %183 : vector<16x256xf32>
    %186 = arith.addf %184, %185 : vector<16x256xf32>
    %187 = math.tanh %186 : vector<16x256xf32>
    %188 = arith.mulf %181, %187 : vector<16x256xf32>
    %c7_i32_56 = arith.constant 7 : i32
    %189 = arith.truncf %188 : vector<16x256xf32> to vector<16x256xbf16>
    %c0_57 = arith.constant 0 : index
    %c0_58 = arith.constant 0 : index
    %190 = vector.load %arg5[%c0_57, %c0_58] : memref<256x128xbf16, #tpu.memory_space<vmem>>, vector<256x128xbf16>
    %cst_59 = arith.constant dense<0.000000e+00> : vector<16x128xf32>
    %191 = tpu.matmul %189, %190, %cst_59 {dimension_numbers = #tpu.dot_dimension_numbers<[1], [0], [0], [1], [0, 0, 1, 1], [], []>} : vector<16x256xbf16>, vector<256x128xbf16>, vector<16x128xf32> -> vector<16x128xf32>
    %c0_60 = arith.constant 0 : index
    %c0_61 = arith.constant 0 : index
    %192 = vector.load %arg6[%c0_60, %c0_61] : memref<1x128xf32, #tpu.memory_space<vmem>>, vector<1x128xf32>
    %193 = vector.broadcast %192 : vector<1x128xf32> to vector<16x128xf32>
    %194 = arith.addf %191, %193 : vector<16x128xf32>
    %c0_62 = arith.constant 0 : index
    %c0_63 = arith.constant 0 : index
    %195 = vector.load %arg7[%c0_62, %c0_63] : memref<16x128xf32, #tpu.memory_space<vmem>>, vector<16x128xf32>
    tpu.vector_store %arg7[%c0_62, %c0_63], %194 {strides = array<i32>} : memref<16x128xf32, #tpu.memory_space<vmem>>, vector<16x128xf32>,
    return
  }
  func.func @transform_0(%arg0: i32) -> (i32, i32, i32) {
    %c0_i32 = arith.constant 0 : i32
    %c0_i32_0 = arith.constant 0 : i32
    %c0_i32_1 = arith.constant 0 : i32
    return %c0_i32, %arg0, %c0_i32_0 : i32, i32, i32
  }
  func.func @transform_1(%arg0: i32) -> (i32, i32) {
    %c0_i32 = arith.constant 0 : i32
    %c0_i32_0 = arith.constant 0 : i32
    %c0_i32_1 = arith.constant 0 : i32
    return %c0_i32, %c0_i32_0 : i32, i32
  }
  func.func @transform_2(%arg0: i32) -> (i32, i32) {
    %c0_i32 = arith.constant 0 : i32
    %c0_i32_0 = arith.constant 0 : i32
    %c0_i32_1 = arith.constant 0 : i32
    return %c0_i32, %c0_i32_0 : i32, i32
  }
  func.func @transform_3(%arg0: i32) -> (i32, i32) {
    %c0_i32 = arith.constant 0 : i32
    %c0_i32_0 = arith.constant 0 : i32
    %c0_i32_1 = arith.constant 0 : i32
    return %c0_i32, %c0_i32_0 : i32, i32
  }
  func.func @transform_4(%arg0: i32) -> (i32, i32) {
    %c0_i32 = arith.constant 0 : i32
    %c0_i32_0 = arith.constant 0 : i32
    %c0_i32_1 = arith.constant 0 : i32
    return %c0_i32, %c0_i32_0 : i32, i32
  }
  func.func @transform_5(%arg0: i32) -> (i32, i32) {
    %c0_i32 = arith.constant 0 : i32
    %c0_i32_0 = arith.constant 0 : i32
    %c0_i32_1 = arith.constant 0 : i32
    return %c0_i32, %c0_i32_0 : i32, i32
  }
  func.func @transform_6(%arg0: i32) -> (i32, i32) {
    %c0_i32 = arith.constant 0 : i32
    %c0_i32_0 = arith.constant 0 : i32
    return %arg0, %c0_i32 : i32, i32
  }
}

</mosaic_0001>

<bundles_post_ra>
// kernel: tpu_custom_call.1
= control target key start
LH: loop header
LB: loop body
LE: loop exit
PB: predicated region body
PF: predicated region fallthrough
CT: control target
= control target key end

     0   :  { %11 = vsyncpa [#allocation4], 0  ;;  %s7179_s0 = inlined_call_operand.hbm [shape: bf16[8,16,128], index: 0, kind: input, shape index: {}]   ;;  %s7180_s1 = inlined_call_operand.hbm [shape: bf16[128,1024], index: 1, kind: input, shape index: {}]   ;;  %s7181_s2 = inlined_call_operand.hbm [shape: bf16[256,1024], index: 2, kind: input, shape index: {}]   ;;  %s7182_s3 = inlined_call_operand.vmem [shape: f32[1,1024], index: 3, kind: input, shape index: {}]   ;;  %s7183_s4 = inlined_call_operand.hbm [shape: bf16[256,128], index: 4, kind: input, shape index: {}]   ;;  %s7184_s5 = inlined_call_operand.vmem [shape: f32[1,128], index: 5, kind: input, shape index: {}]   ;;  %s7185_s6 = inlined_call_operand.hbm [shape: f32[16,128], index: 6, kind: output, shape index: {}]  }
   0x1   :  { %12 = vsyncpa [#allocation7], 0 }
   0x2   :  { %13 = vsyncpa [#allocation10], 0 }
   0x3   :  { %14 = vsyncpa [#allocation5], 0  ;;  %s5519_s21 = smov [#allocation6]   ;;  %s5401_s25 = scalar_lea.hbm %s7180_s1, 8192 }
   0x4   :  { %s32_s22 = sshll.u32 %s5519_s21, 4  ;;  %p5402_p0 = scmp.ne.s32.totalorder %s7180_s1, %s5401_s25  ;;  %s33_s22 = int_to_ptr.vmem [resolvable:$true] %s32_s22 }
   0x5   :  { %p5405_p1 = scmp.lt.u32.totalorder %s5401_s25, %s7180_s1 }
   0x7   :  { %p5407_p2 = pnand %p5405_p1, %p5402_p0 }
   0x9   :  { %5410 = shalt.err (!%p5407_p2)
}
   0xa   :  { %s5411_s30 = scalar_lea.vmem %s33_s22, 8192  ;;  %p5416_p4 = scmp.lt.s32.totalorder %s33_s22, %s33_s22 }
   0xb   :  { %p5412_p3 = scmp.ne.s32.totalorder %s33_s22, %s5411_s30  ;;  %p5417_p5 = scmp.lt.s32.totalorder %s5411_s30, %s5411_s30 }
   0xd   :  { %p5418_p6 = por %p5417_p5, %p5416_p4 }
   0xf   :  { %p5419_p7 = pnand %p5418_p6, %p5412_p3 }
  0x11   :  { %5422 = shalt.err (!%p5419_p7)
}
  0x12   :  { %s5520_s7 = smov 512   ;;  %s5521_s8 = smov 32  }
  0x13   :  { %38 = dma.hbm_to_vmem [thread:$0]  %s7180_s1, 8192, %s33_s22, [#allocation7], %s5520_s7, %s5520_s7, %s5521_s8  }
  0x14   :  { %s5522_s11 = smov [#allocation3]   ;;  %s5423_s15 = scalar_lea.hbm %s7179_s0, 1024 }
  0x15   :  { %s20_s12 = sshll.u32 %s5522_s11, 4  ;;  %p5424_p8 = scmp.ne.s32.totalorder %s7179_s0, %s5423_s15  ;;  %s21_s12 = int_to_ptr.vmem [resolvable:$true] %s20_s12 }
  0x16   :  { %p5427_p9 = scmp.lt.u32.totalorder %s5423_s15, %s7179_s0 }
  0x18   :  { %p5429_p10 = pnand %p5427_p9, %p5424_p8 }
  0x1a   :  { %5432 = shalt.err (!%p5429_p10)
}
  0x1b   :  { %s5433_s20 = scalar_lea.vmem %s21_s12, 1024  ;;  %p5438_p12 = scmp.lt.s32.totalorder %s21_s12, %s21_s12 }
  0x1c   :  { %p5434_p11 = scmp.ne.s32.totalorder %s21_s12, %s5433_s20  ;;  %p5439_p13 = scmp.lt.s32.totalorder %s5433_s20, %s5433_s20 }
  0x1e   :  { %p5440_p0 = por %p5439_p13, %p5438_p12 }
  0x20   :  { %p5441_p1 = pnand %p5440_p0, %p5434_p11 }
  0x22   :  { %5444 = shalt.err (!%p5441_p1)
}
  0x23   :  { %s5523_s1 = smov 64   ;;  %s5524_s21 = smov 4  }
  0x24   :  { %26 = dma.hbm_to_vmem [thread:$0]  %s7179_s0, 1024, %s21_s12, [#allocation4], %s5523_s1, %s5523_s1, %s5524_s21  }
  0x25   :  { %s5525_s24 = smov [#allocation8]   ;;  %s5526_s26 = smov [#allocation9]  }
  0x26   :  { %s44_s25 = sshll.u32 %s5525_s24, 4  ;;  %s58_s27 = sshll.u32 %s5526_s26, 4  ;;  %s45_s25 = int_to_ptr.vmem [resolvable:$true] %s44_s25  ;;  %s5596_s27 = int_to_ptr.vmem [resolvable:$true] %s58_s27 }
  0x27   :  { %s5445_s30 = scalar_lea.hbm %s7181_s2, 16384 }
  0x28   :  { %p5446_p2 = scmp.ne.s32.totalorder %s7181_s2, %s5445_s30  ;;  %p5449_p3 = scmp.lt.u32.totalorder %s5445_s30, %s7181_s2 }
  0x2a   :  { %p5451_p4 = pnand %p5449_p3, %p5446_p2 }
  0x2c   :  { %5454 = shalt.err (!%p5451_p4)
}
  0x2d   :  { %s5455_s0 = scalar_lea.vmem %s45_s25, 16384  ;;  %p5460_p6 = scmp.lt.s32.totalorder %s45_s25, %s45_s25 }
  0x2e   :  { %p5456_p5 = scmp.ne.s32.totalorder %s45_s25, %s5455_s0  ;;  %p5461_p7 = scmp.lt.s32.totalorder %s5455_s0, %s5455_s0 }
  0x30   :  { %p5462_p8 = por %p5461_p7, %p5460_p6 }
  0x32   :  { %p5463_p9 = pnand %p5462_p8, %p5456_p5 }
  0x34   :  { %5466 = shalt.err (!%p5463_p9)
}
  0x35   :  { %50 = dma.hbm_to_vmem [thread:$0]  %s7181_s2, 16384, %s45_s25, [#allocation7], %s5520_s7, %s5520_s7, %s5521_s8  }
  0x36   :  { %s5467_s17 = scalar_lea.hbm %s7183_s4, 2048 }
  0x37   :  { %p5468_p10 = scmp.ne.s32.totalorder %s7183_s4, %s5467_s17  ;;  %p5471_p11 = scmp.lt.u32.totalorder %s5467_s17, %s7183_s4 }
  0x39   :  { %p5473_p12 = pnand %p5471_p11, %p5468_p10 }
  0x3b   :  { %5476 = shalt.err (!%p5473_p12)
}
  0x3c   :  { %s5477_s23 = scalar_lea.vmem %s5596_s27, 2048  ;;  %p5482_p0 = scmp.lt.s32.totalorder %s5596_s27, %s5596_s27 }
  0x3d   :  { %p5478_p13 = scmp.ne.s32.totalorder %s5596_s27, %s5477_s23  ;;  %p5483_p1 = scmp.lt.s32.totalorder %s5477_s23, %s5477_s23 }
  0x3f   :  { %p5484_p2 = por %p5483_p1, %p5482_p0 }
  0x41   :  { %p5485_p3 = pnand %p5484_p2, %p5478_p13 }
  0x43   :  { %5488 = shalt.err (!%p5485_p3)
}
  0x44   :  { %64 = dma.hbm_to_vmem [thread:$0]  %s7183_s4, 2048, %s5596_s27, [#allocation10], %s5523_s1, %s5523_s1, %s5524_s21  }
  0x45   :  { %5511 = dma.done.wait [#allocation4], 1024  }
  0x46   :  { %5512 = vsyncadd [#allocation4], 4294966272 }
  0x47   :  { %5513 = dma.done.wait [#allocation7], 24576  }
  0x48   :  { %5514 = vsyncadd [#allocation7], 4294942720 }
  0x49   :  { %5515 = dma.done.wait [#allocation10], 2048  }
  0x4a   :  { %5516 = vsyncadd [#allocation10], 4294965248  ;;  %v5527_v0 = vmov 0   ;;  %v96_v1 = vld [vmem:[#allocation6] sm:$0xff]  ;;  %v97_v3 = vld [vmem:[#allocation6 + $0x8] sm:$0xff]  ;;  %s5528_s21 = smov [#allocation11]  }
  0x4b   :  { %602 = vmatprep.mubr.bf16.mxu0 %v5527_v0  ;;  %715 = vmatprep.mubr.bf16.mxu1 %v5527_v0  ;;  %v100_v2 = vld [vmem:[#allocation6 + $0x20] sm:$0xff]  ;;  %v101_v5 = vld [vmem:[#allocation6 + $0x28] sm:$0xff]  ;;  %v98_v63 = vld [vmem:[#allocation6 + $0x10] sm:$0xff]  ;;  %s4300_s24 = sshll.u32 %s5528_s21, 4  ;;  %s4301_s24 = int_to_ptr.vmem [resolvable:$true] %s4300_s24 }
  0x4c   :  { %v4323_v4 = vcombine.high %v96_v1, %v100_v2  ;;  %v4322_v6 = vcombine.low %v96_v1, %v100_v2  ;;  %v104_v7 = vld [vmem:[#allocation6 + $0x40] sm:$0xff]  ;;  %v4325_v9 = vcombine.high %v97_v3, %v101_v5  ;;  %v4324_v10 = vcombine.low %v97_v3, %v101_v5  ;;  %v105_v12 = vld [vmem:[#allocation6 + $0x48] sm:$0xff]  ;;  %v102_v1 = vld [vmem:[#allocation6 + $0x30] sm:$0xff]  ;;  %s5489_s25 = scalar_lea.vmem %s4301_s24, 256  ;;  %p5494_p5 = scmp.lt.s32.totalorder %s4301_s24, %s4301_s24 }
  0x4d   :  { %v108_v8 = vld [vmem:[#allocation6 + $0x60] sm:$0xff]  ;;  %v109_v13 = vld [vmem:[#allocation6 + $0x68] sm:$0xff]  ;;  %v99_v2 = vld [vmem:[#allocation6 + $0x18] sm:$0xff]  ;;  %p5490_p4 = scmp.ne.s32.totalorder %s4301_s24, %s5489_s25  ;;  %p5495_p6 = scmp.lt.s32.totalorder %s5489_s25, %s5489_s25 }
  0x4e   :  { %v4331_v11 = vcombine.high %v104_v7, %v108_v8  ;;  %v112_v14 = vld [vmem:[#allocation6 + $0x80] sm:$0xff]  ;;  %570 = vmatprep.subr.bf16.mxu0 %v4323_v4  ;;  %v4333_v15 = vcombine.high %v105_v12, %v109_v13  ;;  %v113_v17 = vld [vmem:[#allocation6 + $0x88] sm:$0xff]  ;;  %683 = vmatprep.subr.bf16.mxu1 %v4325_v9  ;;  %v4330_v19 = vcombine.low %v104_v7, %v108_v8  ;;  %v103_v3 = vld [vmem:[#allocation6 + $0x38] sm:$0xff] }
  0x4f   :  { %v116_v16 = vld [vmem:[#allocation6 + $0xa0] sm:$0xff]  ;;  %v117_v18 = vld [vmem:[#allocation6 + $0xa8] sm:$0xff]  ;;  %571 = vmatpush1.bf16.msra.mxu0 %v4322_v6  ;;  %684 = vmatpush1.bf16.msra.mxu1 %v4324_v10  ;;  %v4332_v20 = vcombine.low %v105_v12, %v109_v13  ;;  %v4327_v7 = vcombine.high %v98_v63, %v102_v1  ;;  %v106_v8 = vld [vmem:[#allocation6 + $0x50] sm:$0xff]  ;;  %v4329_v10 = vcombine.high %v99_v2, %v103_v3  ;;  %p5496_p7 = por %p5495_p6, %p5494_p5 }
  0x50   :  { %572 = vmatprep.subr.bf16.mxu0 %v4331_v11  ;;  %v4339_v21 = vcombine.high %v112_v14, %v116_v16  ;;  %685 = vmatprep.subr.bf16.mxu1 %v4333_v15  ;;  %v4341_v22 = vcombine.high %v113_v17, %v117_v18  ;;  %v120_v23 = vld [vmem:[#allocation6 + $0xc0] sm:$0xff]  ;;  %v121_v25 = vld [vmem:[#allocation6 + $0xc8] sm:$0xff]  ;;  %v4338_v27 = vcombine.low %v112_v14, %v116_v16  ;;  %v110_v9 = vld [vmem:[#allocation6 + $0x70] sm:$0xff] }
  0x51   :  { %v124_v24 = vld [vmem:[#allocation6 + $0xe0] sm:$0xff]  ;;  %v125_v26 = vld [vmem:[#allocation6 + $0xe8] sm:$0xff]  ;;  %v4340_v28 = vcombine.low %v113_v17, %v117_v18  ;;  %v107_v11 = vld [vmem:[#allocation6 + $0x58] sm:$0xff]  ;;  %v4326_v13 = vcombine.low %v98_v63, %v102_v1  ;;  %v4328_v16 = vcombine.low %v99_v2, %v103_v3  ;;  %p5497_p8 = pnand %p5496_p7, %p5490_p4 }
  0x52   :  { %v4347_v29 = vcombine.high %v120_v23, %v124_v24  ;;  %v4349_v30 = vcombine.high %v121_v25, %v125_v26  ;;  %v128_v31 = vld [vmem:[#allocation6 + $0x100] sm:$0xff]  ;;  %v129_v33 = vld [vmem:[#allocation6 + $0x108] sm:$0xff]  ;;  %v4346_v35 = vcombine.low %v120_v23, %v124_v24  ;;  %v4348_v36 = vcombine.low %v121_v25, %v125_v26  ;;  %v111_v12 = vld [vmem:[#allocation6 + $0x78] sm:$0xff] }
  0x53   :  { %573 = vmatpush1.bf16.msra.mxu0 %v4330_v19  ;;  %686 = vmatpush1.bf16.msra.mxu1 %v4332_v20  ;;  %v132_v32 = vld [vmem:[#allocation6 + $0x120] sm:$0xff]  ;;  %v133_v34 = vld [vmem:[#allocation6 + $0x128] sm:$0xff]  ;;  %v114_v14 = vld [vmem:[#allocation6 + $0x90] sm:$0xff]  ;;  %v4335_v19 = vcombine.high %v106_v8, %v110_v9  ;;  %v4337_v20 = vcombine.high %v107_v11, %v111_v12  ;;  %v4336_v23 = vcombine.low %v107_v11, %v111_v12 }
  0x54   :  { %574 = vmatprep.subr.bf16.mxu0 %v4339_v21  ;;  %687 = vmatprep.subr.bf16.mxu1 %v4341_v22  ;;  %v4355_v37 = vcombine.high %v128_v31, %v132_v32  ;;  %v4357_v38 = vcombine.high %v129_v33, %v133_v34  ;;  %v136_v39 = vld [vmem:[#allocation6 + $0x140] sm:$0xff]  ;;  %v137_v41 = vld [vmem:[#allocation6 + $0x148] sm:$0xff]  ;;  %v4354_v43 = vcombine.low %v128_v31, %v132_v32  ;;  %v118_v15 = vld [vmem:[#allocation6 + $0xb0] sm:$0xff] }
  0x55   :  { %v140_v40 = vld [vmem:[#allocation6 + $0x160] sm:$0xff]  ;;  %v141_v42 = vld [vmem:[#allocation6 + $0x168] sm:$0xff]  ;;  %v4356_v44 = vcombine.low %v129_v33, %v133_v34  ;;  %v115_v17 = vld [vmem:[#allocation6 + $0x98] sm:$0xff]  ;;  %v4334_v21 = vcombine.low %v106_v8, %v110_v9  ;;  %v4343_v24 = vcombine.high %v114_v14, %v118_v15 }
  0x56   :  { %v4363_v45 = vcombine.high %v136_v39, %v140_v40  ;;  %v4365_v46 = vcombine.high %v137_v41, %v141_v42  ;;  %v144_v47 = vld [vmem:[#allocation6 + $0x180] sm:$0xff]  ;;  %v145_v49 = vld [vmem:[#allocation6 + $0x188] sm:$0xff]  ;;  %v4362_v51 = vcombine.low %v136_v39, %v140_v40  ;;  %v4364_v52 = vcombine.low %v137_v41, %v141_v42  ;;  %v119_v18 = vld [vmem:[#allocation6 + $0xb8] sm:$0xff] }
  0x57   :  { %575 = vmatpush1.bf16.msra.mxu0 %v4338_v27  ;;  %688 = vmatpush1.bf16.msra.mxu1 %v4340_v28  ;;  %v148_v48 = vld [vmem:[#allocation6 + $0x1a0] sm:$0xff]  ;;  %v149_v50 = vld [vmem:[#allocation6 + $0x1a8] sm:$0xff]  ;;  %v122_v25 = vld [vmem:[#allocation6 + $0xd0] sm:$0xff]  ;;  %v4345_v27 = vcombine.high %v115_v17, %v119_v18  ;;  %v4344_v31 = vcombine.low %v115_v17, %v119_v18 }
  0x58   :  { %576 = vmatprep.subr.bf16.mxu0 %v4347_v29  ;;  %689 = vmatprep.subr.bf16.mxu1 %v4349_v30  ;;  %v4371_v53 = vcombine.high %v144_v47, %v148_v48  ;;  %v152_v54 = vld [vmem:[#allocation6 + $0x1c0] sm:$0xff]  ;;  %v4373_v55 = vcombine.high %v145_v49, %v149_v50  ;;  %v153_v57 = vld [vmem:[#allocation6 + $0x1c8] sm:$0xff]  ;;  %v4370_v59 = vcombine.low %v144_v47, %v148_v48  ;;  %v126_v26 = vld [vmem:[#allocation6 + $0xf0] sm:$0xff] }
  0x59   :  { %v156_v56 = vld [vmem:[#allocation6 + $0x1e0] sm:$0xff]  ;;  %v157_v58 = vld [vmem:[#allocation6 + $0x1e8] sm:$0xff]  ;;  %v4372_v60 = vcombine.low %v145_v49, %v149_v50  ;;  %v123_v28 = vld [vmem:[#allocation6 + $0xd8] sm:$0xff]  ;;  %v4342_v30 = vcombine.low %v114_v14, %v118_v15  ;;  %v4351_v32 = vcombine.high %v122_v25, %v126_v26 }
  0x5a   :  { %v4379_v61 = vcombine.high %v152_v54, %v156_v56  ;;  %v4381_v62 = vcombine.high %v153_v57, %v157_v58  ;;  %v4378_v4 = vcombine.low %v152_v54, %v156_v56  ;;  %v4380_v5 = vcombine.low %v153_v57, %v157_v58  ;;  %v5635_v6 = vld [vmem:[#allocation3] sm:$0xff]   ;;  %v5640_v22 = vld [vmem:[#allocation3 + $0x8] sm:$0xff]   ;;  %v127_v29 = vld [vmem:[#allocation6 + $0xf8] sm:$0xff] }
  0x5b   :  { %577 = vmatpush1.bf16.msra.mxu0 %v4346_v35  ;;  %690 = vmatpush1.bf16.msra.mxu1 %v4348_v36  ;;  %v4353_v33 = vcombine.high %v123_v28, %v127_v29  ;;  %v130_v34 = vld [vmem:[#allocation6 + $0x110] sm:$0xff]  ;;  %v131_v36 = vld [vmem:[#allocation6 + $0x118] sm:$0xff]  ;;  %v4352_v39 = vcombine.low %v123_v28, %v127_v29  ;;  %v4885_v8 = vld [vmem:[#allocation3 + $0x20] sm:$0xff]  }
  0x5c   :  { %578 = vmatprep.subr.bf16.mxu0 %v4355_v37  ;;  %691 = vmatprep.subr.bf16.mxu1 %v4357_v38  ;;  %v134_v35 = vld [vmem:[#allocation6 + $0x130] sm:$0xff]  ;;  %v135_v37 = vld [vmem:[#allocation6 + $0x138] sm:$0xff]  ;;  %v4350_v38 = vcombine.low %v122_v25, %v126_v26  ;;  %v4886_v9 = vld [vmem:[#allocation3 + $0x28] sm:$0xff]  }
  0x5d   :  { %v4359_v40 = vcombine.high %v130_v34, %v134_v35  ;;  %v5647_v41 = vld [vmem:[#allocation3 + $0x10] sm:$0xff]   ;;  %v4361_v42 = vcombine.high %v131_v36, %v135_v37  ;;  %v4358_v47 = vcombine.low %v130_v34, %v134_v35  ;;  %v4360_v48 = vcombine.low %v131_v36, %v135_v37  ;;  %v151_v54 = vld [vmem:[#allocation6 + $0x1b8] sm:$0xff]  ;;  %v1249_v12 = vld [vmem:[#allocation8 + $0x20] sm:$0xff] }
  0x5e   :  { %v4884_v58 = vld [vmem:[#allocation3 + $0x18] sm:$0xff]   ;;  %v1250_v15 = vld [vmem:[#allocation8 + $0x28] sm:$0xff]  ;;  %v1253_v17 = vld [vmem:[#allocation8 + $0x40] sm:$0xff] }
  0x5f   :  { %579 = vmatpush1.bf16.msra.mxu0 %v4354_v43  ;;  %692 = vmatpush1.bf16.msra.mxu1 %v4356_v44  ;;  %v138_v43 = vld [vmem:[#allocation6 + $0x150] sm:$0xff]  ;;  %v159_v63 = vld [vmem:[#allocation6 + $0x1f8] sm:$0xff]  ;;  %v1257_v18 = vld [vmem:[#allocation8 + $0x60] sm:$0xff] }
  0x60   :  { %580 = vmatprep.subr.bf16.mxu0 %v4363_v45  ;;  %693 = vmatprep.subr.bf16.mxu1 %v4365_v46  ;;  %v142_v44 = vld [vmem:[#allocation6 + $0x170] sm:$0xff]  ;;  %v139_v45 = vld [vmem:[#allocation6 + $0x158] sm:$0xff]  ;;  %v1265_v26 = vld [vmem:[#allocation8 + $0xa0] sm:$0xff]  ;;  %v5704_v29 = vcombine.low %v1253_v17, %v1257_v18 }
  0x61   :  { %v143_v46 = vld [vmem:[#allocation6 + $0x178] sm:$0xff]  ;;  %v4367_v49 = vcombine.high %v138_v43, %v142_v44  ;;  %v1266_v28 = vld [vmem:[#allocation8 + $0xa8] sm:$0xff]  ;;  %v1273_v34 = vld [vmem:[#allocation8 + $0xe0] sm:$0xff] }
  0x62   :  { %v4369_v50 = vcombine.high %v139_v45, %v143_v46  ;;  %v4368_v56 = vcombine.low %v139_v45, %v143_v46  ;;  %v5665_v11 = vld [vmem:[#allocation3 + $0x38] sm:$0xff]   ;;  %7523 = vst [vmem:[#allocation22_spill] sm:$0xff] %v5704_v29  ;;  %v1270_v35 = vld [vmem:[#allocation8 + $0xc8] sm:$0xff] }
  0x63   :  { %581 = vmatpush1.bf16.msra.mxu0 %v4362_v51  ;;  %694 = vmatpush1.bf16.msra.mxu1 %v4364_v52  ;;  %v146_v51 = vld [vmem:[#allocation6 + $0x190] sm:$0xff]  ;;  %v1274_v36 = vld [vmem:[#allocation8 + $0xe8] sm:$0xff] }
  0x64   :  { %582 = vmatprep.subr.bf16.mxu0 %v4371_v53  ;;  %695 = vmatprep.subr.bf16.mxu1 %v4373_v55  ;;  %v150_v52 = vld [vmem:[#allocation6 + $0x1b0] sm:$0xff]  ;;  %v147_v53 = vld [vmem:[#allocation6 + $0x198] sm:$0xff]  ;;  %v4366_v55 = vcombine.low %v138_v43, %v142_v44  ;;  %v1278_v43 = vld [vmem:[#allocation8 + $0x108] sm:$0xff]  ;;  %v5736_v46 = vcombine.low %v1270_v35, %v1274_v36 }
  0x65   :  { %v4375_v57 = vcombine.high %v146_v51, %v150_v52  ;;  %v4374_v1 = vcombine.low %v146_v51, %v150_v52  ;;  %v4376_v2 = vcombine.low %v147_v53, %v151_v54  ;;  %v1282_v44 = vld [vmem:[#allocation8 + $0x128] sm:$0xff] }
  0x66   :  { %7532 = vst [vmem:[#allocation31_spill] sm:$0xff] %v5736_v46  ;;  %v1286_v51 = vld [vmem:[#allocation8 + $0x148] sm:$0xff] }
  0x67   :  { %583 = vmatpush1.bf16.msra.mxu0 %v4370_v59  ;;  %696 = vmatpush1.bf16.msra.mxu1 %v4372_v60  ;;  %v4377_v59 = vcombine.high %v147_v53, %v151_v54  ;;  %v154_v60 = vld [vmem:[#allocation6 + $0x1d0] sm:$0xff]  ;;  %v1290_v52 = vld [vmem:[#allocation8 + $0x168] sm:$0xff] }
  0x68   :  { %584 = vmatprep.subr.bf16.mxu0 %v4379_v61  ;;  %697 = vmatprep.subr.bf16.mxu1 %v4381_v62  ;;  %v158_v61 = vld [vmem:[#allocation6 + $0x1f0] sm:$0xff]  ;;  %v155_v62 = vld [vmem:[#allocation6 + $0x1d8] sm:$0xff] }
  0x69   :  { %v4383_v3 = vcombine.high %v154_v60, %v158_v61 }
  0x6b   :  { %585 = vmatpush1.bf16.msra.mxu0 %v4378_v4  ;;  %698 = vmatpush1.bf16.msra.mxu1 %v4380_v5  ;;  %v4385_v4 = vcombine.high %v155_v62, %v159_v63  ;;  %v4382_v5 = vcombine.low %v154_v60, %v158_v61  ;;  %v5762_v61 = vcombine.low %v1286_v51, %v1290_v52 }
  0x6c   :  { %796 = vmatprep.subr.bf16.mxu0 %v4327_v7  ;;  %909 = vmatprep.subr.bf16.mxu1 %v4329_v10  ;;  %v4384_v7 = vcombine.low %v155_v62, %v159_v63  ;;  %v5659_v10 = vld [vmem:[#allocation3 + $0x30] sm:$0xff]  }
  0x6d   :  { %7540 = vst [vmem:[#allocation39_spill] sm:$0xff] %v5762_v61 }
  0x6e   :  { %603 = vmatmul.mubr.bf16.vlgmr.msra.gmra.mrb[0].mxu0 %v5635_v6  ;;  %716 = vmatmul.mubr.bf16.vlgmr.msra.gmra.mrb[0].mxu1 %v5635_v6 }
  0x6f   :  { %797 = vmatpush1.bf16.msra.mxu0 %v4326_v13  ;;  %910 = vmatpush1.bf16.msra.mxu1 %v4328_v16  ;;  %v1246_v13 = vld [vmem:[#allocation8 + $0x8] sm:$0xff] }
  0x70   :  { %612 = vmatprep.mubr.bf16.mxu0 %v5527_v0  ;;  %725 = vmatprep.mubr.bf16.mxu1 %v5527_v0 }
  0x71   :  { %798 = vmatprep.subr.bf16.mxu0 %v4335_v19  ;;  %911 = vmatprep.subr.bf16.mxu1 %v4337_v20  ;;  %v5692_v19 = vcombine.high %v1246_v13, %v1250_v15  ;;  %v5694_v20 = vcombine.low %v1246_v13, %v1250_v15  ;;  %v1310_v13 = vld [vmem:[#allocation8 + $0x208] sm:$0xff] }
  0x73   :  { %799 = vmatpush1.bf16.msra.mxu0 %v4334_v21  ;;  %912 = vmatpush1.bf16.msra.mxu1 %v4336_v23  ;;  %7519 = vst [vmem:[#allocation18_spill] sm:$0xff] %v5692_v19  ;;  %7520 = vst [vmem:[#allocation19_spill] sm:$0xff] %v5694_v20  ;;  %v5696_v21 = vcombine.high %v1253_v17, %v1257_v18  ;;  %v1258_v23 = vld [vmem:[#allocation8 + $0x68] sm:$0xff] }
  0x74   :  { %800 = vmatprep.subr.bf16.mxu0 %v4343_v24  ;;  %913 = vmatprep.subr.bf16.mxu1 %v4345_v27  ;;  %v1261_v24 = vld [vmem:[#allocation8 + $0x80] sm:$0xff]  ;;  %v1262_v27 = vld [vmem:[#allocation8 + $0x88] sm:$0xff] }
  0x75   :  { %7521 = vst [vmem:[#allocation20_spill] sm:$0xff] %v5696_v21  ;;  %v5716_v37 = vcombine.low %v1261_v24, %v1265_v26  ;;  %v1314_v17 = vld [vmem:[#allocation8 + $0x228] sm:$0xff] }
  0x76   :  { %613 = vmatmul.mubr.bf16.gmra.mrb[4].mxu0 %v5640_v22  ;;  %726 = vmatmul.mubr.bf16.gmra.mrb[4].mxu1 %v5640_v22  ;;  %v5793_v18 = vcombine.high %v1310_v13, %v1314_v17 }
  0x77   :  { %622 = vmatprep.mubr.bf16.mxu0 %v5527_v0  ;;  %735 = vmatprep.mubr.bf16.mxu1 %v5527_v0  ;;  %7527 = vst [vmem:[#allocation26_spill] sm:$0xff] %v5716_v37 }
  0x78   :  { %801 = vmatpush1.bf16.msra.mxu0 %v4342_v30  ;;  %914 = vmatpush1.bf16.msra.mxu1 %v4344_v31  ;;  %v5710_v31 = vcombine.high %v1261_v24, %v1265_v26  ;;  %7550 = vst [vmem:[#allocation49_spill] sm:$0xff] %v5793_v18  ;;  %v1317_v24 = vld [vmem:[#allocation8 + $0x240] sm:$0xff] }
  0x79   :  { %802 = vmatprep.subr.bf16.mxu0 %v4351_v32  ;;  %915 = vmatprep.subr.bf16.mxu1 %v4353_v33  ;;  %v5713_v32 = vcombine.high %v1262_v27, %v1266_v28  ;;  %v1269_v33 = vld [vmem:[#allocation8 + $0xc0] sm:$0xff] }
  0x7a   :  { %7525 = vst [vmem:[#allocation24_spill] sm:$0xff] %v5710_v31  ;;  %v5731_v45 = vcombine.low %v1269_v33, %v1273_v34  ;;  %v1321_v26 = vld [vmem:[#allocation8 + $0x260] sm:$0xff] }
  0x7b   :  { %7526 = vst [vmem:[#allocation25_spill] sm:$0xff] %v5713_v32 }
  0x7c   :  { %803 = vmatpush1.bf16.msra.mxu0 %v4350_v38  ;;  %916 = vmatpush1.bf16.msra.mxu1 %v4352_v39  ;;  %v5720_v38 = vcombine.low %v1262_v27, %v1266_v28  ;;  %v5722_v39 = vcombine.high %v1269_v33, %v1273_v34  ;;  %7531 = vst [vmem:[#allocation30_spill] sm:$0xff] %v5731_v45  ;;  %v1318_v27 = vld [vmem:[#allocation8 + $0x248] sm:$0xff] }
  0x7d   :  { %804 = vmatprep.subr.bf16.mxu0 %v4359_v40  ;;  %917 = vmatprep.subr.bf16.mxu1 %v4361_v42  ;;  %v5725_v40 = vcombine.high %v1270_v35, %v1274_v36  ;;  %v1281_v42 = vld [vmem:[#allocation8 + $0x120] sm:$0xff]  ;;  %v5803_v28 = vcombine.high %v1317_v24, %v1321_v26  ;;  %v1322_v33 = vld [vmem:[#allocation8 + $0x268] sm:$0xff]  ;;  %v5807_v35 = vcombine.low %v1317_v24, %v1321_v26 }
  0x7e   :  { %623 = vmatmul.mubr.bf16.gmra.mrb[8].mxu0 %v5647_v41  ;;  %736 = vmatmul.mubr.bf16.gmra.mrb[8].mxu1 %v5647_v41  ;;  %7528 = vst [vmem:[#allocation27_spill] sm:$0xff] %v5720_v38  ;;  %7529 = vst [vmem:[#allocation28_spill] sm:$0xff] %v5722_v39  ;;  %v5805_v34 = vcombine.high %v1318_v27, %v1322_v33  ;;  %v5809_v36 = vcombine.low %v1318_v27, %v1322_v33  ;;  %v1346_v24 = vld [vmem:[#allocation8 + $0x328] sm:$0xff] }
  0x7f   :  { %632 = vmatprep.mubr.bf16.mxu0 %v5527_v0  ;;  %745 = vmatprep.mubr.bf16.mxu1 %v5527_v0  ;;  %7530 = vst [vmem:[#allocation29_spill] sm:$0xff] %v5725_v40  ;;  %7553 = vst [vmem:[#allocation52_spill] sm:$0xff] %v5803_v28 }
  0x80   :  { %805 = vmatpush1.bf16.msra.mxu0 %v4358_v47  ;;  %918 = vmatpush1.bf16.msra.mxu1 %v4360_v48  ;;  %v5741_v48 = vcombine.high %v1278_v43, %v1282_v44  ;;  %7554 = vst [vmem:[#allocation53_spill] sm:$0xff] %v5805_v34  ;;  %7555 = vst [vmem:[#allocation54_spill] sm:$0xff] %v5807_v35 }
  0x81   :  { %806 = vmatprep.subr.bf16.mxu0 %v4367_v49  ;;  %919 = vmatprep.subr.bf16.mxu1 %v4369_v50  ;;  %v1285_v49 = vld [vmem:[#allocation8 + $0x140] sm:$0xff]  ;;  %7556 = vst [vmem:[#allocation55_spill] sm:$0xff] %v5809_v36 }
  0x82   :  { %7534 = vst [vmem:[#allocation33_spill] sm:$0xff] %v5741_v48  ;;  %v1289_v50 = vld [vmem:[#allocation8 + $0x160] sm:$0xff] }
  0x83   :  { %v5750_v54 = vcombine.high %v1285_v49, %v1289_v50  ;;  %v5758_v60 = vcombine.low %v1285_v49, %v1289_v50  ;;  %v1330_v49 = vld [vmem:[#allocation8 + $0x2a8] sm:$0xff] }
  0x84   :  { %807 = vmatpush1.bf16.msra.mxu0 %v4366_v55  ;;  %920 = vmatpush1.bf16.msra.mxu1 %v4368_v56  ;;  %v5753_v55 = vcombine.high %v1286_v51, %v1290_v52  ;;  %v1293_v56 = vld [vmem:[#allocation8 + $0x180] sm:$0xff] }
  0x85   :  { %808 = vmatprep.subr.bf16.mxu0 %v4375_v57  ;;  %921 = vmatprep.subr.bf16.mxu1 %v4377_v59  ;;  %7537 = vst [vmem:[#allocation36_spill] sm:$0xff] %v5750_v54  ;;  %v1297_v57 = vld [vmem:[#allocation8 + $0x1a0] sm:$0xff]  ;;  %v1298_v59 = vld [vmem:[#allocation8 + $0x1a8] sm:$0xff]  ;;  %7539 = vst [vmem:[#allocation38_spill] sm:$0xff] %v5758_v60 }
  0x86   :  { %633 = vmatmul.mubr.bf16.gmra.mrb[12].mxu0 %v4884_v58  ;;  %746 = vmatmul.mubr.bf16.gmra.mrb[12].mxu1 %v4884_v58  ;;  %7538 = vst [vmem:[#allocation37_spill] sm:$0xff] %v5753_v55  ;;  %v5764_v62 = vcombine.high %v1293_v56, %v1297_v57 }
  0x87   :  { %642 = vmatprep.mubr.bf16.mxu0 %v5527_v0  ;;  %755 = vmatprep.mubr.bf16.mxu1 %v5527_v0 }
  0x88   :  { %809 = vmatpush1.bf16.msra.mxu0 %v4374_v1  ;;  %922 = vmatpush1.bf16.msra.mxu1 %v4376_v2  ;;  %7541 = vst [vmem:[#allocation40_spill] sm:$0xff] %v5764_v62  ;;  %v5770_v1 = vcombine.low %v1293_v56, %v1297_v57  ;;  %v1333_v56 = vld [vmem:[#allocation8 + $0x2c0] sm:$0xff] }
  0x89   :  { %810 = vmatprep.subr.bf16.mxu0 %v4383_v3  ;;  %923 = vmatprep.subr.bf16.mxu1 %v4385_v4  ;;  %v1301_v3 = vld [vmem:[#allocation8 + $0x1c0] sm:$0xff] }
  0x8a   :  { %7543 = vst [vmem:[#allocation42_spill] sm:$0xff] %v5770_v1  ;;  %v1305_v4 = vld [vmem:[#allocation8 + $0x1e0] sm:$0xff] }
  0x8b   :  { %v1337_v57 = vld [vmem:[#allocation8 + $0x2e0] sm:$0xff] }
  0x8c   :  { %811 = vmatpush1.bf16.msra.mxu0 %v4382_v5  ;;  %924 = vmatpush1.bf16.msra.mxu1 %v4384_v7  ;;  %v1302_v5 = vld [vmem:[#allocation8 + $0x1c8] sm:$0xff]  ;;  %v5779_v7 = vcombine.high %v1301_v3, %v1305_v4 }
  0x8d   :  { %2056 = vmatprep.subr.bf16.mxu1 %v5692_v19 }
  0x8e   :  { %643 = vmatmul.mubr.bf16.gmra.mrb[16].mxu0 %v4885_v8  ;;  %756 = vmatmul.mubr.bf16.gmra.mrb[16].mxu1 %v4885_v8  ;;  %7545 = vst [vmem:[#allocation44_spill] sm:$0xff] %v5779_v7 }
  0x8f   :  { %652 = vmatprep.mubr.bf16.mxu0 %v5527_v0  ;;  %765 = vmatprep.mubr.bf16.mxu1 %v5527_v0 }
  0x96   :  { %653 = vmatmul.mubr.bf16.gmra.mrb[20].mxu0 %v4886_v9  ;;  %766 = vmatmul.mubr.bf16.gmra.mrb[20].mxu1 %v4886_v9 }
  0x97   :  { %662 = vmatprep.mubr.bf16.mxu0 %v5527_v0  ;;  %775 = vmatprep.mubr.bf16.mxu1 %v5527_v0 }
  0x9e   :  { %663 = vmatmul.mubr.bf16.gmra.mrb[24].mxu0 %v5659_v10  ;;  %776 = vmatmul.mubr.bf16.gmra.mrb[24].mxu1 %v5659_v10 }
  0x9f   :  { %672 = vmatprep.mubr.bf16.mxu0 %v5527_v0  ;;  %785 = vmatprep.mubr.bf16.mxu1 %v5527_v0 }
  0xa6   :  { %673 = vmatmul.mubr.bf16.gmra.mrb[28].mxu0 %v5665_v11  ;;  %786 = vmatmul.mubr.bf16.gmra.mrb[28].mxu1 %v5665_v11 }
  0xa7   :  { %828 = vmatprep.mubr.bf16.mxu0 %v5527_v0  ;;  %941 = vmatprep.mubr.bf16.mxu1 %v5527_v0 }
  0xae   :  { %829 = vmatmul.mubr.bf16.vlgmr.msra.gmra.mrb[32].mxu0 %v5635_v6  ;;  %942 = vmatmul.mubr.bf16.vlgmr.msra.gmra.mrb[32].mxu1 %v5635_v6  ;;  %v1245_v6 = vld [vmem:[#allocation8] sm:$0xff] }
  0xaf   :  { %838 = vmatprep.mubr.bf16.mxu0 %v5527_v0  ;;  %951 = vmatprep.mubr.bf16.mxu1 %v5527_v0  ;;  %v5687_v14 = vcombine.high %v1245_v6, %v1249_v12  ;;  %v5689_v16 = vcombine.low %v1245_v6, %v1249_v12  ;;  %v1309_v6 = vld [vmem:[#allocation8 + $0x200] sm:$0xff] }
  0xb0   :  { %2057 = vmatpush1.bf16.msra.mxu1 %v5694_v20  ;;  %v1313_v12 = vld [vmem:[#allocation8 + $0x220] sm:$0xff] }
  0xb1   :  { %7517 = vst [vmem:[#allocation16_spill] sm:$0xff] %v5687_v14  ;;  %7518 = vst [vmem:[#allocation17_spill] sm:$0xff] %v5689_v16  ;;  %2013 = vmatprep.subr.bf16.mxu0 %v5687_v14  ;;  %v5791_v15 = vcombine.high %v1309_v6, %v1313_v12 }
  0xb2   :  { %2014 = vmatpush1.bf16.msra.mxu0 %v5689_v16 }
  0xb3   :  { %2015 = vmatprep.subr.bf16.mxu0 %v5696_v21  ;;  %7549 = vst [vmem:[#allocation48_spill] sm:$0xff] %v5791_v15 }
  0xb6   :  { %839 = vmatmul.mubr.bf16.gmra.mrb[36].mxu0 %v5640_v22  ;;  %952 = vmatmul.mubr.bf16.gmra.mrb[36].mxu1 %v5640_v22  ;;  %v1254_v22 = vld [vmem:[#allocation8 + $0x48] sm:$0xff] }
  0xb7   :  { %848 = vmatprep.mubr.bf16.mxu0 %v5527_v0  ;;  %961 = vmatprep.mubr.bf16.mxu1 %v5527_v0  ;;  %v5700_v25 = vcombine.high %v1254_v22, %v1258_v23  ;;  %v5708_v30 = vcombine.low %v1254_v22, %v1258_v23  ;;  %v5795_v22 = vcombine.low %v1309_v6, %v1313_v12  ;;  %v1341_v6 = vld [vmem:[#allocation8 + $0x300] sm:$0xff] }
  0xb8   :  { %2016 = vmatpush1.bf16.msra.mxu0 %v5704_v29  ;;  %v5797_v23 = vcombine.low %v1310_v13, %v1314_v17  ;;  %v1345_v12 = vld [vmem:[#allocation8 + $0x320] sm:$0xff]  ;;  %v1342_v13 = vld [vmem:[#allocation8 + $0x308] sm:$0xff] }
  0xb9   :  { %7522 = vst [vmem:[#allocation21_spill] sm:$0xff] %v5700_v25  ;;  %7524 = vst [vmem:[#allocation23_spill] sm:$0xff] %v5708_v30  ;;  %2058 = vmatprep.subr.bf16.mxu1 %v5700_v25  ;;  %2017 = vmatprep.subr.bf16.mxu0 %v5710_v31  ;;  %v5839_v17 = vcombine.high %v1341_v6, %v1345_v12  ;;  %v5841_v26 = vcombine.high %v1342_v13, %v1346_v24 }
  0xba   :  { %2059 = vmatpush1.bf16.msra.mxu1 %v5708_v30  ;;  %7551 = vst [vmem:[#allocation50_spill] sm:$0xff] %v5795_v22  ;;  %7552 = vst [vmem:[#allocation51_spill] sm:$0xff] %v5797_v23  ;;  %v5843_v27 = vcombine.low %v1341_v6, %v1345_v12  ;;  %v5845_v33 = vcombine.low %v1342_v13, %v1346_v24  ;;  %v1358_v12 = vld [vmem:[#allocation8 + $0x388] sm:$0xff] }
  0xbb   :  { %2060 = vmatprep.subr.bf16.mxu1 %v5713_v32  ;;  %7565 = vst [vmem:[#allocation64_spill] sm:$0xff] %v5839_v17  ;;  %7566 = vst [vmem:[#allocation65_spill] sm:$0xff] %v5841_v26  ;;  %v1362_v13 = vld [vmem:[#allocation8 + $0x3a8] sm:$0xff] }
  0xbc   :  { %2018 = vmatpush1.bf16.msra.mxu0 %v5716_v37  ;;  %7567 = vst [vmem:[#allocation66_spill] sm:$0xff] %v5843_v27  ;;  %7568 = vst [vmem:[#allocation67_spill] sm:$0xff] %v5845_v33 }
  0xbd   :  { %2019 = vmatprep.subr.bf16.mxu0 %v5722_v39 }
  0xbe   :  { %849 = vmatmul.mubr.bf16.gmra.mrb[40].mxu0 %v5647_v41  ;;  %962 = vmatmul.mubr.bf16.gmra.mrb[40].mxu1 %v5647_v41  ;;  %v1277_v41 = vld [vmem:[#allocation8 + $0x100] sm:$0xff] }
  0xbf   :  { %858 = vmatprep.mubr.bf16.mxu0 %v5527_v0  ;;  %971 = vmatprep.mubr.bf16.mxu1 %v5527_v0  ;;  %v5738_v47 = vcombine.high %v1277_v41, %v1281_v42  ;;  %v5744_v53 = vcombine.low %v1277_v41, %v1281_v42  ;;  %v1325_v41 = vld [vmem:[#allocation8 + $0x280] sm:$0xff] }
  0xc0   :  { %2061 = vmatpush1.bf16.msra.mxu1 %v5720_v38  ;;  %2020 = vmatpush1.bf16.msra.mxu0 %v5731_v45  ;;  %v1329_v42 = vld [vmem:[#allocation8 + $0x2a0] sm:$0xff] }
  0xc1   :  { %7533 = vst [vmem:[#allocation32_spill] sm:$0xff] %v5738_v47  ;;  %2062 = vmatprep.subr.bf16.mxu1 %v5725_v40  ;;  %7535 = vst [vmem:[#allocation34_spill] sm:$0xff] %v5744_v53  ;;  %2021 = vmatprep.subr.bf16.mxu0 %v5738_v47  ;;  %v5819_v51 = vcombine.low %v1325_v41, %v1329_v42 }
  0xc3   :  { %7559 = vst [vmem:[#allocation58_spill] sm:$0xff] %v5819_v51 }
  0xc4   :  { %2063 = vmatpush1.bf16.msra.mxu1 %v5736_v46  ;;  %2022 = vmatpush1.bf16.msra.mxu0 %v5744_v53 }
  0xc5   :  { %2064 = vmatprep.subr.bf16.mxu1 %v5741_v48  ;;  %2023 = vmatprep.subr.bf16.mxu0 %v5750_v54 }
  0xc6   :  { %859 = vmatmul.mubr.bf16.gmra.mrb[44].mxu0 %v4884_v58  ;;  %972 = vmatmul.mubr.bf16.gmra.mrb[44].mxu1 %v4884_v58  ;;  %v1294_v58 = vld [vmem:[#allocation8 + $0x188] sm:$0xff] }
  0xc7   :  { %868 = vmatprep.mubr.bf16.mxu0 %v5527_v0  ;;  %981 = vmatprep.mubr.bf16.mxu1 %v5527_v0  ;;  %v5767_v63 = vcombine.high %v1294_v58, %v1298_v59  ;;  %v5774_v2 = vcombine.low %v1294_v58, %v1298_v59  ;;  %v1334_v58 = vld [vmem:[#allocation8 + $0x2c8] sm:$0xff]  ;;  %v5827_v59 = vcombine.high %v1333_v56, %v1337_v57 }
  0xc8   :  { %2024 = vmatpush1.bf16.msra.mxu0 %v5758_v60 }
  0xc9   :  { %7542 = vst [vmem:[#allocation41_spill] sm:$0xff] %v5767_v63  ;;  %2025 = vmatprep.subr.bf16.mxu0 %v5764_v62  ;;  %7544 = vst [vmem:[#allocation43_spill] sm:$0xff] %v5774_v2 }
  0xca   :  { %7561 = vst [vmem:[#allocation60_spill] sm:$0xff] %v5827_v59 }
  0xcc   :  { %2026 = vmatpush1.bf16.msra.mxu0 %v5770_v1 }
  0xcd   :  { %2027 = vmatprep.subr.bf16.mxu0 %v5779_v7 }
  0xce   :  { %869 = vmatmul.mubr.bf16.gmra.mrb[48].mxu0 %v4885_v8  ;;  %982 = vmatmul.mubr.bf16.gmra.mrb[48].mxu1 %v4885_v8  ;;  %v1306_v8 = vld [vmem:[#allocation8 + $0x1e8] sm:$0xff] }
  0xcf   :  { %878 = vmatprep.mubr.bf16.mxu0 %v5527_v0  ;;  %991 = vmatprep.mubr.bf16.mxu1 %v5527_v0 }
  0xd6   :  { %879 = vmatmul.mubr.bf16.gmra.mrb[52].mxu0 %v4886_v9  ;;  %992 = vmatmul.mubr.bf16.gmra.mrb[52].mxu1 %v4886_v9  ;;  %v5781_v9 = vcombine.high %v1302_v5, %v1306_v8 }
  0xd7   :  { %888 = vmatprep.mubr.bf16.mxu0 %v5527_v0  ;;  %1001 = vmatprep.mubr.bf16.mxu1 %v5527_v0 }
  0xd8   :  { %7546 = vst [vmem:[#allocation45_spill] sm:$0xff] %v5781_v9 }
  0xde   :  { %889 = vmatmul.mubr.bf16.gmra.mrb[56].mxu0 %v5659_v10  ;;  %1002 = vmatmul.mubr.bf16.gmra.mrb[56].mxu1 %v5659_v10  ;;  %v5785_v10 = vcombine.low %v1301_v3, %v1305_v4  ;;  %v1338_v3 = vld [vmem:[#allocation8 + $0x2e8] sm:$0xff] }
  0xdf   :  { %898 = vmatprep.mubr.bf16.mxu0 %v5527_v0  ;;  %1011 = vmatprep.mubr.bf16.mxu1 %v5527_v0  ;;  %v5748_v0 = vcombine.low %v1278_v43, %v1282_v44  ;;  %v1326_v43 = vld [vmem:[#allocation8 + $0x288] sm:$0xff]  ;;  %v5815_v44 = vcombine.high %v1325_v41, %v1329_v42  ;;  %v5829_v4 = vcombine.high %v1334_v58, %v1338_v3  ;;  %v1349_v41 = vld [vmem:[#allocation8 + $0x340] sm:$0xff] }
  0xe0   :  { %7547 = vst [vmem:[#allocation46_spill] sm:$0xff] %v5785_v10  ;;  %2028 = vmatpush1.bf16.msra.mxu0 %v5785_v10  ;;  %v5817_v50 = vcombine.high %v1326_v43, %v1330_v49  ;;  %v5821_v52 = vcombine.low %v1326_v43, %v1330_v49  ;;  %v1353_v42 = vld [vmem:[#allocation8 + $0x360] sm:$0xff]  ;;  %v1350_v43 = vld [vmem:[#allocation8 + $0x348] sm:$0xff] }
  0xe1   :  { %7536 = vst [vmem:[#allocation35_spill] sm:$0xff] %v5748_v0  ;;  %2065 = vmatpush1.bf16.msra.mxu1 %v5748_v0  ;;  %2029 = vmatprep.subr.bf16.mxu0 %v5791_v15  ;;  %7557 = vst [vmem:[#allocation56_spill] sm:$0xff] %v5815_v44  ;;  %v5848_v49 = vcombine.high %v1349_v41, %v1353_v42  ;;  %v5854_v6 = vcombine.low %v1349_v41, %v1353_v42 }
  0xe2   :  { %2066 = vmatprep.subr.bf16.mxu1 %v5753_v55  ;;  %7558 = vst [vmem:[#allocation57_spill] sm:$0xff] %v5817_v50  ;;  %7560 = vst [vmem:[#allocation59_spill] sm:$0xff] %v5821_v52  ;;  %v5870_v42 = vcombine.low %v1358_v12, %v1362_v13 }
  0xe3   :  { %7562 = vst [vmem:[#allocation61_spill] sm:$0xff] %v5829_v4  ;;  %7569 = vst [vmem:[#allocation68_spill] sm:$0xff] %v5848_v49 }
  0xe4   :  { %2030 = vmatpush1.bf16.msra.mxu0 %v5795_v22  ;;  %7571 = vst [vmem:[#allocation70_spill] sm:$0xff] %v5854_v6  ;;  %7576 = vst [vmem:[#allocation75_spill] sm:$0xff] %v5870_v42 }
  0xe5   :  { %2067 = vmatpush1.bf16.msra.mxu1 %v5762_v61  ;;  %2031 = vmatprep.subr.bf16.mxu0 %v5803_v28 }
  0xe6   :  { %899 = vmatmul.mubr.bf16.gmra.mrb[60].mxu0 %v5665_v11  ;;  %1012 = vmatmul.mubr.bf16.gmra.mrb[60].mxu1 %v5665_v11  ;;  %v5787_v11 = vcombine.low %v1302_v5, %v1306_v8  ;;  %v5831_v5 = vcombine.low %v1333_v56, %v1337_v57  ;;  %v5833_v8 = vcombine.low %v1334_v58, %v1338_v3  ;;  %v1354_v56 = vld [vmem:[#allocation8 + $0x368] sm:$0xff]  ;;  %v1357_v57 = vld [vmem:[#allocation8 + $0x380] sm:$0xff] }
  0xe7   :  { %2068 = vmatprep.subr.bf16.mxu1 %v5767_v63  ;;  %v1361_v58 = vld [vmem:[#allocation8 + $0x3a0] sm:$0xff]  ;;  %v5852_v3 = vcombine.high %v1350_v43, %v1354_v56  ;;  %v5858_v24 = vcombine.low %v1350_v43, %v1354_v56 }
  0xe8   :  { %7548 = vst [vmem:[#allocation47_spill] sm:$0xff] %v5787_v11  ;;  %2032 = vmatpush1.bf16.msra.mxu0 %v5807_v35  ;;  %7563 = vst [vmem:[#allocation62_spill] sm:$0xff] %v5831_v5  ;;  %v5866_v41 = vcombine.low %v1357_v57, %v1361_v58 }
  0xe9   :  { %2069 = vmatpush1.bf16.msra.mxu1 %v5774_v2  ;;  %2033 = vmatprep.subr.bf16.mxu0 %v5815_v44  ;;  %7564 = vst [vmem:[#allocation63_spill] sm:$0xff] %v5833_v8  ;;  %7570 = vst [vmem:[#allocation69_spill] sm:$0xff] %v5852_v3  ;;  %v1267_v44 = vld [vmem:[#allocation8 + $0xb0] sm:$0xff] }
  0xea   :  { %2070 = vmatprep.subr.bf16.mxu1 %v5781_v9  ;;  %7572 = vst [vmem:[#allocation71_spill] sm:$0xff] %v5858_v24  ;;  %7575 = vst [vmem:[#allocation74_spill] sm:$0xff] %v5866_v41 }
  0xec   :  { %2034 = vmatpush1.bf16.msra.mxu0 %v5819_v51 }
  0xed   :  { %2071 = vmatpush1.bf16.msra.mxu1 %v5787_v11  ;;  %2035 = vmatprep.subr.bf16.mxu0 %v5827_v59 }
  0xee   :  { %2072 = vmatprep.subr.bf16.mxu1 %v5793_v18 }
  0xf0   :  { %2036 = vmatpush1.bf16.msra.mxu0 %v5831_v5  ;;  %v1366_v5 = vld [vmem:[#allocation8 + $0x3c8] sm:$0xff] }
  0xf1   :  { %2073 = vmatpush1.bf16.msra.mxu1 %v5797_v23  ;;  %2037 = vmatprep.subr.bf16.mxu0 %v5839_v17  ;;  %v5860_v17 = vcombine.high %v1357_v57, %v1361_v58  ;;  %v1247_v58 = vld [vmem:[#allocation8 + $0x10] sm:$0xff] }
  0xf2   :  { %2074 = vmatprep.subr.bf16.mxu1 %v5805_v34 }
  0xf3   :  { %7573 = vst [vmem:[#allocation72_spill] sm:$0xff] %v5860_v17 }
  0xf4   :  { %2038 = vmatpush1.bf16.msra.mxu0 %v5843_v27  ;;  %v1369_v27 = vld [vmem:[#allocation8 + $0x3e0] sm:$0xff] }
  0xf5   :  { %2075 = vmatpush1.bf16.msra.mxu1 %v5809_v36  ;;  %2039 = vmatprep.subr.bf16.mxu0 %v5848_v49 }
  0xf6   :  { %2076 = vmatprep.subr.bf16.mxu1 %v5817_v50 }
  0xf8   :  { %2040 = vmatpush1.bf16.msra.mxu0 %v5854_v6  ;;  %v162_v6 = vlaneseq }
  0xf9   :  { %2077 = vmatpush1.bf16.msra.mxu1 %v5821_v52  ;;  %2041 = vmatprep.subr.bf16.mxu0 %v5860_v17 }
  0xfa   :  { %2078 = vmatprep.subr.bf16.mxu1 %v5829_v4  ;;  %v1370_v4 = vld [vmem:[#allocation8 + $0x3e8] sm:$0xff]  ;;  %v5897_v49 = vshrl.u32 %v162_v6, 7 }
  0xfb   :  { %v5875_v56 = vcombine.high %v1366_v5, %v1370_v4  ;;  %v5882_v57 = vcombine.low %v1366_v5, %v1370_v4 }
  0xfc   :  { %2042 = vmatpush1.bf16.msra.mxu0 %v5866_v41  ;;  %v1252_v41 = vld [vmem:[#allocation8 + $0x38] sm:$0xff]  ;;  %7583 = vst [vmem:[#allocation82_spill] sm:$0xff] %v5897_v49 }
  0xfd   :  { %2079 = vmatpush1.bf16.msra.mxu1 %v5833_v8  ;;  %v5863_v8 = vcombine.high %v1358_v12, %v1362_v13  ;;  %7578 = vst [vmem:[#allocation77_spill] sm:$0xff] %v5875_v56  ;;  %7580 = vst [vmem:[#allocation79_spill] sm:$0xff] %v5882_v57  ;;  %v1251_v12 = vld [vmem:[#allocation8 + $0x30] sm:$0xff]  ;;  %v1248_v13 = vld [vmem:[#allocation8 + $0x18] sm:$0xff] }
  0xfe   :  { %2080 = vmatprep.subr.bf16.mxu1 %v5841_v26  ;;  %v1365_v26 = vld [vmem:[#allocation8 + $0x3c0] sm:$0xff] }
  0xff   :  { %7574 = vst [vmem:[#allocation73_spill] sm:$0xff] %v5863_v8  ;;  %v5872_v43 = vcombine.high %v1365_v26, %v1369_v27 }
 0x101   :  { %2081 = vmatpush1.bf16.msra.mxu1 %v5845_v33  ;;  %7577 = vst [vmem:[#allocation76_spill] sm:$0xff] %v5872_v43  ;;  %2043 = vmatprep.subr.bf16.mxu0 %v5872_v43 }
 0x102   :  { %2082 = vmatprep.subr.bf16.mxu1 %v5852_v3  ;;  %v5878_v3 = vcombine.low %v1365_v26, %v1369_v27  ;;  %v5889_v26 = vcombine.high %v1248_v13, %v1252_v41  ;;  %v5891_v27 = vcombine.low %v1247_v58, %v1251_v12 }
 0x104   :  { %7579 = vst [vmem:[#allocation78_spill] sm:$0xff] %v5878_v3  ;;  %2044 = vmatpush1.bf16.msra.mxu0 %v5878_v3  ;;  %7582 = vst [vmem:[#allocation81_spill] sm:$0xff] %v5889_v26 }
 0x105   :  { %2083 = vmatpush1.bf16.msra.mxu1 %v5858_v24 }
 0x106   :  { %2084 = vmatprep.subr.bf16.mxu1 %v5863_v8  ;;  %v5887_v8 = vcombine.high %v1247_v58, %v1251_v12  ;;  %v164_v58 = vsub.s32 0, %v5897_v49  ;;  %v168_v12 = vsub.s32 1, %v5897_v49 }
 0x108   :  { %7581 = vst [vmem:[#allocation80_spill] sm:$0xff] %v5887_v8  ;;  %2099 = vmatprep.subr.bf16.mxu0 %v5887_v8 }
 0x109   :  { %2085 = vmatpush1.bf16.msra.mxu1 %v5870_v42  ;;  %v5893_v42 = vcombine.low %v1248_v13, %v1252_v41  ;;  %v5903_v41 = vld [vmem:[%s7182_s3] sm:$0xff] }
 0x10a   :  { %2086 = vmatprep.subr.bf16.mxu1 %v5875_v56  ;;  %7584 = vst [vmem:[#allocation83_spill] sm:$0xff] %v5903_v41  ;;  %v5907_v13 = vrot.slane %v5903_v41, %v164_v58 }
 0x10c   :  { %7585 = vst [vmem:[#allocation84_spill] sm:$0xff] %v5907_v13 }
 0x10d   :  { %2087 = vmatpush1.bf16.msra.mxu1 %v5882_v57 }
 0x10e   :  { %2142 = vmatprep.subr.bf16.mxu1 %v5889_v26 }
 0x141   :  { %v604_v4 = vpop.f32.mrb[0].mxu0  ;;  %v717_v5 = vpop.f32.mrb[0].mxu1 }
 0x142   :  { %v606_v3 = vpop.f32.mrb[1].mxu0  ;;  %v719_v56 = vpop.f32.mrb[1].mxu1 }
 0x143   :  { %v608_v43 = vpop.f32.mrb[2].mxu0  ;;  %v721_v17 = vpop.f32.mrb[2].mxu1  ;;  %v5910_v56 = vrot.slane %v5903_v41, %v168_v12  ;;  %v180_v12 = vsub.s32 4, %v5897_v49 }
 0x144   :  { %v610_v57 = vpop.f32.mrb[3].mxu0  ;;  %v723_v24 = vpop.f32.mrb[3].mxu1  ;;  %v605_v17 = vadd.f32 %v604_v4, %v5907_v13  ;;  %v188_v4 = vsub.s32 6, %v5897_v49 }
 0x145   :  { %7586 = vst [vmem:[#allocation85_spill] sm:$0xff] %v5910_v56  ;;  %v607_v6 = vadd.f32 %v606_v3, %v5910_v56  ;;  %v609_v24 = vadd.f32 %v608_v43, %v5907_v13  ;;  %v611_v5 = vadd.f32 %v610_v57, %v5910_v56  ;;  %v184_v3 = vsub.s32 5, %v5897_v49 }
 0x146   :  { %v4386_v26 = vmul.f32 -1.442695, %v605_v17  ;;  %v192_v43 = vsub.s32 7, %v5897_v49 }
 0x147   :  { %v4387_v8 = vmul.f32 -1.442695, %v607_v6  ;;  %v4388_v33 = vmul.f32 -1.442695, %v609_v24  ;;  %v4389_v59 = vmul.f32 -1.442695, %v611_v5  ;;  %v5921_v24 = vrot.slane %v5903_v41, %v180_v12 }
 0x148   :  { %4905 = vpow2.f32 %v4386_v26  ;;  %v5930_v5 = vrot.slane %v5903_v41, %v192_v43 }
 0x149   :  { %4907 = vpow2.f32 %v4387_v8  ;;  %7587 = vst [vmem:[#allocation86_spill] sm:$0xff] %v5921_v24 }
 0x14a   :  { %4909 = vpow2.f32 %v4388_v33  ;;  %v5927_v33 = vrot.slane %v5903_v41, %v184_v3  ;;  %7590 = vst [vmem:[#allocation89_spill] sm:$0xff] %v5930_v5 }
 0x14b   :  { %4911 = vpow2.f32 %v4389_v59  ;;  %v5924_v59 = vrot.slane %v5903_v41, %v188_v4 }
 0x14c   :  { %7589 = vst [vmem:[#allocation88_spill] sm:$0xff] %v5927_v33 }
 0x14d   :  { %7588 = vst [vmem:[#allocation87_spill] sm:$0xff] %v5924_v59 }
 0x152   :  { %v4906_v58 = vpop.eup %4905 }
 0x153   :  { %v4908_v52 = vpop.eup %4907  ;;  %v1174_v17 = vadd.f32 1.0, %v4906_v58 }
 0x154   :  { %v4910_v51 = vpop.eup %4909  ;;  %v1175_v6 = vadd.f32 1.0, %v4908_v52 }
 0x155   :  { %v4912_v57 = vpop.eup %4911  ;;  %v1176_v8 = vadd.f32 1.0, %v4910_v51  ;;  %4913 = vrcp.f32 %v1174_v17 }
 0x156   :  { %v1177_v26 = vadd.f32 1.0, %v4912_v57  ;;  %4915 = vrcp.f32 %v1175_v6 }
 0x157   :  { %4917 = vrcp.f32 %v1176_v8 }
 0x158   :  { %4919 = vrcp.f32 %v1177_v26 }
 0x181   :  { %v830_v56 = vpop.f32.mrb[32].mxu0  ;;  %v943_v52 = vpop.f32.mrb[32].mxu1 }
 0x182   :  { %v831_v58 = vadd.f32 %v830_v56, %v5921_v24  ;;  %v832_v13 = vpop.f32.mrb[33].mxu0  ;;  %v944_v51 = vadd.f32 %v943_v52, %v5924_v59  ;;  %v945_v4 = vpop.f32.mrb[33].mxu1 }
 0x183   :  { %v833_v12 = vadd.f32 %v832_v13, %v5927_v33  ;;  %v834_v49 = vpop.f32.mrb[34].mxu0  ;;  %v946_v57 = vadd.f32 %v945_v4, %v5930_v5  ;;  %v947_v17 = vpop.f32.mrb[34].mxu1 }
 0x184   :  { %v4390_v3 = vmul.f32 -1.442695, %v831_v58  ;;  %v835_v43 = vadd.f32 %v834_v49, %v5921_v24  ;;  %v836_v41 = vpop.f32.mrb[35].mxu0  ;;  %4921 = vtanh.f32 %v944_v51  ;;  %v949_v50 = vpop.f32.mrb[35].mxu1  ;;  %v948_v52 = vadd.f32 %v947_v17, %v5924_v59 }
 0x185   :  { %v4391_v6 = vmul.f32 -1.442695, %v833_v12  ;;  %v837_v56 = vadd.f32 %v836_v41, %v5927_v33  ;;  %v950_v26 = vadd.f32 %v949_v50, %v5930_v5  ;;  %v4914_v58 = vpop.eup %4913 }
 0x186   :  { %4923 = vpow2.f32 %v4390_v3  ;;  %v4392_v8 = vmul.f32 -1.442695, %v835_v43  ;;  %v4916_v49 = vpop.eup %4915 }
 0x187   :  { %4925 = vpow2.f32 %v4391_v6  ;;  %v4393_v13 = vmul.f32 -1.442695, %v837_v56  ;;  %v4918_v51 = vpop.eup %4917 }
 0x188   :  { %4927 = vtanh.f32 %v946_v57  ;;  %v4920_v12 = vpop.eup %4919 }
 0x189   :  { %4929 = vpow2.f32 %v4392_v8 }
 0x18a   :  { %4931 = vtanh.f32 %v948_v52 }
 0x18b   :  { %4933 = vpow2.f32 %v4393_v13 }
 0x18c   :  { %4935 = vtanh.f32 %v950_v26 }
 0x18e   :  { %v4922_v4 = vpop.eup %4921 }
 0x18f   :  { %v5940_v33 = vmul.f32 %v4922_v4, %v4914_v58 }
 0x190   :  { %v4924_v41 = vpop.eup %4923 }
 0x191   :  { %7591 = vst [vmem:[#allocation90_spill] sm:$0xff] %v5940_v33  ;;  %v4926_v3 = vpop.eup %4925  ;;  %v1206_v43 = vadd.f32 1.0, %v4924_v41  ;;  %4937 = vtanh.f32 %v5940_v33 }
 0x192   :  { %v4928_v17 = vpop.eup %4927  ;;  %v1207_v57 = vadd.f32 1.0, %v4926_v3 }
 0x193   :  { %v4930_v6 = vpop.eup %4929  ;;  %4939 = vrcp.f32 %v1206_v43  ;;  %v5943_v50 = vmul.f32 %v4928_v17, %v4916_v49 }
 0x194   :  { %v4932_v56 = vpop.eup %4931  ;;  %4941 = vrcp.f32 %v1207_v57  ;;  %v1208_v8 = vadd.f32 1.0, %v4930_v6 }
 0x195   :  { %7592 = vst [vmem:[#allocation91_spill] sm:$0xff] %v5943_v50  ;;  %v4934_v52 = vpop.eup %4933  ;;  %4943 = vtanh.f32 %v5943_v50  ;;  %v5946_v13 = vmul.f32 %v4932_v56, %v4918_v51 }
 0x196   :  { %v4936_v26 = vpop.eup %4935  ;;  %4945 = vrcp.f32 %v1208_v8  ;;  %v1209_v58 = vadd.f32 1.0, %v4934_v52 }
 0x197   :  { %7593 = vst [vmem:[#allocation92_spill] sm:$0xff] %v5946_v13  ;;  %4947 = vtanh.f32 %v5946_v13  ;;  %v5949_v4 = vmul.f32 %v4936_v26, %v4920_v12  ;;  %v1255_v13 = vld [vmem:[#allocation8 + $0x50] sm:$0xff]  ;;  %v1256_v26 = vld [vmem:[#allocation8 + $0x58] sm:$0xff] }
 0x198   :  { %4949 = vrcp.f32 %v1209_v58  ;;  %v1259_v12 = vld [vmem:[#allocation8 + $0x70] sm:$0xff]  ;;  %v1260_v58 = vld [vmem:[#allocation8 + $0x78] sm:$0xff] }
 0x199   :  { %7594 = vst [vmem:[#allocation93_spill] sm:$0xff] %v5949_v4  ;;  %4951 = vtanh.f32 %v5949_v4  ;;  %v1263_v4 = vld [vmem:[#allocation8 + $0x90] sm:$0xff]  ;;  %v5954_v59 = vcombine.high %v1255_v13, %v1259_v12  ;;  %v5956_v24 = vcombine.high %v1256_v26, %v1260_v58 }
 0x19b   :  { %v4938_v49 = vpop.eup %4937  ;;  %7595 = vst [vmem:[#allocation94_spill] sm:$0xff] %v5956_v24 }
 0x19d   :  { %v4940_v41 = vpop.eup %4939 }
 0x19e   :  { %v4942_v3 = vpop.eup %4941  ;;  %v1222_v50 = vmul.f32 %v4940_v41, %v4938_v49  ;;  %v1264_v49 = vld [vmem:[#allocation8 + $0x98] sm:$0xff] }
 0x19f   :  { %v4944_v43 = vpop.eup %4943  ;;  %v1268_v41 = vld [vmem:[#allocation8 + $0xb8] sm:$0xff] }
 0x1a0   :  { %v4946_v17 = vpop.eup %4945  ;;  %v1223_v33 = vmul.f32 %v4944_v43, %v4942_v3  ;;  %v5966_v3 = vcombine.high %v1263_v4, %v1267_v44  ;;  %v5968_v43 = vcombine.high %v1264_v49, %v1268_v41 }
 0x1a1   :  { %v4948_v57 = vpop.eup %4947 }
 0x1a2   :  { %v4950_v6 = vpop.eup %4949  ;;  %v1224_v51 = vmul.f32 %v4948_v57, %v4946_v17  ;;  %7598 = vst [vmem:[#allocation97_spill] sm:$0xff] %v5966_v3  ;;  %7599 = vst [vmem:[#allocation98_spill] sm:$0xff] %v5968_v43  ;;  %v1271_v17 = vld [vmem:[#allocation8 + $0xd0] sm:$0xff] }
 0x1a3   :  { %v4952_v56 = vpop.eup %4951  ;;  %v1275_v57 = vld [vmem:[#allocation8 + $0xf0] sm:$0xff] }
 0x1a4   :  { %v1225_v8 = vmul.f32 %v4952_v56, %v4950_v6  ;;  %v5952_v52 = vpack.c.bf16 %v1224_v51, %v1222_v50  ;;  %v5962_v50 = vcombine.low %v1255_v13, %v1259_v12  ;;  %v1272_v6 = vld [vmem:[#allocation8 + $0xd8] sm:$0xff]  ;;  %v5974_v13 = vcombine.low %v1263_v4, %v1267_v44  ;;  %v1279_v12 = vld [vmem:[#allocation8 + $0x110] sm:$0xff] }
 0x1a5   :  { %v1276_v51 = vld [vmem:[#allocation8 + $0xf8] sm:$0xff]  ;;  %v5976_v56 = vcombine.low %v1264_v49, %v1268_v41  ;;  %v5986_v44 = vcombine.low %v1271_v17, %v1275_v57 }
 0x1a6   :  { %v1244_v5 = vpack.c.bf16 %v1225_v8, %v1223_v33  ;;  %7596 = vst [vmem:[#allocation95_spill] sm:$0xff] %v5962_v50  ;;  %v5964_v33 = vcombine.low %v1256_v26, %v1260_v58  ;;  %7600 = vst [vmem:[#allocation99_spill] sm:$0xff] %v5974_v13  ;;  %v5982_v8 = vcombine.high %v1272_v6, %v1276_v51  ;;  %v1283_v26 = vld [vmem:[#allocation8 + $0x130] sm:$0xff]  ;;  %v1280_v58 = vld [vmem:[#allocation8 + $0x118] sm:$0xff] }
 0x1a7   :  { %7601 = vst [vmem:[#allocation100_spill] sm:$0xff] %v5976_v56  ;;  %7604 = vst [vmem:[#allocation103_spill] sm:$0xff] %v5986_v44  ;;  %v5988_v4 = vcombine.low %v1272_v6, %v1276_v51  ;;  %v5992_v49 = vcombine.high %v1279_v12, %v1283_v26 }
 0x1a8   :  { %2045 = vmatprep.mubr.bf16.mxu0 %v1244_v5  ;;  %2088 = vmatprep.mubr.bf16.mxu1 %v1244_v5  ;;  %7597 = vst [vmem:[#allocation96_spill] sm:$0xff] %v5964_v33  ;;  %7603 = vst [vmem:[#allocation102_spill] sm:$0xff] %v5982_v8 }
 0x1a9   :  { %2046 = vmatmul.mubr.bf16.vlgmr.msra.gmra.mrb[4].mxu0 %v5952_v52  ;;  %2089 = vmatmul.mubr.bf16.vlgmr.msra.gmra.mrb[4].mxu1 %v5952_v52  ;;  %7605 = vst [vmem:[#allocation104_spill] sm:$0xff] %v5988_v4  ;;  %7606 = vst [vmem:[#allocation105_spill] sm:$0xff] %v5992_v49 }
 0x1aa   :  { %2100 = vmatpush1.bf16.msra.mxu0 %v5891_v27  ;;  %2143 = vmatpush1.bf16.msra.mxu1 %v5893_v42 }
 0x1ab   :  { %2131 = vmatprep.mubr.bf16.mxu0 %v1244_v5  ;;  %2174 = vmatprep.mubr.bf16.mxu1 %v1244_v5  ;;  %v5980_v5 = vcombine.high %v1271_v17, %v1275_v57  ;;  %v5998_v17 = vcombine.low %v1279_v12, %v1283_v26 }
 0x1ac   :  { %2101 = vmatprep.subr.bf16.mxu0 %v5954_v59  ;;  %2144 = vmatprep.subr.bf16.mxu1 %v5956_v24  ;;  %v1284_v24 = vld [vmem:[#allocation8 + $0x138] sm:$0xff] }
 0x1ad   :  { %7602 = vst [vmem:[#allocation101_spill] sm:$0xff] %v5980_v5  ;;  %v5994_v41 = vcombine.high %v1280_v58, %v1284_v24  ;;  %7608 = vst [vmem:[#allocation107_spill] sm:$0xff] %v5998_v17  ;;  %v6000_v57 = vcombine.low %v1280_v58, %v1284_v24 }
 0x1ae   :  { %2102 = vmatpush1.bf16.msra.mxu0 %v5962_v50  ;;  %2145 = vmatpush1.bf16.msra.mxu1 %v5964_v33  ;;  %v1288_v33 = vld [vmem:[#allocation8 + $0x158] sm:$0xff] }
 0x1af   :  { %2103 = vmatprep.subr.bf16.mxu0 %v5966_v3  ;;  %2146 = vmatprep.subr.bf16.mxu1 %v5968_v43  ;;  %7607 = vst [vmem:[#allocation106_spill] sm:$0xff] %v5994_v41  ;;  %v1287_v43 = vld [vmem:[#allocation8 + $0x150] sm:$0xff]  ;;  %v1292_v50 = vld [vmem:[#allocation8 + $0x178] sm:$0xff]  ;;  %7609 = vst [vmem:[#allocation108_spill] sm:$0xff] %v6000_v57 }
 0x1b0   :  { %v1291_v3 = vld [vmem:[#allocation8 + $0x170] sm:$0xff]  ;;  %v6006_v51 = vcombine.high %v1288_v33, %v1292_v50  ;;  %v6012_v24 = vcombine.low %v1288_v33, %v1292_v50 }
 0x1b1   :  { %v6004_v6 = vcombine.high %v1287_v43, %v1291_v3  ;;  %v6010_v12 = vcombine.low %v1287_v43, %v1291_v3 }
 0x1b2   :  { %2104 = vmatpush1.bf16.msra.mxu0 %v5974_v13  ;;  %2147 = vmatpush1.bf16.msra.mxu1 %v5976_v56  ;;  %7611 = vst [vmem:[#allocation110_spill] sm:$0xff] %v6006_v51  ;;  %v1296_v56 = vld [vmem:[#allocation8 + $0x198] sm:$0xff]  ;;  %7613 = vst [vmem:[#allocation112_spill] sm:$0xff] %v6012_v24 }
 0x1b3   :  { %2105 = vmatprep.subr.bf16.mxu0 %v5980_v5  ;;  %2148 = vmatprep.subr.bf16.mxu1 %v5982_v8  ;;  %7610 = vst [vmem:[#allocation109_spill] sm:$0xff] %v6004_v6  ;;  %v1295_v8 = vld [vmem:[#allocation8 + $0x190] sm:$0xff]  ;;  %v1300_v13 = vld [vmem:[#allocation8 + $0x1b8] sm:$0xff]  ;;  %7612 = vst [vmem:[#allocation111_spill] sm:$0xff] %v6010_v12 }
 0x1b4   :  { %v1299_v5 = vld [vmem:[#allocation8 + $0x1b0] sm:$0xff]  ;;  %v6018_v58 = vcombine.high %v1296_v56, %v1300_v13  ;;  %v6024_v50 = vcombine.low %v1296_v56, %v1300_v13 }
 0x1b5   :  { %v6016_v26 = vcombine.high %v1295_v8, %v1299_v5  ;;  %v6022_v3 = vcombine.low %v1295_v8, %v1299_v5 }
 0x1b6   :  { %2106 = vmatpush1.bf16.msra.mxu0 %v5986_v44  ;;  %2149 = vmatpush1.bf16.msra.mxu1 %v5988_v4  ;;  %7615 = vst [vmem:[#allocation114_spill] sm:$0xff] %v6018_v58  ;;  %v1304_v4 = vld [vmem:[#allocation8 + $0x1d8] sm:$0xff]  ;;  %7617 = vst [vmem:[#allocation116_spill] sm:$0xff] %v6024_v50 }
 0x1b7   :  { %2107 = vmatprep.subr.bf16.mxu0 %v5992_v49  ;;  %2150 = vmatprep.subr.bf16.mxu1 %v5994_v41  ;;  %7614 = vst [vmem:[#allocation113_spill] sm:$0xff] %v6016_v26  ;;  %v1303_v41 = vld [vmem:[#allocation8 + $0x1d0] sm:$0xff]  ;;  %v1308_v44 = vld [vmem:[#allocation8 + $0x1f8] sm:$0xff]  ;;  %7616 = vst [vmem:[#allocation115_spill] sm:$0xff] %v6022_v3 }
 0x1b8   :  { %v1307_v49 = vld [vmem:[#allocation8 + $0x1f0] sm:$0xff]  ;;  %v6030_v43 = vcombine.high %v1304_v4, %v1308_v44  ;;  %v6036_v13 = vcombine.low %v1304_v4, %v1308_v44 }
 0x1b9   :  { %v6028_v33 = vcombine.high %v1303_v41, %v1307_v49  ;;  %v6034_v5 = vcombine.low %v1303_v41, %v1307_v49 }
 0x1ba   :  { %2108 = vmatpush1.bf16.msra.mxu0 %v5998_v17  ;;  %2151 = vmatpush1.bf16.msra.mxu1 %v6000_v57  ;;  %7619 = vst [vmem:[#allocation118_spill] sm:$0xff] %v6030_v43  ;;  %v1312_v57 = vld [vmem:[#allocation8 + $0x218] sm:$0xff]  ;;  %7621 = vst [vmem:[#allocation120_spill] sm:$0xff] %v6036_v13 }
 0x1bb   :  { %2109 = vmatprep.subr.bf16.mxu0 %v6004_v6  ;;  %2152 = vmatprep.subr.bf16.mxu1 %v6006_v51  ;;  %7618 = vst [vmem:[#allocation117_spill] sm:$0xff] %v6028_v33  ;;  %v1311_v51 = vld [vmem:[#allocation8 + $0x210] sm:$0xff]  ;;  %v1316_v17 = vld [vmem:[#allocation8 + $0x238] sm:$0xff]  ;;  %7620 = vst [vmem:[#allocation119_spill] sm:$0xff] %v6034_v5 }
 0x1bc   :  { %v1315_v6 = vld [vmem:[#allocation8 + $0x230] sm:$0xff]  ;;  %v6042_v8 = vcombine.high %v1312_v57, %v1316_v17  ;;  %v6048_v44 = vcombine.low %v1312_v57, %v1316_v17 }
 0x1bd   :  { %v6040_v56 = vcombine.high %v1311_v51, %v1315_v6  ;;  %v6046_v49 = vcombine.low %v1311_v51, %v1315_v6 }
 0x1be   :  { %2110 = vmatpush1.bf16.msra.mxu0 %v6010_v12  ;;  %2153 = vmatpush1.bf16.msra.mxu1 %v6012_v24  ;;  %7623 = vst [vmem:[#allocation122_spill] sm:$0xff] %v6042_v8  ;;  %v1320_v24 = vld [vmem:[#allocation8 + $0x258] sm:$0xff]  ;;  %7625 = vst [vmem:[#allocation124_spill] sm:$0xff] %v6048_v44 }
 0x1bf   :  { %2111 = vmatprep.subr.bf16.mxu0 %v6016_v26  ;;  %2154 = vmatprep.subr.bf16.mxu1 %v6018_v58  ;;  %7622 = vst [vmem:[#allocation121_spill] sm:$0xff] %v6040_v56  ;;  %v1319_v58 = vld [vmem:[#allocation8 + $0x250] sm:$0xff]  ;;  %v1324_v12 = vld [vmem:[#allocation8 + $0x278] sm:$0xff]  ;;  %7624 = vst [vmem:[#allocation123_spill] sm:$0xff] %v6046_v49 }
 0x1c0   :  { %v1323_v26 = vld [vmem:[#allocation8 + $0x270] sm:$0xff]  ;;  %v6054_v41 = vcombine.high %v1320_v24, %v1324_v12  ;;  %v6060_v17 = vcombine.low %v1320_v24, %v1324_v12 }
 0x1c1   :  { %v6052_v4 = vcombine.high %v1319_v58, %v1323_v26  ;;  %v6058_v6 = vcombine.low %v1319_v58, %v1323_v26 }
 0x1c2   :  { %2112 = vmatpush1.bf16.msra.mxu0 %v6022_v3  ;;  %2155 = vmatpush1.bf16.msra.mxu1 %v6024_v50  ;;  %7627 = vst [vmem:[#allocation126_spill] sm:$0xff] %v6054_v41  ;;  %v1328_v50 = vld [vmem:[#allocation8 + $0x298] sm:$0xff]  ;;  %7629 = vst [vmem:[#allocation128_spill] sm:$0xff] %v6060_v17 }
 0x1c3   :  { %2113 = vmatprep.subr.bf16.mxu0 %v6028_v33  ;;  %2156 = vmatprep.subr.bf16.mxu1 %v6030_v43  ;;  %7626 = vst [vmem:[#allocation125_spill] sm:$0xff] %v6052_v4  ;;  %v1327_v43 = vld [vmem:[#allocation8 + $0x290] sm:$0xff]  ;;  %v1332_v3 = vld [vmem:[#allocation8 + $0x2b8] sm:$0xff]  ;;  %7628 = vst [vmem:[#allocation127_spill] sm:$0xff] %v6058_v6 }
 0x1c4   :  { %v1331_v33 = vld [vmem:[#allocation8 + $0x2b0] sm:$0xff]  ;;  %v6066_v51 = vcombine.high %v1328_v50, %v1332_v3  ;;  %v6072_v12 = vcombine.low %v1328_v50, %v1332_v3 }
 0x1c5   :  { %v6064_v57 = vcombine.high %v1327_v43, %v1331_v33  ;;  %v6070_v26 = vcombine.low %v1327_v43, %v1331_v33 }
 0x1c6   :  { %2114 = vmatpush1.bf16.msra.mxu0 %v6034_v5  ;;  %2157 = vmatpush1.bf16.msra.mxu1 %v6036_v13  ;;  %7631 = vst [vmem:[#allocation130_spill] sm:$0xff] %v6066_v51  ;;  %v1336_v13 = vld [vmem:[#allocation8 + $0x2d8] sm:$0xff]  ;;  %7633 = vst [vmem:[#allocation132_spill] sm:$0xff] %v6072_v12 }
 0x1c7   :  { %2115 = vmatprep.subr.bf16.mxu0 %v6040_v56  ;;  %2158 = vmatprep.subr.bf16.mxu1 %v6042_v8  ;;  %7630 = vst [vmem:[#allocation129_spill] sm:$0xff] %v6064_v57  ;;  %v1335_v8 = vld [vmem:[#allocation8 + $0x2d0] sm:$0xff]  ;;  %v1340_v5 = vld [vmem:[#allocation8 + $0x2f8] sm:$0xff]  ;;  %7632 = vst [vmem:[#allocation131_spill] sm:$0xff] %v6070_v26 }
 0x1c8   :  { %v1339_v56 = vld [vmem:[#allocation8 + $0x2f0] sm:$0xff]  ;;  %v6078_v58 = vcombine.high %v1336_v13, %v1340_v5  ;;  %v6084_v3 = vcombine.low %v1336_v13, %v1340_v5 }
 0x1c9   :  { %v6076_v24 = vcombine.high %v1335_v8, %v1339_v56  ;;  %v6082_v33 = vcombine.low %v1335_v8, %v1339_v56 }
 0x1ca   :  { %2116 = vmatpush1.bf16.msra.mxu0 %v6046_v49  ;;  %2159 = vmatpush1.bf16.msra.mxu1 %v6048_v44  ;;  %7635 = vst [vmem:[#allocation134_spill] sm:$0xff] %v6078_v58  ;;  %v1344_v44 = vld [vmem:[#allocation8 + $0x318] sm:$0xff]  ;;  %7637 = vst [vmem:[#allocation136_spill] sm:$0xff] %v6084_v3 }
 0x1cb   :  { %2117 = vmatprep.subr.bf16.mxu0 %v6052_v4  ;;  %2160 = vmatprep.subr.bf16.mxu1 %v6054_v41  ;;  %7634 = vst [vmem:[#allocation133_spill] sm:$0xff] %v6076_v24  ;;  %v1343_v41 = vld [vmem:[#allocation8 + $0x310] sm:$0xff]  ;;  %v1348_v49 = vld [vmem:[#allocation8 + $0x338] sm:$0xff]  ;;  %7636 = vst [vmem:[#allocation135_spill] sm:$0xff] %v6082_v33 }
 0x1cc   :  { %v1347_v4 = vld [vmem:[#allocation8 + $0x330] sm:$0xff]  ;;  %v6090_v43 = vcombine.high %v1344_v44, %v1348_v49  ;;  %v6096_v5 = vcombine.low %v1344_v44, %v1348_v49 }
 0x1cd   :  { %v6088_v50 = vcombine.high %v1343_v41, %v1347_v4  ;;  %v6094_v56 = vcombine.low %v1343_v41, %v1347_v4 }
 0x1ce   :  { %2118 = vmatpush1.bf16.msra.mxu0 %v6058_v6  ;;  %2161 = vmatpush1.bf16.msra.mxu1 %v6060_v17  ;;  %7639 = vst [vmem:[#allocation138_spill] sm:$0xff] %v6090_v43  ;;  %v1352_v17 = vld [vmem:[#allocation8 + $0x358] sm:$0xff]  ;;  %7641 = vst [vmem:[#allocation140_spill] sm:$0xff] %v6096_v5 }
 0x1cf   :  { %2119 = vmatprep.subr.bf16.mxu0 %v6064_v57  ;;  %2162 = vmatprep.subr.bf16.mxu1 %v6066_v51  ;;  %7638 = vst [vmem:[#allocation137_spill] sm:$0xff] %v6088_v50  ;;  %v1351_v51 = vld [vmem:[#allocation8 + $0x350] sm:$0xff]  ;;  %v1356_v6 = vld [vmem:[#allocation8 + $0x378] sm:$0xff]  ;;  %7640 = vst [vmem:[#allocation139_spill] sm:$0xff] %v6094_v56 }
 0x1d0   :  { %v1355_v57 = vld [vmem:[#allocation8 + $0x370] sm:$0xff]  ;;  %v6102_v8 = vcombine.high %v1352_v17, %v1356_v6  ;;  %v6108_v49 = vcombine.low %v1352_v17, %v1356_v6 }
 0x1d1   :  { %v6100_v13 = vcombine.high %v1351_v51, %v1355_v57  ;;  %v6106_v4 = vcombine.low %v1351_v51, %v1355_v57 }
 0x1d2   :  { %2120 = vmatpush1.bf16.msra.mxu0 %v6070_v26  ;;  %2163 = vmatpush1.bf16.msra.mxu1 %v6072_v12  ;;  %7643 = vst [vmem:[#allocation142_spill] sm:$0xff] %v6102_v8  ;;  %v1360_v12 = vld [vmem:[#allocation8 + $0x398] sm:$0xff]  ;;  %7645 = vst [vmem:[#allocation144_spill] sm:$0xff] %v6108_v49 }
 0x1d3   :  { %2121 = vmatprep.subr.bf16.mxu0 %v6076_v24  ;;  %2164 = vmatprep.subr.bf16.mxu1 %v6078_v58  ;;  %7642 = vst [vmem:[#allocation141_spill] sm:$0xff] %v6100_v13  ;;  %v1359_v58 = vld [vmem:[#allocation8 + $0x390] sm:$0xff]  ;;  %v1364_v26 = vld [vmem:[#allocation8 + $0x3b8] sm:$0xff]  ;;  %7644 = vst [vmem:[#allocation143_spill] sm:$0xff] %v6106_v4 }
 0x1d4   :  { %v1363_v24 = vld [vmem:[#allocation8 + $0x3b0] sm:$0xff]  ;;  %v6114_v41 = vcombine.high %v1360_v12, %v1364_v26  ;;  %v6120_v6 = vcombine.low %v1360_v12, %v1364_v26  ;;  %v7655_v26 = vld [vmem:[#allocation57_spill] sm:$0xff]  ;;  %v7656_v12 = vld [vmem:[#allocation58_spill] sm:$0xff] }
 0x1d5   :  { %v6112_v44 = vcombine.high %v1359_v58, %v1363_v24  ;;  %v6118_v57 = vcombine.low %v1359_v58, %v1363_v24  ;;  %v7657_v24 = vld [vmem:[#allocation59_spill] sm:$0xff]  ;;  %v7658_v58 = vld [vmem:[#allocation60_spill] sm:$0xff] }
 0x1d6   :  { %2122 = vmatpush1.bf16.msra.mxu0 %v6082_v33  ;;  %2165 = vmatpush1.bf16.msra.mxu1 %v6084_v3  ;;  %7647 = vst [vmem:[#allocation146_spill] sm:$0xff] %v6114_v41  ;;  %v1368_v3 = vld [vmem:[#allocation8 + $0x3d8] sm:$0xff]  ;;  %7649 = vst [vmem:[#allocation148_spill] sm:$0xff] %v6120_v6 }
 0x1d7   :  { %2123 = vmatprep.subr.bf16.mxu0 %v6088_v50  ;;  %2166 = vmatprep.subr.bf16.mxu1 %v6090_v43  ;;  %7646 = vst [vmem:[#allocation145_spill] sm:$0xff] %v6112_v44  ;;  %v1367_v43 = vld [vmem:[#allocation8 + $0x3d0] sm:$0xff]  ;;  %v1372_v33 = vld [vmem:[#allocation8 + $0x3f8] sm:$0xff]  ;;  %7648 = vst [vmem:[#allocation147_spill] sm:$0xff] %v6118_v57 }
 0x1d8   :  { %v1371_v50 = vld [vmem:[#allocation8 + $0x3f0] sm:$0xff]  ;;  %v6126_v51 = vcombine.high %v1368_v3, %v1372_v33 }
 0x1d9   :  { %v6124_v17 = vcombine.high %v1367_v43, %v1371_v50 }
 0x1da   :  { %2124 = vmatpush1.bf16.msra.mxu0 %v6094_v56  ;;  %2167 = vmatpush1.bf16.msra.mxu1 %v6096_v5  ;;  %7651 = vst [vmem:[#allocation150_spill] sm:$0xff] %v6126_v51 }
 0x1db   :  { %2125 = vmatprep.subr.bf16.mxu0 %v6100_v13  ;;  %2168 = vmatprep.subr.bf16.mxu1 %v6102_v8  ;;  %7650 = vst [vmem:[#allocation149_spill] sm:$0xff] %v6124_v17  ;;  %v6130_v8 = vcombine.low %v1367_v43, %v1371_v50  ;;  %v7661_v50 = vld [vmem:[#allocation63_spill] sm:$0xff]  ;;  %v7662_v43 = vld [vmem:[#allocation64_spill] sm:$0xff] }
 0x1dd   :  { %7652 = vst [vmem:[#allocation151_spill] sm:$0xff] %v6130_v8 }
 0x1de   :  { %2126 = vmatpush1.bf16.msra.mxu0 %v6106_v4  ;;  %2169 = vmatpush1.bf16.msra.mxu1 %v6108_v49  ;;  %v6132_v4 = vcombine.low %v1368_v3, %v1372_v33  ;;  %v7659_v33 = vld [vmem:[#allocation61_spill] sm:$0xff]  ;;  %v7660_v3 = vld [vmem:[#allocation62_spill] sm:$0xff] }
 0x1df   :  { %2127 = vmatprep.subr.bf16.mxu0 %v6112_v44  ;;  %2170 = vmatprep.subr.bf16.mxu1 %v6114_v41 }
 0x1e0   :  { %7653 = vst [vmem:[#allocation152_spill] sm:$0xff] %v6132_v4 }
 0x1e2   :  { %2128 = vmatpush1.bf16.msra.mxu0 %v6118_v57  ;;  %2171 = vmatpush1.bf16.msra.mxu1 %v6120_v6 }
 0x1e3   :  { %2129 = vmatprep.subr.bf16.mxu0 %v6124_v17  ;;  %2172 = vmatprep.subr.bf16.mxu1 %v6126_v51 }
 0x1e6   :  { %2130 = vmatpush1.bf16.msra.mxu0 %v6130_v8  ;;  %2173 = vmatpush1.bf16.msra.mxu1 %v6132_v4 }
 0x1e7   :  { %2316 = vmatprep.subr.bf16.mxu0 %v5687_v14  ;;  %2359 = vmatprep.subr.bf16.mxu1 %v5692_v19 }
 0x1e9   :  { %2132 = vmatmul.mubr.bf16.vlgmr.msra.gmra.mrb[36].mxu0 %v5952_v52  ;;  %2175 = vmatmul.mubr.bf16.vlgmr.msra.gmra.mrb[36].mxu1 %v5952_v52  ;;  %v7654_v52 = vld [vmem:[#allocation56_spill] sm:$0xff] }
 0x1ea   :  { %2317 = vmatpush1.bf16.msra.mxu0 %v5689_v16  ;;  %2360 = vmatpush1.bf16.msra.mxu1 %v5694_v20 }
 0x1eb   :  { %2318 = vmatprep.subr.bf16.mxu0 %v5696_v21  ;;  %2361 = vmatprep.subr.bf16.mxu1 %v5700_v25 }
 0x1ee   :  { %2319 = vmatpush1.bf16.msra.mxu0 %v5704_v29  ;;  %2362 = vmatpush1.bf16.msra.mxu1 %v5708_v30 }
 0x1ef   :  { %2320 = vmatprep.subr.bf16.mxu0 %v5710_v31  ;;  %2363 = vmatprep.subr.bf16.mxu1 %v5713_v32 }
 0x1f2   :  { %2321 = vmatpush1.bf16.msra.mxu0 %v5716_v37  ;;  %2364 = vmatpush1.bf16.msra.mxu1 %v5720_v38 }
 0x1f3   :  { %2322 = vmatprep.subr.bf16.mxu0 %v5722_v39  ;;  %2365 = vmatprep.subr.bf16.mxu1 %v5725_v40 }
 0x1f6   :  { %2323 = vmatpush1.bf16.msra.mxu0 %v5731_v45  ;;  %2366 = vmatpush1.bf16.msra.mxu1 %v5736_v46 }
 0x1f7   :  { %2324 = vmatprep.subr.bf16.mxu0 %v5738_v47  ;;  %2367 = vmatprep.subr.bf16.mxu1 %v5741_v48 }
 0x1fa   :  { %2325 = vmatpush1.bf16.msra.mxu0 %v5744_v53  ;;  %2368 = vmatpush1.bf16.msra.mxu1 %v5748_v0 }
 0x1fb   :  { %2326 = vmatprep.subr.bf16.mxu0 %v5750_v54  ;;  %2369 = vmatprep.subr.bf16.mxu1 %v5753_v55 }
 0x1fe   :  { %2327 = vmatpush1.bf16.msra.mxu0 %v5758_v60  ;;  %2370 = vmatpush1.bf16.msra.mxu1 %v5762_v61  ;;  %v7692_v60 = vld [vmem:[#allocation92_spill] sm:$0xff] }
 0x1ff   :  { %2328 = vmatprep.subr.bf16.mxu0 %v5764_v62  ;;  %2371 = vmatprep.subr.bf16.mxu1 %v5767_v63 }
 0x202   :  { %2329 = vmatpush1.bf16.msra.mxu0 %v5770_v1  ;;  %2372 = vmatpush1.bf16.msra.mxu1 %v5774_v2 }
 0x203   :  { %2330 = vmatprep.subr.bf16.mxu0 %v5779_v7  ;;  %2373 = vmatprep.subr.bf16.mxu1 %v5781_v9 }
 0x206   :  { %2331 = vmatpush1.bf16.msra.mxu0 %v5785_v10  ;;  %2374 = vmatpush1.bf16.msra.mxu1 %v5787_v11  ;;  %v7685_v11 = vld [vmem:[#allocation85_spill] sm:$0xff] }
 0x207   :  { %2332 = vmatprep.subr.bf16.mxu0 %v5791_v15  ;;  %2375 = vmatprep.subr.bf16.mxu1 %v5793_v18  ;;  %v7681_v18 = vld [vmem:[#allocation83_spill] sm:$0xff] }
 0x20a   :  { %2333 = vmatpush1.bf16.msra.mxu0 %v5795_v22  ;;  %2376 = vmatpush1.bf16.msra.mxu1 %v5797_v23  ;;  %v7680_v22 = vld [vmem:[#allocation82_spill] sm:$0xff] }
 0x20b   :  { %2334 = vmatprep.subr.bf16.mxu0 %v5803_v28  ;;  %2377 = vmatprep.subr.bf16.mxu1 %v5805_v34 }
 0x20e   :  { %2335 = vmatpush1.bf16.msra.mxu0 %v5807_v35  ;;  %2378 = vmatpush1.bf16.msra.mxu1 %v5809_v36  ;;  %v7663_v35 = vld [vmem:[#allocation65_spill] sm:$0xff]  ;;  %v7664_v36 = vld [vmem:[#allocation66_spill] sm:$0xff] }
 0x20f   :  { %2336 = vmatprep.subr.bf16.mxu0 %v7654_v52  ;;  %2379 = vmatprep.subr.bf16.mxu1 %v7655_v26  ;;  %v7665_v52 = vld [vmem:[#allocation67_spill] sm:$0xff]  ;;  %v7666_v26 = vld [vmem:[#allocation68_spill] sm:$0xff] }
 0x212   :  { %2337 = vmatpush1.bf16.msra.mxu0 %v7656_v12  ;;  %2380 = vmatpush1.bf16.msra.mxu1 %v7657_v24  ;;  %v7667_v12 = vld [vmem:[#allocation69_spill] sm:$0xff]  ;;  %v7668_v24 = vld [vmem:[#allocation70_spill] sm:$0xff] }
 0x213   :  { %2338 = vmatprep.subr.bf16.mxu0 %v7658_v58  ;;  %2381 = vmatprep.subr.bf16.mxu1 %v7659_v33  ;;  %v7669_v58 = vld [vmem:[#allocation71_spill] sm:$0xff]  ;;  %v7670_v33 = vld [vmem:[#allocation72_spill] sm:$0xff] }
 0x216   :  { %2339 = vmatpush1.bf16.msra.mxu0 %v7660_v3  ;;  %2382 = vmatpush1.bf16.msra.mxu1 %v7661_v50  ;;  %v7671_v3 = vld [vmem:[#allocation73_spill] sm:$0xff]  ;;  %v7672_v50 = vld [vmem:[#allocation74_spill] sm:$0xff] }
 0x217   :  { %2340 = vmatprep.subr.bf16.mxu0 %v7662_v43  ;;  %2383 = vmatprep.subr.bf16.mxu1 %v7663_v35  ;;  %v7673_v43 = vld [vmem:[#allocation75_spill] sm:$0xff]  ;;  %v7674_v35 = vld [vmem:[#allocation76_spill] sm:$0xff] }
 0x21a   :  { %2341 = vmatpush1.bf16.msra.mxu0 %v7664_v36  ;;  %2384 = vmatpush1.bf16.msra.mxu1 %v7665_v52  ;;  %v7675_v36 = vld [vmem:[#allocation77_spill] sm:$0xff]  ;;  %v7676_v52 = vld [vmem:[#allocation78_spill] sm:$0xff] }
 0x21b   :  { %2342 = vmatprep.subr.bf16.mxu0 %v7666_v26  ;;  %2385 = vmatprep.subr.bf16.mxu1 %v7667_v12  ;;  %v7677_v26 = vld [vmem:[#allocation79_spill] sm:$0xff]  ;;  %v7678_v12 = vld [vmem:[#allocation80_spill] sm:$0xff] }
 0x21e   :  { %2343 = vmatpush1.bf16.msra.mxu0 %v7668_v24  ;;  %2386 = vmatpush1.bf16.msra.mxu1 %v7669_v58  ;;  %v7679_v24 = vld [vmem:[#allocation81_spill] sm:$0xff] }
 0x21f   :  { %2344 = vmatprep.subr.bf16.mxu0 %v7670_v33  ;;  %2387 = vmatprep.subr.bf16.mxu1 %v7671_v3 }
 0x222   :  { %2345 = vmatpush1.bf16.msra.mxu0 %v7672_v50  ;;  %2388 = vmatpush1.bf16.msra.mxu1 %v7673_v43 }
 0x223   :  { %2346 = vmatprep.subr.bf16.mxu0 %v7674_v35  ;;  %2389 = vmatprep.subr.bf16.mxu1 %v7675_v36  ;;  %v172_v35 = vsub.s32 2, %v7680_v22  ;;  %v176_v36 = vsub.s32 3, %v7680_v22 }
 0x226   :  { %2347 = vmatpush1.bf16.msra.mxu0 %v7676_v52  ;;  %2390 = vmatpush1.bf16.msra.mxu1 %v7677_v26  ;;  %v6209_v52 = vrot.slane %v7681_v18, %v172_v35  ;;  %v6212_v26 = vrot.slane %v7681_v18, %v176_v36 }
 0x227   :  { %2402 = vmatprep.subr.bf16.mxu0 %v7678_v12  ;;  %2445 = vmatprep.subr.bf16.mxu1 %v7679_v24  ;;  %v7684_v12 = vld [vmem:[#allocation84_spill] sm:$0xff] }
 0x228   :  { %7682 = vst [vmem:[#allocation82_spill] sm:$0xff] %v6209_v52  ;;  %7683 = vst [vmem:[#allocation83_spill] sm:$0xff] %v6212_v26 }
 0x27c   :  { %v2047_v58 = vpop.f32.mrb[4].mxu0  ;;  %v2090_v33 = vpop.f32.mrb[4].mxu1 }
 0x27d   :  { %v2049_v34 = vpop.f32.mrb[5].mxu0  ;;  %v2092_v3 = vpop.f32.mrb[5].mxu1  ;;  %v4645_v24 = vadd.f32 %v2047_v58, %v7684_v12  ;;  %v4673_v15 = vadd.f32 %v2090_v33, %v6209_v52 }
 0x27e   :  { %v2051_v28 = vpop.f32.mrb[6].mxu0  ;;  %v2094_v50 = vpop.f32.mrb[6].mxu1  ;;  %v4646_v10 = vadd.f32 %v2049_v34, %v7685_v11  ;;  %v4674_v9 = vadd.f32 %v2092_v3, %v6212_v26 }
 0x27f   :  { %v2053_v23 = vpop.f32.mrb[7].mxu0  ;;  %v2096_v43 = vpop.f32.mrb[7].mxu1  ;;  %v4522_v7 = vmul.f32 -1.442695, %v4645_v24  ;;  %v4647_v2 = vadd.f32 %v2051_v28, %v7684_v12  ;;  %v4524_v1 = vmul.f32 -1.442695, %v4673_v15  ;;  %v4675_v22 = vadd.f32 %v2094_v50, %v6209_v52 }
 0x280   :  { %v4523_v63 = vmul.f32 -1.442695, %v4646_v10  ;;  %v4648_v35 = vadd.f32 %v2053_v23, %v7685_v11  ;;  %v4525_v62 = vmul.f32 -1.442695, %v4674_v9  ;;  %v4676_v18 = vadd.f32 %v2096_v43, %v6212_v26 }
 0x281   :  { %4953 = vpow2.f32 %v4522_v7  ;;  %v4528_v36 = vmul.f32 -1.442695, %v4647_v2  ;;  %v4530_v58 = vmul.f32 -1.442695, %v4675_v22 }
 0x282   :  { %4955 = vpow2.f32 %v4524_v1  ;;  %v4529_v34 = vmul.f32 -1.442695, %v4648_v35  ;;  %v4531_v33 = vmul.f32 -1.442695, %v4676_v18 }
 0x283   :  { %4957 = vpow2.f32 %v4523_v63 }
 0x284   :  { %4959 = vpow2.f32 %v4525_v62 }
 0x285   :  { %4961 = vpow2.f32 %v4528_v36 }
 0x286   :  { %4963 = vpow2.f32 %v4530_v58  ;;  %v7686_v58 = vld [vmem:[#allocation86_spill] sm:$0xff] }
 0x287   :  { %4965 = vpow2.f32 %v4529_v34 }
 0x288   :  { %4967 = vpow2.f32 %v4531_v33  ;;  %v7687_v33 = vld [vmem:[#allocation87_spill] sm:$0xff] }
 0x28b   :  { %v4954_v15 = vpop.eup %4953 }
 0x28c   :  { %v4956_v28 = vpop.eup %4955  ;;  %v2237_v23 = vadd.f32 1.0, %v4954_v15 }
 0x28d   :  { %v4958_v10 = vpop.eup %4957  ;;  %v2239_v3 = vadd.f32 1.0, %v4956_v28 }
 0x28e   :  { %v4960_v24 = vpop.eup %4959  ;;  %v2238_v7 = vadd.f32 1.0, %v4958_v10  ;;  %4969 = vrcp.f32 %v2237_v23 }
 0x28f   :  { %v4962_v9 = vpop.eup %4961  ;;  %v2240_v1 = vadd.f32 1.0, %v4960_v24  ;;  %4971 = vrcp.f32 %v2239_v3  ;;  %v7688_v24 = vld [vmem:[#allocation88_spill] sm:$0xff] }
 0x290   :  { %v4964_v50 = vpop.eup %4963  ;;  %v2243_v63 = vadd.f32 1.0, %v4962_v9  ;;  %4973 = vrcp.f32 %v2238_v7  ;;  %v7689_v9 = vld [vmem:[#allocation89_spill] sm:$0xff] }
 0x291   :  { %v4966_v2 = vpop.eup %4965  ;;  %v2245_v62 = vadd.f32 1.0, %v4964_v50  ;;  %4975 = vrcp.f32 %v2240_v1 }
 0x292   :  { %v4968_v43 = vpop.eup %4967  ;;  %v2244_v22 = vadd.f32 1.0, %v4966_v2  ;;  %4977 = vrcp.f32 %v2243_v63 }
 0x293   :  { %v2246_v35 = vadd.f32 1.0, %v4968_v43  ;;  %4979 = vrcp.f32 %v2245_v62 }
 0x294   :  { %4981 = vrcp.f32 %v2244_v22 }
 0x295   :  { %4983 = vrcp.f32 %v2246_v35 }
 0x2bc   :  { %v2133_v18 = vpop.f32.mrb[36].mxu0  ;;  %v2176_v36 = vpop.f32.mrb[36].mxu1 }
 0x2bd   :  { %v4701_v34 = vadd.f32 %v2133_v18, %v7686_v58  ;;  %v4729_v15 = vadd.f32 %v2176_v36, %v7687_v33  ;;  %v2135_v28 = vpop.f32.mrb[37].mxu0  ;;  %v2178_v10 = vpop.f32.mrb[37].mxu1 }
 0x2be   :  { %v4702_v23 = vadd.f32 %v2135_v28, %v7688_v24  ;;  %v4730_v3 = vadd.f32 %v2178_v10, %v7689_v9  ;;  %v2137_v50 = vpop.f32.mrb[38].mxu0  ;;  %v2180_v7 = vpop.f32.mrb[38].mxu1 }
 0x2bf   :  { %v4526_v2 = vmul.f32 -1.442695, %v4701_v34  ;;  %4985 = vtanh.f32 %v4729_v15  ;;  %v4703_v1 = vadd.f32 %v2137_v50, %v7686_v58  ;;  %v2139_v43 = vpop.f32.mrb[39].mxu0  ;;  %v2182_v63 = vpop.f32.mrb[39].mxu1  ;;  %v4731_v22 = vadd.f32 %v2180_v7, %v7687_v33 }
 0x2c0   :  { %v4527_v62 = vmul.f32 -1.442695, %v4702_v23  ;;  %4987 = vtanh.f32 %v4730_v3  ;;  %v4704_v18 = vadd.f32 %v2139_v43, %v7688_v24  ;;  %v4970_v36 = vpop.eup %4969  ;;  %v4732_v26 = vadd.f32 %v2182_v63, %v7689_v9  ;;  %v7690_v24 = vld [vmem:[#allocation90_spill] sm:$0xff] }
 0x2c1   :  { %4989 = vpow2.f32 %v4526_v2  ;;  %v4532_v35 = vmul.f32 -1.442695, %v4703_v1  ;;  %v4972_v28 = vpop.eup %4971 }
 0x2c2   :  { %4991 = vpow2.f32 %v4527_v62  ;;  %v4533_v10 = vmul.f32 -1.442695, %v4704_v18  ;;  %v4974_v34 = vpop.eup %4973  ;;  %v2277_v2 = vmul.f32 %v4972_v28, %v7690_v24  ;;  %v7691_v62 = vld [vmem:[#allocation91_spill] sm:$0xff]  ;;  %v7693_v28 = vld [vmem:[#allocation93_spill] sm:$0xff] }
 0x2c3   :  { %4993 = vpow2.f32 %v4532_v35  ;;  %v4976_v15 = vpop.eup %4975 }
 0x2c4   :  { %4995 = vtanh.f32 %v4731_v22  ;;  %v4978_v50 = vpop.eup %4977  ;;  %v2278_v18 = vmul.f32 %v4976_v15, %v7691_v62 }
 0x2c5   :  { %4997 = vpow2.f32 %v4533_v10  ;;  %v4980_v23 = vpop.eup %4979 }
 0x2c6   :  { %4999 = vtanh.f32 %v4732_v26  ;;  %v4982_v3 = vpop.eup %4981  ;;  %v2279_v55 = vmul.f32 %v4980_v23, %v7692_v60 }
 0x2c7   :  { %v4984_v7 = vpop.eup %4983 }
 0x2c9   :  { %v4986_v33 = vpop.eup %4985 }
 0x2ca   :  { %v4988_v43 = vpop.eup %4987  ;;  %v2281_v1 = vmul.f32 %v4986_v33, %v4970_v36 }
 0x2cb   :  { %v4990_v58 = vpop.eup %4989  ;;  %v2282_v11 = vmul.f32 %v4988_v43, %v4974_v34 }
 0x2cc   :  { %v4992_v63 = vpop.eup %4991  ;;  %v2241_v9 = vadd.f32 1.0, %v4990_v58  ;;  %v6232_v35 = vadd.f32 %v2281_v1, %v2277_v2  ;;  %v2280_v58 = vmul.f32 %v4984_v7, %v7693_v28  ;;  %v7701_v28 = vld [vmem:[#allocation101_spill] sm:$0xff] }
 0x2cd   :  { %v4994_v22 = vpop.eup %4993  ;;  %v2242_v52 = vadd.f32 1.0, %v4992_v63  ;;  %v6234_v10 = vadd.f32 %v2282_v11, %v2278_v18  ;;  %v7694_v18 = vld [vmem:[#allocation94_spill] sm:$0xff]  ;;  %v7695_v63 = vld [vmem:[#allocation95_spill] sm:$0xff] }
 0x2ce   :  { %v4996_v26 = vpop.eup %4995  ;;  %5001 = vrcp.f32 %v2241_v9  ;;  %v2247_v12 = vadd.f32 1.0, %v4994_v22  ;;  %v7696_v22 = vld [vmem:[#allocation96_spill] sm:$0xff] }
 0x2cf   :  { %v4998_v61 = vpop.eup %4997  ;;  %5003 = vtanh.f32 %v6232_v35  ;;  %v2283_v33 = vmul.f32 %v4996_v26, %v4978_v50  ;;  %v7697_v26 = vld [vmem:[#allocation97_spill] sm:$0xff] }
 0x2d0   :  { %v5000_v24 = vpop.eup %4999  ;;  %5005 = vrcp.f32 %v2242_v52  ;;  %v2248_v36 = vadd.f32 1.0, %v4998_v61 }
 0x2d1   :  { %5007 = vtanh.f32 %v6234_v10  ;;  %v6240_v34 = vadd.f32 %v2283_v33, %v2279_v55  ;;  %v2284_v11 = vmul.f32 %v5000_v24, %v4982_v3  ;;  %v7698_v33 = vld [vmem:[#allocation98_spill] sm:$0xff]  ;;  %v7699_v24 = vld [vmem:[#allocation99_spill] sm:$0xff] }
 0x2d2   :  { %5009 = vrcp.f32 %v2247_v12 }
 0x2d3   :  { %5011 = vtanh.f32 %v6240_v34  ;;  %v6243_v9 = vadd.f32 %v2284_v11, %v2280_v58  ;;  %v7702_v58 = vld [vmem:[#allocation102_spill] sm:$0xff]  ;;  %v7703_v11 = vld [vmem:[#allocation103_spill] sm:$0xff] }
 0x2d4   :  { %5013 = vrcp.f32 %v2248_v36  ;;  %v7700_v36 = vld [vmem:[#allocation100_spill] sm:$0xff] }
 0x2d5   :  { %5015 = vtanh.f32 %v6243_v9 }
 0x2d8   :  { %v5002_v60 = vpop.eup %5001 }
 0x2d9   :  { %v5004_v15 = vpop.eup %5003 }
 0x2da   :  { %v5006_v50 = vpop.eup %5005  ;;  %v2293_v43 = vmul.f32 %v5004_v15, %v5002_v60  ;;  %v7704_v60 = vld [vmem:[#allocation104_spill] sm:$0xff]  ;;  %v7705_v15 = vld [vmem:[#allocation105_spill] sm:$0xff] }
 0x2db   :  { %v5008_v52 = vpop.eup %5007 }
 0x2dc   :  { %v5010_v61 = vpop.eup %5009  ;;  %v2294_v1 = vmul.f32 %v5008_v52, %v5006_v50  ;;  %v7706_v50 = vld [vmem:[#allocation106_spill] sm:$0xff]  ;;  %v7707_v52 = vld [vmem:[#allocation107_spill] sm:$0xff] }
 0x2dd   :  { %v5012_v23 = vpop.eup %5011 }
 0x2de   :  { %v5014_v7 = vpop.eup %5013  ;;  %v2295_v2 = vmul.f32 %v5012_v23, %v5010_v61  ;;  %v7708_v61 = vld [vmem:[#allocation108_spill] sm:$0xff]  ;;  %v7709_v23 = vld [vmem:[#allocation109_spill] sm:$0xff] }
 0x2df   :  { %v5016_v55 = vpop.eup %5015 }
 0x2e0   :  { %v2296_v3 = vmul.f32 %v5016_v55, %v5014_v7  ;;  %v6246_v12 = vpack.c.bf16 %v2295_v2, %v2293_v43  ;;  %v7710_v7 = vld [vmem:[#allocation110_spill] sm:$0xff]  ;;  %v7711_v43 = vld [vmem:[#allocation111_spill] sm:$0xff]  ;;  %v7712_v2 = vld [vmem:[#allocation112_spill] sm:$0xff] }
 0x2e1   :  { %v7713_v55 = vld [vmem:[#allocation113_spill] sm:$0xff] }
 0x2e2   :  { %v2315_v62 = vpack.c.bf16 %v2296_v3, %v2294_v1  ;;  %v7714_v1 = vld [vmem:[#allocation114_spill] sm:$0xff]  ;;  %v7715_v3 = vld [vmem:[#allocation115_spill] sm:$0xff] }
 0x2e4   :  { %2348 = vmatprep.mubr.bf16.mxu0 %v2315_v62  ;;  %2391 = vmatprep.mubr.bf16.mxu1 %v2315_v62 }
 0x2e5   :  { %2349 = vmatmul.mubr.bf16.vlgmr.msra.gmra.mrb[8].mxu0 %v6246_v12  ;;  %2392 = vmatmul.mubr.bf16.vlgmr.msra.gmra.mrb[8].mxu1 %v6246_v12 }
 0x2e6   :  { %2403 = vmatpush1.bf16.msra.mxu0 %v5891_v27  ;;  %2446 = vmatpush1.bf16.msra.mxu1 %v5893_v42 }
 0x2e7   :  { %2434 = vmatprep.mubr.bf16.mxu0 %v2315_v62  ;;  %2477 = vmatprep.mubr.bf16.mxu1 %v2315_v62  ;;  %v7716_v62 = vld [vmem:[#allocation116_spill] sm:$0xff] }
 0x2e8   :  { %2404 = vmatprep.subr.bf16.mxu0 %v5954_v59  ;;  %2447 = vmatprep.subr.bf16.mxu1 %v7694_v18 }
 0x2ea   :  { %2405 = vmatpush1.bf16.msra.mxu0 %v7695_v63  ;;  %2448 = vmatpush1.bf16.msra.mxu1 %v7696_v22 }
 0x2eb   :  { %2406 = vmatprep.subr.bf16.mxu0 %v7697_v26  ;;  %2449 = vmatprep.subr.bf16.mxu1 %v7698_v33 }
 0x2ee   :  { %2407 = vmatpush1.bf16.msra.mxu0 %v7699_v24  ;;  %2450 = vmatpush1.bf16.msra.mxu1 %v7700_v36 }
 0x2ef   :  { %2408 = vmatprep.subr.bf16.mxu0 %v7701_v28  ;;  %2451 = vmatprep.subr.bf16.mxu1 %v7702_v58 }
 0x2f2   :  { %2409 = vmatpush1.bf16.msra.mxu0 %v7703_v11  ;;  %2452 = vmatpush1.bf16.msra.mxu1 %v7704_v60 }
 0x2f3   :  { %2410 = vmatprep.subr.bf16.mxu0 %v7705_v15  ;;  %2453 = vmatprep.subr.bf16.mxu1 %v7706_v50  ;;  %v7717_v50 = vld [vmem:[#allocation117_spill] sm:$0xff] }
 0x2f6   :  { %2411 = vmatpush1.bf16.msra.mxu0 %v7707_v52  ;;  %2454 = vmatpush1.bf16.msra.mxu1 %v7708_v61  ;;  %v7718_v52 = vld [vmem:[#allocation118_spill] sm:$0xff]  ;;  %v7719_v61 = vld [vmem:[#allocation119_spill] sm:$0xff] }
 0x2f7   :  { %2412 = vmatprep.subr.bf16.mxu0 %v7709_v23  ;;  %2455 = vmatprep.subr.bf16.mxu1 %v7710_v7  ;;  %v7720_v23 = vld [vmem:[#allocation120_spill] sm:$0xff]  ;;  %v7721_v7 = vld [vmem:[#allocation121_spill] sm:$0xff] }
 0x2fa   :  { %2413 = vmatpush1.bf16.msra.mxu0 %v7711_v43  ;;  %2456 = vmatpush1.bf16.msra.mxu1 %v7712_v2  ;;  %v7722_v43 = vld [vmem:[#allocation122_spill] sm:$0xff]  ;;  %v7723_v2 = vld [vmem:[#allocation123_spill] sm:$0xff] }
 0x2fb   :  { %2414 = vmatprep.subr.bf16.mxu0 %v7713_v55  ;;  %2457 = vmatprep.subr.bf16.mxu1 %v7714_v1  ;;  %v7724_v55 = vld [vmem:[#allocation124_spill] sm:$0xff]  ;;  %v7725_v1 = vld [vmem:[#allocation125_spill] sm:$0xff] }
 0x2fe   :  { %2415 = vmatpush1.bf16.msra.mxu0 %v7715_v3  ;;  %2458 = vmatpush1.bf16.msra.mxu1 %v7716_v62  ;;  %v7726_v3 = vld [vmem:[#allocation126_spill] sm:$0xff]  ;;  %v7727_v62 = vld [vmem:[#allocation127_spill] sm:$0xff] }
 0x2ff   :  { %2416 = vmatprep.subr.bf16.mxu0 %v7717_v50  ;;  %2459 = vmatprep.subr.bf16.mxu1 %v7718_v52  ;;  %v7728_v50 = vld [vmem:[#allocation128_spill] sm:$0xff]  ;;  %v7729_v52 = vld [vmem:[#allocation129_spill] sm:$0xff] }
 0x302   :  { %2417 = vmatpush1.bf16.msra.mxu0 %v7719_v61  ;;  %2460 = vmatpush1.bf16.msra.mxu1 %v7720_v23  ;;  %v7730_v61 = vld [vmem:[#allocation130_spill] sm:$0xff]  ;;  %v7731_v23 = vld [vmem:[#allocation131_spill] sm:$0xff] }
 0x303   :  { %2418 = vmatprep.subr.bf16.mxu0 %v7721_v7  ;;  %2461 = vmatprep.subr.bf16.mxu1 %v7722_v43  ;;  %v7732_v7 = vld [vmem:[#allocation132_spill] sm:$0xff]  ;;  %v7733_v43 = vld [vmem:[#allocation133_spill] sm:$0xff] }
 0x306   :  { %2419 = vmatpush1.bf16.msra.mxu0 %v7723_v2  ;;  %2462 = vmatpush1.bf16.msra.mxu1 %v7724_v55  ;;  %v7734_v2 = vld [vmem:[#allocation134_spill] sm:$0xff]  ;;  %v7735_v55 = vld [vmem:[#allocation135_spill] sm:$0xff] }
 0x307   :  { %2420 = vmatprep.subr.bf16.mxu0 %v7725_v1  ;;  %2463 = vmatprep.subr.bf16.mxu1 %v7726_v3  ;;  %v7736_v1 = vld [vmem:[#allocation136_spill] sm:$0xff]  ;;  %v7737_v3 = vld [vmem:[#allocation137_spill] sm:$0xff] }
 0x30a   :  { %2421 = vmatpush1.bf16.msra.mxu0 %v7727_v62  ;;  %2464 = vmatpush1.bf16.msra.mxu1 %v7728_v50  ;;  %v7738_v62 = vld [vmem:[#allocation138_spill] sm:$0xff] }
 0x30b   :  { %2422 = vmatprep.subr.bf16.mxu0 %v7729_v52  ;;  %2465 = vmatprep.subr.bf16.mxu1 %v7730_v61 }
 0x30e   :  { %2423 = vmatpush1.bf16.msra.mxu0 %v7731_v23  ;;  %2466 = vmatpush1.bf16.msra.mxu1 %v7732_v7  ;;  %v7739_v23 = vld [vmem:[#allocation142_spill] sm:$0xff]  ;;  %v7740_v7 = vld [vmem:[#allocation143_spill] sm:$0xff] }
 0x30f   :  { %2424 = vmatprep.subr.bf16.mxu0 %v7733_v43  ;;  %2467 = vmatprep.subr.bf16.mxu1 %v7734_v2 }
 0x312   :  { %2425 = vmatpush1.bf16.msra.mxu0 %v7735_v55  ;;  %2468 = vmatpush1.bf16.msra.mxu1 %v7736_v1 }
 0x313   :  { %2426 = vmatprep.subr.bf16.mxu0 %v7737_v3  ;;  %2469 = vmatprep.subr.bf16.mxu1 %v7738_v62 }
 0x316   :  { %2427 = vmatpush1.bf16.msra.mxu0 %v6094_v56  ;;  %2470 = vmatpush1.bf16.msra.mxu1 %v6096_v5 }
 0x317   :  { %2428 = vmatprep.subr.bf16.mxu0 %v6100_v13  ;;  %2471 = vmatprep.subr.bf16.mxu1 %v7739_v23 }
 0x31a   :  { %2429 = vmatpush1.bf16.msra.mxu0 %v7740_v7  ;;  %2472 = vmatpush1.bf16.msra.mxu1 %v6108_v49 }
 0x31b   :  { %2430 = vmatprep.subr.bf16.mxu0 %v6112_v44  ;;  %2473 = vmatprep.subr.bf16.mxu1 %v6114_v41 }
 0x31e   :  { %2431 = vmatpush1.bf16.msra.mxu0 %v6118_v57  ;;  %2474 = vmatpush1.bf16.msra.mxu1 %v6120_v6 }
 0x31f   :  { %2432 = vmatprep.subr.bf16.mxu0 %v6124_v17  ;;  %2475 = vmatprep.subr.bf16.mxu1 %v6126_v51 }
 0x322   :  { %2433 = vmatpush1.bf16.msra.mxu0 %v6130_v8  ;;  %2476 = vmatpush1.bf16.msra.mxu1 %v6132_v4 }
 0x323   :  { %2619 = vmatprep.subr.bf16.mxu0 %v5687_v14  ;;  %2662 = vmatprep.subr.bf16.mxu1 %v5692_v19 }
 0x325   :  { %2435 = vmatmul.mubr.bf16.vlgmr.msra.gmra.mrb[40].mxu0 %v6246_v12  ;;  %2478 = vmatmul.mubr.bf16.vlgmr.msra.gmra.mrb[40].mxu1 %v6246_v12  ;;  %v7741_v12 = vld [vmem:[#allocation37_spill] sm:$0xff] }
 0x326   :  { %2620 = vmatpush1.bf16.msra.mxu0 %v5689_v16  ;;  %2663 = vmatpush1.bf16.msra.mxu1 %v5694_v20 }
 0x327   :  { %2621 = vmatprep.subr.bf16.mxu0 %v5696_v21  ;;  %2664 = vmatprep.subr.bf16.mxu1 %v5700_v25  ;;  %v7788_v25 = vld [vmem:[#allocation85_spill] sm:$0xff]  ;;  %v7789_v21 = vld [vmem:[#allocation83_spill] sm:$0xff] }
 0x32a   :  { %2622 = vmatpush1.bf16.msra.mxu0 %v5704_v29  ;;  %2665 = vmatpush1.bf16.msra.mxu1 %v5708_v30  ;;  %v7786_v30 = vld [vmem:[#allocation84_spill] sm:$0xff]  ;;  %v7787_v29 = vld [vmem:[#allocation82_spill] sm:$0xff] }
 0x32b   :  { %2623 = vmatprep.subr.bf16.mxu0 %v5710_v31  ;;  %2666 = vmatprep.subr.bf16.mxu1 %v5713_v32 }
 0x32e   :  { %2624 = vmatpush1.bf16.msra.mxu0 %v5716_v37  ;;  %2667 = vmatpush1.bf16.msra.mxu1 %v5720_v38  ;;  %v7742_v38 = vld [vmem:[#allocation38_spill] sm:$0xff] }
 0x32f   :  { %2625 = vmatprep.subr.bf16.mxu0 %v5722_v39  ;;  %2668 = vmatprep.subr.bf16.mxu1 %v5725_v40  ;;  %v7743_v39 = vld [vmem:[#allocation39_spill] sm:$0xff]  ;;  %v7744_v40 = vld [vmem:[#allocation40_spill] sm:$0xff] }
 0x332   :  { %2626 = vmatpush1.bf16.msra.mxu0 %v5731_v45  ;;  %2669 = vmatpush1.bf16.msra.mxu1 %v5736_v46  ;;  %v7745_v45 = vld [vmem:[#allocation41_spill] sm:$0xff]  ;;  %v7746_v46 = vld [vmem:[#allocation42_spill] sm:$0xff] }
 0x333   :  { %2627 = vmatprep.subr.bf16.mxu0 %v5738_v47  ;;  %2670 = vmatprep.subr.bf16.mxu1 %v5741_v48  ;;  %v7747_v47 = vld [vmem:[#allocation43_spill] sm:$0xff]  ;;  %v7748_v48 = vld [vmem:[#allocation44_spill] sm:$0xff] }
 0x336   :  { %2628 = vmatpush1.bf16.msra.mxu0 %v5744_v53  ;;  %2671 = vmatpush1.bf16.msra.mxu1 %v5748_v0  ;;  %v7749_v53 = vld [vmem:[#allocation45_spill] sm:$0xff]  ;;  %v7750_v0 = vld [vmem:[#allocation46_spill] sm:$0xff] }
 0x337   :  { %2629 = vmatprep.subr.bf16.mxu0 %v5750_v54  ;;  %2672 = vmatprep.subr.bf16.mxu1 %v7741_v12  ;;  %v7751_v54 = vld [vmem:[#allocation47_spill] sm:$0xff]  ;;  %v7752_v12 = vld [vmem:[#allocation48_spill] sm:$0xff] }
 0x33a   :  { %2630 = vmatpush1.bf16.msra.mxu0 %v7742_v38  ;;  %2673 = vmatpush1.bf16.msra.mxu1 %v7743_v39  ;;  %v7753_v38 = vld [vmem:[#allocation49_spill] sm:$0xff]  ;;  %v7754_v39 = vld [vmem:[#allocation50_spill] sm:$0xff] }
 0x33b   :  { %2631 = vmatprep.subr.bf16.mxu0 %v7744_v40  ;;  %2674 = vmatprep.subr.bf16.mxu1 %v7745_v45  ;;  %v7755_v40 = vld [vmem:[#allocation51_spill] sm:$0xff]  ;;  %v7756_v45 = vld [vmem:[#allocation52_spill] sm:$0xff] }
 0x33e   :  { %2632 = vmatpush1.bf16.msra.mxu0 %v7746_v46  ;;  %2675 = vmatpush1.bf16.msra.mxu1 %v7747_v47  ;;  %v7757_v46 = vld [vmem:[#allocation53_spill] sm:$0xff]  ;;  %v7758_v47 = vld [vmem:[#allocation54_spill] sm:$0xff] }
 0x33f   :  { %2633 = vmatprep.subr.bf16.mxu0 %v7748_v48  ;;  %2676 = vmatprep.subr.bf16.mxu1 %v7749_v53  ;;  %v7759_v48 = vld [vmem:[#allocation55_spill] sm:$0xff]  ;;  %v7760_v53 = vld [vmem:[#allocation56_spill] sm:$0xff] }
 0x342   :  { %2634 = vmatpush1.bf16.msra.mxu0 %v7750_v0  ;;  %2677 = vmatpush1.bf16.msra.mxu1 %v7751_v54  ;;  %v7761_v0 = vld [vmem:[#allocation57_spill] sm:$0xff]  ;;  %v7762_v54 = vld [vmem:[#allocation58_spill] sm:$0xff] }
 0x343   :  { %2635 = vmatprep.subr.bf16.mxu0 %v7752_v12  ;;  %2678 = vmatprep.subr.bf16.mxu1 %v7753_v38  ;;  %v7763_v12 = vld [vmem:[#allocation59_spill] sm:$0xff]  ;;  %v7764_v38 = vld [vmem:[#allocation60_spill] sm:$0xff] }
 0x346   :  { %2636 = vmatpush1.bf16.msra.mxu0 %v7754_v39  ;;  %2679 = vmatpush1.bf16.msra.mxu1 %v7755_v40  ;;  %v7765_v39 = vld [vmem:[#allocation61_spill] sm:$0xff]  ;;  %v7766_v40 = vld [vmem:[#allocation62_spill] sm:$0xff] }
 0x347   :  { %2637 = vmatprep.subr.bf16.mxu0 %v7756_v45  ;;  %2680 = vmatprep.subr.bf16.mxu1 %v7757_v46  ;;  %v7767_v45 = vld [vmem:[#allocation63_spill] sm:$0xff]  ;;  %v7768_v46 = vld [vmem:[#allocation64_spill] sm:$0xff] }
 0x34a   :  { %2638 = vmatpush1.bf16.msra.mxu0 %v7758_v47  ;;  %2681 = vmatpush1.bf16.msra.mxu1 %v7759_v48  ;;  %v7769_v47 = vld [vmem:[#allocation65_spill] sm:$0xff]  ;;  %v7770_v48 = vld [vmem:[#allocation66_spill] sm:$0xff] }
 0x34b   :  { %2639 = vmatprep.subr.bf16.mxu0 %v7760_v53  ;;  %2682 = vmatprep.subr.bf16.mxu1 %v7761_v0  ;;  %v7771_v53 = vld [vmem:[#allocation67_spill] sm:$0xff]  ;;  %v7772_v0 = vld [vmem:[#allocation68_spill] sm:$0xff] }
 0x34e   :  { %2640 = vmatpush1.bf16.msra.mxu0 %v7762_v54  ;;  %2683 = vmatpush1.bf16.msra.mxu1 %v7763_v12  ;;  %v7773_v54 = vld [vmem:[#allocation69_spill] sm:$0xff]  ;;  %v7774_v12 = vld [vmem:[#allocation70_spill] sm:$0xff] }
 0x34f   :  { %2641 = vmatprep.subr.bf16.mxu0 %v7764_v38  ;;  %2684 = vmatprep.subr.bf16.mxu1 %v7765_v39  ;;  %v7775_v38 = vld [vmem:[#allocation71_spill] sm:$0xff]  ;;  %v7776_v39 = vld [vmem:[#allocation72_spill] sm:$0xff] }
 0x352   :  { %2642 = vmatpush1.bf16.msra.mxu0 %v7766_v40  ;;  %2685 = vmatpush1.bf16.msra.mxu1 %v7767_v45  ;;  %v7777_v40 = vld [vmem:[#allocation73_spill] sm:$0xff]  ;;  %v7778_v45 = vld [vmem:[#allocation74_spill] sm:$0xff] }
 0x353   :  { %2643 = vmatprep.subr.bf16.mxu0 %v7768_v46  ;;  %2686 = vmatprep.subr.bf16.mxu1 %v7769_v47  ;;  %v7779_v46 = vld [vmem:[#allocation75_spill] sm:$0xff]  ;;  %v7780_v47 = vld [vmem:[#allocation76_spill] sm:$0xff] }
 0x356   :  { %2644 = vmatpush1.bf16.msra.mxu0 %v7770_v48  ;;  %2687 = vmatpush1.bf16.msra.mxu1 %v7771_v53  ;;  %v7781_v48 = vld [vmem:[#allocation77_spill] sm:$0xff]  ;;  %v7782_v53 = vld [vmem:[#allocation78_spill] sm:$0xff] }
 0x357   :  { %2645 = vmatprep.subr.bf16.mxu0 %v7772_v0  ;;  %2688 = vmatprep.subr.bf16.mxu1 %v7773_v54  ;;  %v7783_v0 = vld [vmem:[#allocation79_spill] sm:$0xff]  ;;  %v7784_v54 = vld [vmem:[#allocation80_spill] sm:$0xff] }
 0x35a   :  { %2646 = vmatpush1.bf16.msra.mxu0 %v7774_v12  ;;  %2689 = vmatpush1.bf16.msra.mxu1 %v7775_v38  ;;  %v7785_v12 = vld [vmem:[#allocation81_spill] sm:$0xff] }
 0x35b   :  { %2647 = vmatprep.subr.bf16.mxu0 %v7776_v39  ;;  %2690 = vmatprep.subr.bf16.mxu1 %v7777_v40 }
 0x35e   :  { %2648 = vmatpush1.bf16.msra.mxu0 %v7778_v45  ;;  %2691 = vmatpush1.bf16.msra.mxu1 %v7779_v46 }
 0x35f   :  { %2649 = vmatprep.subr.bf16.mxu0 %v7780_v47  ;;  %2692 = vmatprep.subr.bf16.mxu1 %v7781_v48 }
 0x362   :  { %2650 = vmatpush1.bf16.msra.mxu0 %v7782_v53  ;;  %2693 = vmatpush1.bf16.msra.mxu1 %v7783_v0 }
 0x363   :  { %2705 = vmatprep.subr.bf16.mxu0 %v7784_v54  ;;  %2748 = vmatprep.subr.bf16.mxu1 %v7785_v12 }
 0x3b8   :  { %v2350_v38 = vpop.f32.mrb[8].mxu0  ;;  %v2393_v39 = vpop.f32.mrb[8].mxu1 }
 0x3b9   :  { %v2352_v37 = vpop.f32.mrb[9].mxu0  ;;  %v2395_v40 = vpop.f32.mrb[9].mxu1  ;;  %v4649_v47 = vadd.f32 %v2350_v38, %v7786_v30  ;;  %v4677_v48 = vadd.f32 %v2393_v39, %v7787_v29 }
 0x3ba   :  { %v2354_v32 = vpop.f32.mrb[10].mxu0  ;;  %v2397_v45 = vpop.f32.mrb[10].mxu1  ;;  %v4650_v53 = vadd.f32 %v2352_v37, %v7788_v25  ;;  %v4678_v0 = vadd.f32 %v2395_v40, %v7789_v21 }
 0x3bb   :  { %v2356_v31 = vpop.f32.mrb[11].mxu0  ;;  %v2399_v46 = vpop.f32.mrb[11].mxu1  ;;  %v4534_v20 = vmul.f32 -1.442695, %v4649_v47  ;;  %v4651_v54 = vadd.f32 %v2354_v32, %v7786_v30  ;;  %v4536_v12 = vmul.f32 -1.442695, %v4677_v48  ;;  %v4679_v16 = vadd.f32 %v2397_v45, %v7787_v29 }
 0x3bc   :  { %v4535_v19 = vmul.f32 -1.442695, %v4650_v53  ;;  %v4652_v14 = vadd.f32 %v2356_v31, %v7788_v25  ;;  %v4537_v4 = vmul.f32 -1.442695, %v4678_v0  ;;  %v4680_v8 = vadd.f32 %v2399_v46, %v7789_v21 }
 0x3bd   :  { %5017 = vpow2.f32 %v4534_v20  ;;  %v4540_v38 = vmul.f32 -1.442695, %v4651_v54  ;;  %v4542_v39 = vmul.f32 -1.442695, %v4679_v16 }
 0x3be   :  { %5019 = vpow2.f32 %v4536_v12  ;;  %v4541_v37 = vmul.f32 -1.442695, %v4652_v14  ;;  %v4543_v40 = vmul.f32 -1.442695, %v4680_v8 }
 0x3bf   :  { %5021 = vpow2.f32 %v4535_v19 }
 0x3c0   :  { %5023 = vpow2.f32 %v4537_v4 }
 0x3c1   :  { %5025 = vpow2.f32 %v4540_v38 }
 0x3c2   :  { %5027 = vpow2.f32 %v4542_v39 }
 0x3c3   :  { %5029 = vpow2.f32 %v4541_v37  ;;  %v7790_v37 = vld [vmem:[#allocation86_spill] sm:$0xff] }
 0x3c4   :  { %5031 = vpow2.f32 %v4543_v40 }
 0x3c7   :  { %v5018_v32 = vpop.eup %5017 }
 0x3c8   :  { %v5020_v45 = vpop.eup %5019  ;;  %v2540_v31 = vadd.f32 1.0, %v5018_v32  ;;  %v7791_v32 = vld [vmem:[#allocation87_spill] sm:$0xff] }
 0x3c9   :  { %v5022_v47 = vpop.eup %5021  ;;  %v2542_v0 = vadd.f32 1.0, %v5020_v45 }
 0x3ca   :  { %v5024_v48 = vpop.eup %5023  ;;  %v2541_v20 = vadd.f32 1.0, %v5022_v47  ;;  %5033 = vrcp.f32 %v2540_v31  ;;  %v7792_v31 = vld [vmem:[#allocation88_spill] sm:$0xff] }
 0x3cb   :  { %v5026_v53 = vpop.eup %5025  ;;  %v2543_v12 = vadd.f32 1.0, %v5024_v48  ;;  %5035 = vrcp.f32 %v2542_v0  ;;  %v7793_v0 = vld [vmem:[#allocation89_spill] sm:$0xff] }
 0x3cc   :  { %v5028_v46 = vpop.eup %5027  ;;  %v2546_v14 = vadd.f32 1.0, %v5026_v53  ;;  %5037 = vrcp.f32 %v2541_v20 }
 0x3cd   :  { %v5030_v54 = vpop.eup %5029  ;;  %v2548_v19 = vadd.f32 1.0, %v5028_v46  ;;  %5039 = vrcp.f32 %v2543_v12 }
 0x3ce   :  { %v5032_v16 = vpop.eup %5031  ;;  %v2547_v8 = vadd.f32 1.0, %v5030_v54  ;;  %5041 = vrcp.f32 %v2546_v14 }
 0x3cf   :  { %v2549_v4 = vadd.f32 1.0, %v5032_v16  ;;  %5043 = vrcp.f32 %v2548_v19 }
 0x3d0   :  { %5045 = vrcp.f32 %v2547_v8 }
 0x3d1   :  { %5047 = vrcp.f32 %v2549_v4 }
 0x3d4   :  { %v5034_v21 = vpop.eup %5033 }
 0x3f8   :  { %v2436_v38 = vpop.f32.mrb[40].mxu0  ;;  %v2479_v39 = vpop.f32.mrb[40].mxu1 }
 0x3f9   :  { %v4705_v40 = vadd.f32 %v2436_v38, %v7790_v37  ;;  %v4733_v45 = vadd.f32 %v2479_v39, %v7791_v32  ;;  %v2438_v47 = vpop.f32.mrb[41].mxu0  ;;  %v2481_v48 = vpop.f32.mrb[41].mxu1 }
 0x3fa   :  { %v4706_v53 = vadd.f32 %v2438_v47, %v7792_v31  ;;  %v4734_v46 = vadd.f32 %v2481_v48, %v7793_v0  ;;  %v2440_v20 = vpop.f32.mrb[42].mxu0  ;;  %v2483_v54 = vpop.f32.mrb[42].mxu1 }
 0x3fb   :  { %v4538_v12 = vmul.f32 -1.442695, %v4705_v40  ;;  %5049 = vtanh.f32 %v4733_v45  ;;  %v4707_v16 = vadd.f32 %v2440_v20, %v7790_v37  ;;  %v2442_v14 = vpop.f32.mrb[43].mxu0  ;;  %v2485_v19 = vpop.f32.mrb[43].mxu1  ;;  %v4735_v38 = vadd.f32 %v2483_v54, %v7791_v32 }
 0x3fc   :  { %v4539_v8 = vmul.f32 -1.442695, %v4706_v53  ;;  %5051 = vtanh.f32 %v4734_v46  ;;  %v4708_v39 = vadd.f32 %v2442_v14, %v7792_v31  ;;  %v5036_v47 = vpop.eup %5035  ;;  %v4736_v25 = vadd.f32 %v2485_v19, %v7793_v0 }
 0x3fd   :  { %5053 = vpow2.f32 %v4538_v12  ;;  %v4544_v4 = vmul.f32 -1.442695, %v4707_v16  ;;  %v5038_v40 = vpop.eup %5037  ;;  %v2580_v12 = vmul.f32 %v5036_v47, %v6232_v35 }
 0x3fe   :  { %5055 = vpow2.f32 %v4539_v8  ;;  %v4545_v48 = vmul.f32 -1.442695, %v4708_v39  ;;  %v5040_v45 = vpop.eup %5039 }
 0x3ff   :  { %5057 = vpow2.f32 %v4544_v4  ;;  %v5042_v20 = vpop.eup %5041  ;;  %v2581_v8 = vmul.f32 %v5040_v45, %v6234_v10 }
 0x400   :  { %5059 = vtanh.f32 %v4735_v38  ;;  %v5044_v53 = vpop.eup %5043 }
 0x401   :  { %5061 = vpow2.f32 %v4545_v48  ;;  %v5046_v46 = vpop.eup %5045  ;;  %v2582_v51 = vmul.f32 %v5044_v53, %v6240_v34 }
 0x402   :  { %5063 = vtanh.f32 %v4736_v25  ;;  %v5048_v54 = vpop.eup %5047 }
 0x405   :  { %v5050_v32 = vpop.eup %5049 }
 0x406   :  { %v5052_v14 = vpop.eup %5051  ;;  %v2584_v16 = vmul.f32 %v5050_v32, %v5034_v21  ;;  %v2583_v32 = vmul.f32 %v5048_v54, %v6243_v9 }
 0x407   :  { %v5054_v31 = vpop.eup %5053  ;;  %v2585_v39 = vmul.f32 %v5052_v14, %v5038_v40 }
 0x408   :  { %v5056_v19 = vpop.eup %5055  ;;  %v2544_v0 = vadd.f32 1.0, %v5054_v31  ;;  %v6398_v4 = vadd.f32 %v2584_v16, %v2580_v12  ;;  %v7794_v16 = vld [vmem:[#allocation106_spill] sm:$0xff] }
 0x409   :  { %v5058_v38 = vpop.eup %5057  ;;  %v2545_v37 = vadd.f32 1.0, %v5056_v19  ;;  %v6400_v48 = vadd.f32 %v2585_v39, %v2581_v8  ;;  %v7795_v8 = vld [vmem:[#allocation107_spill] sm:$0xff]  ;;  %v7796_v39 = vld [vmem:[#allocation108_spill] sm:$0xff]  ;;  %v7797_v19 = vld [vmem:[#allocation109_spill] sm:$0xff] }
 0x40a   :  { %v5060_v25 = vpop.eup %5059  ;;  %5065 = vrcp.f32 %v2544_v0  ;;  %v2550_v29 = vadd.f32 1.0, %v5058_v38  ;;  %v7798_v38 = vld [vmem:[#allocation110_spill] sm:$0xff] }
 0x40b   :  { %v5062_v30 = vpop.eup %5061  ;;  %5067 = vtanh.f32 %v6398_v4  ;;  %v2586_v21 = vmul.f32 %v5060_v25, %v5042_v20  ;;  %v7799_v25 = vld [vmem:[#allocation111_spill] sm:$0xff] }
 0x40c   :  { %v5064_v35 = vpop.eup %5063  ;;  %5069 = vrcp.f32 %v2545_v37  ;;  %v2551_v10 = vadd.f32 1.0, %v5062_v30 }
 0x40d   :  { %5071 = vtanh.f32 %v6400_v48  ;;  %v6406_v31 = vadd.f32 %v2586_v21, %v2582_v51  ;;  %v2587_v47 = vmul.f32 %v5064_v35, %v5046_v46  ;;  %v7800_v21 = vld [vmem:[#allocation112_spill] sm:$0xff]  ;;  %v7801_v35 = vld [vmem:[#allocation113_spill] sm:$0xff] }
 0x40e   :  { %5073 = vrcp.f32 %v2550_v29 }
 0x40f   :  { %5075 = vtanh.f32 %v6406_v31  ;;  %v6409_v0 = vadd.f32 %v2587_v47, %v2583_v32  ;;  %v7803_v32 = vld [vmem:[#allocation115_spill] sm:$0xff]  ;;  %v7804_v47 = vld [vmem:[#allocation116_spill] sm:$0xff] }
 0x410   :  { %5077 = vrcp.f32 %v2551_v10  ;;  %v7802_v10 = vld [vmem:[#allocation114_spill] sm:$0xff] }
 0x411   :  { %5079 = vtanh.f32 %v6409_v0 }
 0x414   :  { %v5066_v34 = vpop.eup %5065 }
 0x415   :  { %v5068_v40 = vpop.eup %5067 }
 0x416   :  { %v5070_v45 = vpop.eup %5069  ;;  %v2596_v53 = vmul.f32 %v5068_v40, %v5066_v34  ;;  %v7805_v34 = vld [vmem:[#allocation117_spill] sm:$0xff]  ;;  %v7806_v40 = vld [vmem:[#allocation118_spill] sm:$0xff] }
 0x417   :  { %v5072_v37 = vpop.eup %5071 }
 0x418   :  { %v5074_v30 = vpop.eup %5073  ;;  %v2597_v14 = vmul.f32 %v5072_v37, %v5070_v45  ;;  %v7807_v45 = vld [vmem:[#allocation119_spill] sm:$0xff]  ;;  %v7808_v37 = vld [vmem:[#allocation120_spill] sm:$0xff] }
 0x419   :  { %v5076_v20 = vpop.eup %5075 }
 0x41a   :  { %v5078_v9 = vpop.eup %5077  ;;  %v2598_v54 = vmul.f32 %v5076_v20, %v5074_v30  ;;  %v7809_v30 = vld [vmem:[#allocation121_spill] sm:$0xff]  ;;  %v7810_v20 = vld [vmem:[#allocation122_spill] sm:$0xff] }
 0x41b   :  { %v5080_v51 = vpop.eup %5079 }
 0x41c   :  { %v2599_v46 = vmul.f32 %v5080_v51, %v5078_v9  ;;  %v6412_v29 = vpack.c.bf16 %v2598_v54, %v2596_v53  ;;  %v7811_v9 = vld [vmem:[#allocation123_spill] sm:$0xff]  ;;  %v7812_v53 = vld [vmem:[#allocation124_spill] sm:$0xff]  ;;  %v7813_v54 = vld [vmem:[#allocation125_spill] sm:$0xff] }
 0x41d   :  { %v7814_v51 = vld [vmem:[#allocation126_spill] sm:$0xff] }
 0x41e   :  { %v2618_v12 = vpack.c.bf16 %v2599_v46, %v2597_v14  ;;  %v7815_v14 = vld [vmem:[#allocation127_spill] sm:$0xff] }
 0x41f   :  { %v7816_v46 = vld [vmem:[#allocation131_spill] sm:$0xff] }
 0x420   :  { %2651 = vmatprep.mubr.bf16.mxu0 %v2618_v12  ;;  %2694 = vmatprep.mubr.bf16.mxu1 %v2618_v12 }
 0x421   :  { %2652 = vmatmul.mubr.bf16.vlgmr.msra.gmra.mrb[12].mxu0 %v6412_v29  ;;  %2695 = vmatmul.mubr.bf16.vlgmr.msra.gmra.mrb[12].mxu1 %v6412_v29 }
 0x422   :  { %2706 = vmatpush1.bf16.msra.mxu0 %v5891_v27  ;;  %2749 = vmatpush1.bf16.msra.mxu1 %v5893_v42 }
 0x423   :  { %2737 = vmatprep.mubr.bf16.mxu0 %v2618_v12  ;;  %2780 = vmatprep.mubr.bf16.mxu1 %v2618_v12  ;;  %v7817_v12 = vld [vmem:[#allocation132_spill] sm:$0xff] }
 0x424   :  { %2707 = vmatprep.subr.bf16.mxu0 %v5954_v59  ;;  %2750 = vmatprep.subr.bf16.mxu1 %v7694_v18 }
 0x426   :  { %2708 = vmatpush1.bf16.msra.mxu0 %v7695_v63  ;;  %2751 = vmatpush1.bf16.msra.mxu1 %v7696_v22 }
 0x427   :  { %2709 = vmatprep.subr.bf16.mxu0 %v7697_v26  ;;  %2752 = vmatprep.subr.bf16.mxu1 %v7698_v33 }
 0x42a   :  { %2710 = vmatpush1.bf16.msra.mxu0 %v7699_v24  ;;  %2753 = vmatpush1.bf16.msra.mxu1 %v7700_v36 }
 0x42b   :  { %2711 = vmatprep.subr.bf16.mxu0 %v7701_v28  ;;  %2754 = vmatprep.subr.bf16.mxu1 %v7702_v58 }
 0x42e   :  { %2712 = vmatpush1.bf16.msra.mxu0 %v7703_v11  ;;  %2755 = vmatpush1.bf16.msra.mxu1 %v7704_v60 }
 0x42f   :  { %2713 = vmatprep.subr.bf16.mxu0 %v7705_v15  ;;  %2756 = vmatprep.subr.bf16.mxu1 %v7794_v16 }
 0x432   :  { %2714 = vmatpush1.bf16.msra.mxu0 %v7795_v8  ;;  %2757 = vmatpush1.bf16.msra.mxu1 %v7796_v39 }
 0x433   :  { %2715 = vmatprep.subr.bf16.mxu0 %v7797_v19  ;;  %2758 = vmatprep.subr.bf16.mxu1 %v7798_v38 }
 0x436   :  { %2716 = vmatpush1.bf16.msra.mxu0 %v7799_v25  ;;  %2759 = vmatpush1.bf16.msra.mxu1 %v7800_v21 }
 0x437   :  { %2717 = vmatprep.subr.bf16.mxu0 %v7801_v35  ;;  %2760 = vmatprep.subr.bf16.mxu1 %v7802_v10 }
 0x43a   :  { %2718 = vmatpush1.bf16.msra.mxu0 %v7803_v32  ;;  %2761 = vmatpush1.bf16.msra.mxu1 %v7804_v47 }
 0x43b   :  { %2719 = vmatprep.subr.bf16.mxu0 %v7805_v34  ;;  %2762 = vmatprep.subr.bf16.mxu1 %v7806_v40 }
 0x43e   :  { %2720 = vmatpush1.bf16.msra.mxu0 %v7807_v45  ;;  %2763 = vmatpush1.bf16.msra.mxu1 %v7808_v37 }
 0x43f   :  { %2721 = vmatprep.subr.bf16.mxu0 %v7809_v30  ;;  %2764 = vmatprep.subr.bf16.mxu1 %v7810_v20 }
 0x442   :  { %2722 = vmatpush1.bf16.msra.mxu0 %v7811_v9  ;;  %2765 = vmatpush1.bf16.msra.mxu1 %v7812_v53 }
 0x443   :  { %2723 = vmatprep.subr.bf16.mxu0 %v7813_v54  ;;  %2766 = vmatprep.subr.bf16.mxu1 %v7814_v51 }
 0x446   :  { %2724 = vmatpush1.bf16.msra.mxu0 %v7815_v14  ;;  %2767 = vmatpush1.bf16.msra.mxu1 %v7728_v50 }
 0x447   :  { %2725 = vmatprep.subr.bf16.mxu0 %v7729_v52  ;;  %2768 = vmatprep.subr.bf16.mxu1 %v7730_v61 }
 0x44a   :  { %2726 = vmatpush1.bf16.msra.mxu0 %v7816_v46  ;;  %2769 = vmatpush1.bf16.msra.mxu1 %v7817_v12 }
 0x44b   :  { %2727 = vmatprep.subr.bf16.mxu0 %v7733_v43  ;;  %2770 = vmatprep.subr.bf16.mxu1 %v7734_v2  ;;  %v7889_v2 = vld [vmem:[#allocation85_spill] sm:$0xff]  ;;  %v7890_v43 = vld [vmem:[#allocation83_spill] sm:$0xff] }
 0x44e   :  { %2728 = vmatpush1.bf16.msra.mxu0 %v7735_v55  ;;  %2771 = vmatpush1.bf16.msra.mxu1 %v7736_v1  ;;  %v7887_v1 = vld [vmem:[#allocation84_spill] sm:$0xff]  ;;  %v7888_v55 = vld [vmem:[#allocation82_spill] sm:$0xff] }
 0x44f   :  { %2729 = vmatprep.subr.bf16.mxu0 %v7737_v3  ;;  %2772 = vmatprep.subr.bf16.mxu1 %v7738_v62 }
 0x452   :  { %2730 = vmatpush1.bf16.msra.mxu0 %v6094_v56  ;;  %2773 = vmatpush1.bf16.msra.mxu1 %v6096_v5  ;;  %v7818_v56 = vld [vmem:[#allocation150_spill] sm:$0xff]  ;;  %v7819_v5 = vld [vmem:[#allocation151_spill] sm:$0xff] }
 0x453   :  { %2731 = vmatprep.subr.bf16.mxu0 %v6100_v13  ;;  %2774 = vmatprep.subr.bf16.mxu1 %v7739_v23  ;;  %v7820_v13 = vld [vmem:[#allocation152_spill] sm:$0xff] }
 0x454   :  { %v7821_v23 = vld [vmem:[#allocation16_spill] sm:$0xff] }
 0x456   :  { %2732 = vmatpush1.bf16.msra.mxu0 %v7740_v7  ;;  %2775 = vmatpush1.bf16.msra.mxu1 %v6108_v49  ;;  %v7822_v7 = vld [vmem:[#allocation18_spill] sm:$0xff] }
 0x457   :  { %2733 = vmatprep.subr.bf16.mxu0 %v6112_v44  ;;  %2776 = vmatprep.subr.bf16.mxu1 %v6114_v41  ;;  %v7823_v41 = vld [vmem:[#allocation17_spill] sm:$0xff]  ;;  %v7832_v44 = vld [vmem:[#allocation27_spill] sm:$0xff] }
 0x45a   :  { %2734 = vmatpush1.bf16.msra.mxu0 %v6118_v57  ;;  %2777 = vmatpush1.bf16.msra.mxu1 %v6120_v6  ;;  %v7824_v57 = vld [vmem:[#allocation19_spill] sm:$0xff]  ;;  %v7825_v6 = vld [vmem:[#allocation20_spill] sm:$0xff] }
 0x45b   :  { %2735 = vmatprep.subr.bf16.mxu0 %v6124_v17  ;;  %2778 = vmatprep.subr.bf16.mxu1 %v7818_v56  ;;  %v7826_v17 = vld [vmem:[#allocation21_spill] sm:$0xff]  ;;  %v7827_v56 = vld [vmem:[#allocation22_spill] sm:$0xff] }
 0x45e   :  { %2736 = vmatpush1.bf16.msra.mxu0 %v7819_v5  ;;  %2779 = vmatpush1.bf16.msra.mxu1 %v7820_v13  ;;  %v7828_v5 = vld [vmem:[#allocation23_spill] sm:$0xff]  ;;  %v7829_v13 = vld [vmem:[#allocation24_spill] sm:$0xff] }
 0x45f   :  { %2922 = vmatprep.subr.bf16.mxu0 %v7821_v23  ;;  %2965 = vmatprep.subr.bf16.mxu1 %v7822_v7  ;;  %v7830_v23 = vld [vmem:[#allocation25_spill] sm:$0xff]  ;;  %v7831_v7 = vld [vmem:[#allocation26_spill] sm:$0xff] }
 0x461   :  { %2738 = vmatmul.mubr.bf16.vlgmr.msra.gmra.mrb[44].mxu0 %v6412_v29  ;;  %2781 = vmatmul.mubr.bf16.vlgmr.msra.gmra.mrb[44].mxu1 %v6412_v29  ;;  %v7833_v29 = vld [vmem:[#allocation28_spill] sm:$0xff] }
 0x462   :  { %2923 = vmatpush1.bf16.msra.mxu0 %v7823_v41  ;;  %2966 = vmatpush1.bf16.msra.mxu1 %v7824_v57  ;;  %v7834_v41 = vld [vmem:[#allocation29_spill] sm:$0xff]  ;;  %v7835_v57 = vld [vmem:[#allocation30_spill] sm:$0xff] }
 0x463   :  { %2924 = vmatprep.subr.bf16.mxu0 %v7825_v6  ;;  %2967 = vmatprep.subr.bf16.mxu1 %v7826_v17  ;;  %v7836_v6 = vld [vmem:[#allocation31_spill] sm:$0xff]  ;;  %v7837_v17 = vld [vmem:[#allocation32_spill] sm:$0xff] }
 0x466   :  { %2925 = vmatpush1.bf16.msra.mxu0 %v7827_v56  ;;  %2968 = vmatpush1.bf16.msra.mxu1 %v7828_v5  ;;  %v7838_v56 = vld [vmem:[#allocation33_spill] sm:$0xff]  ;;  %v7839_v5 = vld [vmem:[#allocation34_spill] sm:$0xff] }
 0x467   :  { %2926 = vmatprep.subr.bf16.mxu0 %v7829_v13  ;;  %2969 = vmatprep.subr.bf16.mxu1 %v7830_v23  ;;  %v7840_v13 = vld [vmem:[#allocation35_spill] sm:$0xff]  ;;  %v7841_v23 = vld [vmem:[#allocation36_spill] sm:$0xff] }
 0x46a   :  { %2927 = vmatpush1.bf16.msra.mxu0 %v7831_v7  ;;  %2970 = vmatpush1.bf16.msra.mxu1 %v7832_v44  ;;  %v7842_v7 = vld [vmem:[#allocation37_spill] sm:$0xff]  ;;  %v7843_v44 = vld [vmem:[#allocation38_spill] sm:$0xff] }
 0x46b   :  { %2928 = vmatprep.subr.bf16.mxu0 %v7833_v29  ;;  %2971 = vmatprep.subr.bf16.mxu1 %v7834_v41  ;;  %v7844_v29 = vld [vmem:[#allocation39_spill] sm:$0xff]  ;;  %v7845_v41 = vld [vmem:[#allocation40_spill] sm:$0xff] }
 0x46e   :  { %2929 = vmatpush1.bf16.msra.mxu0 %v7835_v57  ;;  %2972 = vmatpush1.bf16.msra.mxu1 %v7836_v6  ;;  %v7846_v57 = vld [vmem:[#allocation41_spill] sm:$0xff]  ;;  %v7847_v6 = vld [vmem:[#allocation42_spill] sm:$0xff] }
 0x46f   :  { %2930 = vmatprep.subr.bf16.mxu0 %v7837_v17  ;;  %2973 = vmatprep.subr.bf16.mxu1 %v7838_v56  ;;  %v7848_v17 = vld [vmem:[#allocation43_spill] sm:$0xff]  ;;  %v7849_v56 = vld [vmem:[#allocation44_spill] sm:$0xff] }
 0x472   :  { %2931 = vmatpush1.bf16.msra.mxu0 %v7839_v5  ;;  %2974 = vmatpush1.bf16.msra.mxu1 %v7840_v13  ;;  %v7850_v5 = vld [vmem:[#allocation45_spill] sm:$0xff]  ;;  %v7851_v13 = vld [vmem:[#allocation46_spill] sm:$0xff] }
 0x473   :  { %2932 = vmatprep.subr.bf16.mxu0 %v7841_v23  ;;  %2975 = vmatprep.subr.bf16.mxu1 %v7842_v7  ;;  %v7852_v23 = vld [vmem:[#allocation47_spill] sm:$0xff]  ;;  %v7853_v7 = vld [vmem:[#allocation48_spill] sm:$0xff] }
 0x476   :  { %2933 = vmatpush1.bf16.msra.mxu0 %v7843_v44  ;;  %2976 = vmatpush1.bf16.msra.mxu1 %v7844_v29  ;;  %v7854_v44 = vld [vmem:[#allocation49_spill] sm:$0xff]  ;;  %v7855_v29 = vld [vmem:[#allocation50_spill] sm:$0xff] }
 0x477   :  { %2934 = vmatprep.subr.bf16.mxu0 %v7845_v41  ;;  %2977 = vmatprep.subr.bf16.mxu1 %v7846_v57  ;;  %v7856_v41 = vld [vmem:[#allocation51_spill] sm:$0xff]  ;;  %v7857_v57 = vld [vmem:[#allocation52_spill] sm:$0xff] }
 0x47a   :  { %2935 = vmatpush1.bf16.msra.mxu0 %v7847_v6  ;;  %2978 = vmatpush1.bf16.msra.mxu1 %v7848_v17  ;;  %v7858_v6 = vld [vmem:[#allocation53_spill] sm:$0xff]  ;;  %v7859_v17 = vld [vmem:[#allocation54_spill] sm:$0xff] }
 0x47b   :  { %2936 = vmatprep.subr.bf16.mxu0 %v7849_v56  ;;  %2979 = vmatprep.subr.bf16.mxu1 %v7850_v5  ;;  %v7860_v56 = vld [vmem:[#allocation55_spill] sm:$0xff]  ;;  %v7861_v5 = vld [vmem:[#allocation56_spill] sm:$0xff] }
 0x47e   :  { %2937 = vmatpush1.bf16.msra.mxu0 %v7851_v13  ;;  %2980 = vmatpush1.bf16.msra.mxu1 %v7852_v23  ;;  %v7862_v13 = vld [vmem:[#allocation57_spill] sm:$0xff]  ;;  %v7863_v23 = vld [vmem:[#allocation58_spill] sm:$0xff] }
 0x47f   :  { %2938 = vmatprep.subr.bf16.mxu0 %v7853_v7  ;;  %2981 = vmatprep.subr.bf16.mxu1 %v7854_v44  ;;  %v7864_v7 = vld [vmem:[#allocation59_spill] sm:$0xff]  ;;  %v7865_v44 = vld [vmem:[#allocation60_spill] sm:$0xff] }
 0x482   :  { %2939 = vmatpush1.bf16.msra.mxu0 %v7855_v29  ;;  %2982 = vmatpush1.bf16.msra.mxu1 %v7856_v41  ;;  %v7866_v29 = vld [vmem:[#allocation61_spill] sm:$0xff]  ;;  %v7867_v41 = vld [vmem:[#allocation62_spill] sm:$0xff] }
 0x483   :  { %2940 = vmatprep.subr.bf16.mxu0 %v7857_v57  ;;  %2983 = vmatprep.subr.bf16.mxu1 %v7858_v6  ;;  %v7868_v57 = vld [vmem:[#allocation63_spill] sm:$0xff]  ;;  %v7869_v6 = vld [vmem:[#allocation64_spill] sm:$0xff] }
 0x486   :  { %2941 = vmatpush1.bf16.msra.mxu0 %v7859_v17  ;;  %2984 = vmatpush1.bf16.msra.mxu1 %v7860_v56  ;;  %v7870_v17 = vld [vmem:[#allocation65_spill] sm:$0xff]  ;;  %v7871_v56 = vld [vmem:[#allocation66_spill] sm:$0xff] }
 0x487   :  { %2942 = vmatprep.subr.bf16.mxu0 %v7861_v5  ;;  %2985 = vmatprep.subr.bf16.mxu1 %v7862_v13  ;;  %v7872_v5 = vld [vmem:[#allocation67_spill] sm:$0xff]  ;;  %v7873_v13 = vld [vmem:[#allocation68_spill] sm:$0xff] }
 0x48a   :  { %2943 = vmatpush1.bf16.msra.mxu0 %v7863_v23  ;;  %2986 = vmatpush1.bf16.msra.mxu1 %v7864_v7  ;;  %v7874_v23 = vld [vmem:[#allocation69_spill] sm:$0xff]  ;;  %v7875_v7 = vld [vmem:[#allocation70_spill] sm:$0xff] }
 0x48b   :  { %2944 = vmatprep.subr.bf16.mxu0 %v7865_v44  ;;  %2987 = vmatprep.subr.bf16.mxu1 %v7866_v29  ;;  %v7876_v44 = vld [vmem:[#allocation71_spill] sm:$0xff]  ;;  %v7877_v29 = vld [vmem:[#allocation72_spill] sm:$0xff] }
 0x48e   :  { %2945 = vmatpush1.bf16.msra.mxu0 %v7867_v41  ;;  %2988 = vmatpush1.bf16.msra.mxu1 %v7868_v57  ;;  %v7878_v41 = vld [vmem:[#allocation73_spill] sm:$0xff]  ;;  %v7879_v57 = vld [vmem:[#allocation74_spill] sm:$0xff] }
 0x48f   :  { %2946 = vmatprep.subr.bf16.mxu0 %v7869_v6  ;;  %2989 = vmatprep.subr.bf16.mxu1 %v7870_v17  ;;  %v7880_v6 = vld [vmem:[#allocation75_spill] sm:$0xff]  ;;  %v7881_v17 = vld [vmem:[#allocation76_spill] sm:$0xff] }
 0x492   :  { %2947 = vmatpush1.bf16.msra.mxu0 %v7871_v56  ;;  %2990 = vmatpush1.bf16.msra.mxu1 %v7872_v5  ;;  %v7882_v56 = vld [vmem:[#allocation77_spill] sm:$0xff]  ;;  %v7883_v5 = vld [vmem:[#allocation78_spill] sm:$0xff] }
 0x493   :  { %2948 = vmatprep.subr.bf16.mxu0 %v7873_v13  ;;  %2991 = vmatprep.subr.bf16.mxu1 %v7874_v23  ;;  %v7884_v13 = vld [vmem:[#allocation79_spill] sm:$0xff]  ;;  %v7885_v23 = vld [vmem:[#allocation80_spill] sm:$0xff] }
 0x496   :  { %2949 = vmatpush1.bf16.msra.mxu0 %v7875_v7  ;;  %2992 = vmatpush1.bf16.msra.mxu1 %v7876_v44  ;;  %v7886_v7 = vld [vmem:[#allocation81_spill] sm:$0xff] }
 0x497   :  { %2950 = vmatprep.subr.bf16.mxu0 %v7877_v29  ;;  %2993 = vmatprep.subr.bf16.mxu1 %v7878_v41 }
 0x49a   :  { %2951 = vmatpush1.bf16.msra.mxu0 %v7879_v57  ;;  %2994 = vmatpush1.bf16.msra.mxu1 %v7880_v6 }
 0x49b   :  { %2952 = vmatprep.subr.bf16.mxu0 %v7881_v17  ;;  %2995 = vmatprep.subr.bf16.mxu1 %v7882_v56 }
 0x49e   :  { %2953 = vmatpush1.bf16.msra.mxu0 %v7883_v5  ;;  %2996 = vmatpush1.bf16.msra.mxu1 %v7884_v13 }
 0x49f   :  { %3008 = vmatprep.subr.bf16.mxu0 %v7885_v23  ;;  %3051 = vmatprep.subr.bf16.mxu1 %v7886_v7 }
 0x4f4   :  { %v2653_v44 = vpop.f32.mrb[12].mxu0  ;;  %v2696_v29 = vpop.f32.mrb[12].mxu1 }
 0x4f5   :  { %v2655_v49 = vpop.f32.mrb[13].mxu0  ;;  %v2698_v41 = vpop.f32.mrb[13].mxu1  ;;  %v4653_v17 = vadd.f32 %v2653_v44, %v7887_v1  ;;  %v4681_v56 = vadd.f32 %v2696_v29, %v7888_v55 }
 0x4f6   :  { %v2657_v62 = vpop.f32.mrb[14].mxu0  ;;  %v2700_v57 = vpop.f32.mrb[14].mxu1  ;;  %v4654_v5 = vadd.f32 %v2655_v49, %v7889_v2  ;;  %v4682_v13 = vadd.f32 %v2698_v41, %v7890_v43 }
 0x4f7   :  { %v2659_v3 = vpop.f32.mrb[15].mxu0  ;;  %v2702_v6 = vpop.f32.mrb[15].mxu1  ;;  %v4546_v12 = vmul.f32 -1.442695, %v4653_v17  ;;  %v4655_v23 = vadd.f32 %v2657_v62, %v7887_v1  ;;  %v4548_v7 = vmul.f32 -1.442695, %v4681_v56  ;;  %v4683_v46 = vadd.f32 %v2700_v57, %v7888_v55 }
 0x4f8   :  { %v4547_v61 = vmul.f32 -1.442695, %v4654_v5  ;;  %v4656_v52 = vadd.f32 %v2659_v3, %v7889_v2  ;;  %v4549_v50 = vmul.f32 -1.442695, %v4682_v13  ;;  %v4684_v14 = vadd.f32 %v2702_v6, %v7890_v43 }
 0x4f9   :  { %5081 = vpow2.f32 %v4546_v12  ;;  %v4552_v44 = vmul.f32 -1.442695, %v4655_v23  ;;  %v4554_v29 = vmul.f32 -1.442695, %v4683_v46 }
 0x4fa   :  { %5083 = vpow2.f32 %v4548_v7  ;;  %v4553_v49 = vmul.f32 -1.442695, %v4656_v52  ;;  %v4555_v41 = vmul.f32 -1.442695, %v4684_v14 }
 0x4fb   :  { %5085 = vpow2.f32 %v4547_v61 }
 0x4fc   :  { %5087 = vpow2.f32 %v4549_v50 }
 0x4fd   :  { %5089 = vpow2.f32 %v4552_v44 }
 0x4fe   :  { %5091 = vpow2.f32 %v4554_v29 }
 0x4ff   :  { %5093 = vpow2.f32 %v4553_v49  ;;  %v7891_v49 = vld [vmem:[#allocation86_spill] sm:$0xff] }
 0x500   :  { %5095 = vpow2.f32 %v4555_v41 }
 0x503   :  { %v5082_v56 = vpop.eup %5081 }
 0x504   :  { %v5084_v57 = vpop.eup %5083  ;;  %v2843_v3 = vadd.f32 1.0, %v5082_v56  ;;  %v7892_v56 = vld [vmem:[#allocation87_spill] sm:$0xff] }
 0x505   :  { %v5086_v5 = vpop.eup %5085  ;;  %v2845_v62 = vadd.f32 1.0, %v5084_v57 }
 0x506   :  { %v5088_v17 = vpop.eup %5087  ;;  %v2844_v12 = vadd.f32 1.0, %v5086_v5  ;;  %5097 = vrcp.f32 %v2843_v3  ;;  %v7893_v3 = vld [vmem:[#allocation88_spill] sm:$0xff] }
 0x507   :  { %v5090_v13 = vpop.eup %5089  ;;  %v2846_v7 = vadd.f32 1.0, %v5088_v17  ;;  %5099 = vrcp.f32 %v2845_v62  ;;  %v7894_v62 = vld [vmem:[#allocation89_spill] sm:$0xff] }
 0x508   :  { %v5092_v6 = vpop.eup %5091  ;;  %v2849_v52 = vadd.f32 1.0, %v5090_v13  ;;  %5101 = vrcp.f32 %v2844_v12 }
 0x509   :  { %v5094_v23 = vpop.eup %5093  ;;  %v2851_v50 = vadd.f32 1.0, %v5092_v6  ;;  %5103 = vrcp.f32 %v2846_v7 }
 0x50a   :  { %v5096_v46 = vpop.eup %5095  ;;  %v2850_v61 = vadd.f32 1.0, %v5094_v23  ;;  %5105 = vrcp.f32 %v2849_v52 }
 0x50b   :  { %v2852_v14 = vadd.f32 1.0, %v5096_v46  ;;  %5107 = vrcp.f32 %v2851_v50 }
 0x50c   :  { %5109 = vrcp.f32 %v2850_v61 }
 0x50d   :  { %5111 = vrcp.f32 %v2852_v14 }
 0x510   :  { %v5098_v43 = vpop.eup %5097 }
 0x534   :  { %v2739_v44 = vpop.f32.mrb[44].mxu0  ;;  %v2782_v29 = vpop.f32.mrb[44].mxu1 }
 0x535   :  { %v4709_v41 = vadd.f32 %v2739_v44, %v7891_v49  ;;  %v4737_v57 = vadd.f32 %v2782_v29, %v7892_v56  ;;  %v2741_v5 = vpop.f32.mrb[45].mxu0  ;;  %v2784_v17 = vpop.f32.mrb[45].mxu1 }
 0x536   :  { %v4710_v13 = vadd.f32 %v2741_v5, %v7893_v3  ;;  %v4738_v6 = vadd.f32 %v2784_v17, %v7894_v62  ;;  %v2743_v12 = vpop.f32.mrb[46].mxu0  ;;  %v2786_v23 = vpop.f32.mrb[46].mxu1 }
 0x537   :  { %v4550_v7 = vmul.f32 -1.442695, %v4709_v41  ;;  %5113 = vtanh.f32 %v4737_v57  ;;  %v4711_v46 = vadd.f32 %v2743_v12, %v7891_v49  ;;  %v2745_v52 = vpop.f32.mrb[47].mxu0  ;;  %v2788_v50 = vpop.f32.mrb[47].mxu1  ;;  %v4739_v44 = vadd.f32 %v2786_v23, %v7892_v56 }
 0x538   :  { %v4551_v61 = vmul.f32 -1.442695, %v4710_v13  ;;  %5115 = vtanh.f32 %v4738_v6  ;;  %v4712_v29 = vadd.f32 %v2745_v52, %v7893_v3  ;;  %v5100_v5 = vpop.eup %5099  ;;  %v4740_v2 = vadd.f32 %v2788_v50, %v7894_v62 }
 0x539   :  { %5117 = vpow2.f32 %v4550_v7  ;;  %v4556_v14 = vmul.f32 -1.442695, %v4711_v46  ;;  %v5102_v41 = vpop.eup %5101  ;;  %v2883_v7 = vmul.f32 %v5100_v5, %v6398_v4 }
 0x53a   :  { %5119 = vpow2.f32 %v4551_v61  ;;  %v4557_v17 = vmul.f32 -1.442695, %v4712_v29  ;;  %v5104_v57 = vpop.eup %5103 }
 0x53b   :  { %5121 = vpow2.f32 %v4556_v14  ;;  %v5106_v12 = vpop.eup %5105  ;;  %v2884_v61 = vmul.f32 %v5104_v57, %v6400_v48 }
 0x53c   :  { %5123 = vtanh.f32 %v4739_v44  ;;  %v5108_v13 = vpop.eup %5107 }
 0x53d   :  { %5125 = vpow2.f32 %v4557_v17  ;;  %v5110_v6 = vpop.eup %5109  ;;  %v2885_v51 = vmul.f32 %v5108_v13, %v6406_v31 }
 0x53e   :  { %5127 = vtanh.f32 %v4740_v2  ;;  %v5112_v23 = vpop.eup %5111 }
 0x541   :  { %v5114_v56 = vpop.eup %5113 }
 0x542   :  { %v5116_v52 = vpop.eup %5115  ;;  %v2887_v46 = vmul.f32 %v5114_v56, %v5098_v43  ;;  %v2886_v56 = vmul.f32 %v5112_v23, %v6409_v0 }
 0x543   :  { %v5118_v3 = vpop.eup %5117  ;;  %v2888_v29 = vmul.f32 %v5116_v52, %v5102_v41 }
 0x544   :  { %v5120_v50 = vpop.eup %5119  ;;  %v2847_v62 = vadd.f32 1.0, %v5118_v3  ;;  %v6564_v14 = vadd.f32 %v2887_v46, %v2883_v7  ;;  %v7895_v46 = vld [vmem:[#allocation126_spill] sm:$0xff] }
 0x545   :  { %v5122_v44 = vpop.eup %5121  ;;  %v2848_v49 = vadd.f32 1.0, %v5120_v50  ;;  %v6566_v17 = vadd.f32 %v2888_v29, %v2884_v61  ;;  %v7896_v61 = vld [vmem:[#allocation127_spill] sm:$0xff]  ;;  %v7897_v29 = vld [vmem:[#allocation128_spill] sm:$0xff]  ;;  %v7898_v50 = vld [vmem:[#allocation129_spill] sm:$0xff] }
 0x546   :  { %v5124_v2 = vpop.eup %5123  ;;  %5129 = vrcp.f32 %v2847_v62  ;;  %v2853_v55 = vadd.f32 1.0, %v5122_v44  ;;  %v7899_v44 = vld [vmem:[#allocation130_spill] sm:$0xff] }
 0x547   :  { %v5126_v1 = vpop.eup %5125  ;;  %5131 = vtanh.f32 %v6564_v14  ;;  %v2889_v43 = vmul.f32 %v5124_v2, %v5106_v12  ;;  %v7900_v2 = vld [vmem:[#allocation131_spill] sm:$0xff] }
 0x548   :  { %v5128_v4 = vpop.eup %5127  ;;  %5133 = vrcp.f32 %v2848_v49  ;;  %v2854_v48 = vadd.f32 1.0, %v5126_v1 }
 0x549   :  { %5135 = vtanh.f32 %v6566_v17  ;;  %v6572_v3 = vadd.f32 %v2889_v43, %v2885_v51  ;;  %v2890_v5 = vmul.f32 %v5128_v4, %v5110_v6  ;;  %v7901_v43 = vld [vmem:[#allocation132_spill] sm:$0xff]  ;;  %v7902_v4 = vld [vmem:[#allocation133_spill] sm:$0xff] }
 0x54a   :  { %5137 = vrcp.f32 %v2853_v55 }
 0x54b   :  { %5139 = vtanh.f32 %v6572_v3  ;;  %v6575_v62 = vadd.f32 %v2890_v5, %v2886_v56  ;;  %v7904_v56 = vld [vmem:[#allocation135_spill] sm:$0xff]  ;;  %v7905_v5 = vld [vmem:[#allocation136_spill] sm:$0xff] }
 0x54c   :  { %5141 = vrcp.f32 %v2854_v48  ;;  %v7903_v48 = vld [vmem:[#allocation134_spill] sm:$0xff] }
 0x54d   :  { %5143 = vtanh.f32 %v6575_v62 }
 0x550   :  { %v5130_v31 = vpop.eup %5129 }
 0x551   :  { %v5132_v41 = vpop.eup %5131 }
 0x552   :  { %v5134_v57 = vpop.eup %5133  ;;  %v2899_v13 = vmul.f32 %v5132_v41, %v5130_v31  ;;  %v7906_v31 = vld [vmem:[#allocation137_spill] sm:$0xff]  ;;  %v7907_v41 = vld [vmem:[#allocation138_spill] sm:$0xff] }
 0x553   :  { %v5136_v49 = vpop.eup %5135 }
 0x554   :  { %v5138_v1 = vpop.eup %5137  ;;  %v2900_v52 = vmul.f32 %v5136_v49, %v5134_v57  ;;  %v7908_v57 = vld [vmem:[#allocation139_spill] sm:$0xff]  ;;  %v7909_v49 = vld [vmem:[#allocation140_spill] sm:$0xff] }
 0x555   :  { %v5140_v12 = vpop.eup %5139 }
 0x556   :  { %v5142_v0 = vpop.eup %5141  ;;  %v2901_v23 = vmul.f32 %v5140_v12, %v5138_v1  ;;  %v7910_v1 = vld [vmem:[#allocation141_spill] sm:$0xff]  ;;  %v7911_v12 = vld [vmem:[#allocation142_spill] sm:$0xff] }
 0x557   :  { %v5144_v51 = vpop.eup %5143 }
 0x558   :  { %v2902_v6 = vmul.f32 %v5144_v51, %v5142_v0  ;;  %v6578_v55 = vpack.c.bf16 %v2901_v23, %v2899_v13  ;;  %v7912_v0 = vld [vmem:[#allocation143_spill] sm:$0xff]  ;;  %v7913_v13 = vld [vmem:[#allocation144_spill] sm:$0xff]  ;;  %v7914_v23 = vld [vmem:[#allocation145_spill] sm:$0xff] }
 0x559   :  { %v7915_v51 = vld [vmem:[#allocation146_spill] sm:$0xff] }
 0x55a   :  { %v2921_v7 = vpack.c.bf16 %v2902_v6, %v2900_v52  ;;  %v7916_v52 = vld [vmem:[#allocation147_spill] sm:$0xff]  ;;  %v7917_v6 = vld [vmem:[#allocation148_spill] sm:$0xff] }
 0x55c   :  { %2954 = vmatprep.mubr.bf16.mxu0 %v2921_v7  ;;  %2997 = vmatprep.mubr.bf16.mxu1 %v2921_v7 }
 0x55d   :  { %2955 = vmatmul.mubr.bf16.vlgmr.msra.gmra.mrb[16].mxu0 %v6578_v55  ;;  %2998 = vmatmul.mubr.bf16.vlgmr.msra.gmra.mrb[16].mxu1 %v6578_v55 }
 0x55e   :  { %3009 = vmatpush1.bf16.msra.mxu0 %v5891_v27  ;;  %3052 = vmatpush1.bf16.msra.mxu1 %v5893_v42 }
 0x55f   :  { %3040 = vmatprep.mubr.bf16.mxu0 %v2921_v7  ;;  %3083 = vmatprep.mubr.bf16.mxu1 %v2921_v7  ;;  %v7918_v7 = vld [vmem:[#allocation149_spill] sm:$0xff] }
 0x560   :  { %3010 = vmatprep.subr.bf16.mxu0 %v5954_v59  ;;  %3053 = vmatprep.subr.bf16.mxu1 %v7694_v18 }
 0x562   :  { %3011 = vmatpush1.bf16.msra.mxu0 %v7695_v63  ;;  %3054 = vmatpush1.bf16.msra.mxu1 %v7696_v22 }
 0x563   :  { %3012 = vmatprep.subr.bf16.mxu0 %v7697_v26  ;;  %3055 = vmatprep.subr.bf16.mxu1 %v7698_v33 }
 0x566   :  { %3013 = vmatpush1.bf16.msra.mxu0 %v7699_v24  ;;  %3056 = vmatpush1.bf16.msra.mxu1 %v7700_v36 }
 0x567   :  { %3014 = vmatprep.subr.bf16.mxu0 %v7701_v28  ;;  %3057 = vmatprep.subr.bf16.mxu1 %v7702_v58 }
 0x56a   :  { %3015 = vmatpush1.bf16.msra.mxu0 %v7703_v11  ;;  %3058 = vmatpush1.bf16.msra.mxu1 %v7704_v60 }
 0x56b   :  { %3016 = vmatprep.subr.bf16.mxu0 %v7705_v15  ;;  %3059 = vmatprep.subr.bf16.mxu1 %v7794_v16 }
 0x56e   :  { %3017 = vmatpush1.bf16.msra.mxu0 %v7795_v8  ;;  %3060 = vmatpush1.bf16.msra.mxu1 %v7796_v39 }
 0x56f   :  { %3018 = vmatprep.subr.bf16.mxu0 %v7797_v19  ;;  %3061 = vmatprep.subr.bf16.mxu1 %v7798_v38 }
 0x572   :  { %3019 = vmatpush1.bf16.msra.mxu0 %v7799_v25  ;;  %3062 = vmatpush1.bf16.msra.mxu1 %v7800_v21 }
 0x573   :  { %3020 = vmatprep.subr.bf16.mxu0 %v7801_v35  ;;  %3063 = vmatprep.subr.bf16.mxu1 %v7802_v10 }
 0x576   :  { %3021 = vmatpush1.bf16.msra.mxu0 %v7803_v32  ;;  %3064 = vmatpush1.bf16.msra.mxu1 %v7804_v47 }
 0x577   :  { %3022 = vmatprep.subr.bf16.mxu0 %v7805_v34  ;;  %3065 = vmatprep.subr.bf16.mxu1 %v7806_v40 }
 0x57a   :  { %3023 = vmatpush1.bf16.msra.mxu0 %v7807_v45  ;;  %3066 = vmatpush1.bf16.msra.mxu1 %v7808_v37 }
 0x57b   :  { %3024 = vmatprep.subr.bf16.mxu0 %v7809_v30  ;;  %3067 = vmatprep.subr.bf16.mxu1 %v7810_v20 }
 0x57e   :  { %3025 = vmatpush1.bf16.msra.mxu0 %v7811_v9  ;;  %3068 = vmatpush1.bf16.msra.mxu1 %v7812_v53 }
 0x57f   :  { %3026 = vmatprep.subr.bf16.mxu0 %v7813_v54  ;;  %3069 = vmatprep.subr.bf16.mxu1 %v7895_v46 }
 0x582   :  { %3027 = vmatpush1.bf16.msra.mxu0 %v7896_v61  ;;  %3070 = vmatpush1.bf16.msra.mxu1 %v7897_v29 }
 0x583   :  { %3028 = vmatprep.subr.bf16.mxu0 %v7898_v50  ;;  %3071 = vmatprep.subr.bf16.mxu1 %v7899_v44 }
 0x586   :  { %3029 = vmatpush1.bf16.msra.mxu0 %v7900_v2  ;;  %3072 = vmatpush1.bf16.msra.mxu1 %v7901_v43 }
 0x587   :  { %3030 = vmatprep.subr.bf16.mxu0 %v7902_v4  ;;  %3073 = vmatprep.subr.bf16.mxu1 %v7903_v48  ;;  %v7990_v48 = vld [vmem:[#allocation85_spill] sm:$0xff]  ;;  %v7991_v4 = vld [vmem:[#allocation83_spill] sm:$0xff] }
 0x58a   :  { %3031 = vmatpush1.bf16.msra.mxu0 %v7904_v56  ;;  %3074 = vmatpush1.bf16.msra.mxu1 %v7905_v5  ;;  %v7988_v5 = vld [vmem:[#allocation84_spill] sm:$0xff]  ;;  %v7989_v56 = vld [vmem:[#allocation82_spill] sm:$0xff] }
 0x58b   :  { %3032 = vmatprep.subr.bf16.mxu0 %v7906_v31  ;;  %3075 = vmatprep.subr.bf16.mxu1 %v7907_v41 }
 0x58e   :  { %3033 = vmatpush1.bf16.msra.mxu0 %v7908_v57  ;;  %3076 = vmatpush1.bf16.msra.mxu1 %v7909_v49  ;;  %v7919_v57 = vld [vmem:[#allocation150_spill] sm:$0xff]  ;;  %v7920_v49 = vld [vmem:[#allocation151_spill] sm:$0xff] }
 0x58f   :  { %3034 = vmatprep.subr.bf16.mxu0 %v7910_v1  ;;  %3077 = vmatprep.subr.bf16.mxu1 %v7911_v12  ;;  %v7921_v1 = vld [vmem:[#allocation152_spill] sm:$0xff] }
 0x590   :  { %v7922_v12 = vld [vmem:[#allocation16_spill] sm:$0xff] }
 0x592   :  { %3035 = vmatpush1.bf16.msra.mxu0 %v7912_v0  ;;  %3078 = vmatpush1.bf16.msra.mxu1 %v7913_v13  ;;  %v7923_v0 = vld [vmem:[#allocation18_spill] sm:$0xff] }
 0x593   :  { %3036 = vmatprep.subr.bf16.mxu0 %v7914_v23  ;;  %3079 = vmatprep.subr.bf16.mxu1 %v7915_v51  ;;  %v7924_v51 = vld [vmem:[#allocation17_spill] sm:$0xff]  ;;  %v7933_v23 = vld [vmem:[#allocation27_spill] sm:$0xff] }
 0x596   :  { %3037 = vmatpush1.bf16.msra.mxu0 %v7916_v52  ;;  %3080 = vmatpush1.bf16.msra.mxu1 %v7917_v6  ;;  %v7925_v52 = vld [vmem:[#allocation19_spill] sm:$0xff]  ;;  %v7926_v6 = vld [vmem:[#allocation20_spill] sm:$0xff] }
 0x597   :  { %3038 = vmatprep.subr.bf16.mxu0 %v7918_v7  ;;  %3081 = vmatprep.subr.bf16.mxu1 %v7919_v57  ;;  %v7927_v7 = vld [vmem:[#allocation21_spill] sm:$0xff]  ;;  %v7928_v57 = vld [vmem:[#allocation22_spill] sm:$0xff] }
 0x59a   :  { %3039 = vmatpush1.bf16.msra.mxu0 %v7920_v49  ;;  %3082 = vmatpush1.bf16.msra.mxu1 %v7921_v1  ;;  %v7929_v49 = vld [vmem:[#allocation23_spill] sm:$0xff]  ;;  %v7930_v1 = vld [vmem:[#allocation24_spill] sm:$0xff] }
 0x59b   :  { %3225 = vmatprep.subr.bf16.mxu0 %v7922_v12  ;;  %3268 = vmatprep.subr.bf16.mxu1 %v7923_v0  ;;  %v7931_v12 = vld [vmem:[#allocation25_spill] sm:$0xff]  ;;  %v7932_v0 = vld [vmem:[#allocation26_spill] sm:$0xff] }
 0x59d   :  { %3041 = vmatmul.mubr.bf16.vlgmr.msra.gmra.mrb[48].mxu0 %v6578_v55  ;;  %3084 = vmatmul.mubr.bf16.vlgmr.msra.gmra.mrb[48].mxu1 %v6578_v55  ;;  %v7934_v55 = vld [vmem:[#allocation28_spill] sm:$0xff] }
 0x59e   :  { %3226 = vmatpush1.bf16.msra.mxu0 %v7924_v51  ;;  %3269 = vmatpush1.bf16.msra.mxu1 %v7925_v52  ;;  %v7935_v51 = vld [vmem:[#allocation29_spill] sm:$0xff]  ;;  %v7936_v52 = vld [vmem:[#allocation30_spill] sm:$0xff] }
 0x59f   :  { %3227 = vmatprep.subr.bf16.mxu0 %v7926_v6  ;;  %3270 = vmatprep.subr.bf16.mxu1 %v7927_v7  ;;  %v7937_v6 = vld [vmem:[#allocation31_spill] sm:$0xff]  ;;  %v7938_v7 = vld [vmem:[#allocation32_spill] sm:$0xff] }
 0x5a2   :  { %3228 = vmatpush1.bf16.msra.mxu0 %v7928_v57  ;;  %3271 = vmatpush1.bf16.msra.mxu1 %v7929_v49  ;;  %v7939_v57 = vld [vmem:[#allocation33_spill] sm:$0xff]  ;;  %v7940_v49 = vld [vmem:[#allocation34_spill] sm:$0xff] }
 0x5a3   :  { %3229 = vmatprep.subr.bf16.mxu0 %v7930_v1  ;;  %3272 = vmatprep.subr.bf16.mxu1 %v7931_v12  ;;  %v7941_v1 = vld [vmem:[#allocation35_spill] sm:$0xff]  ;;  %v7942_v12 = vld [vmem:[#allocation36_spill] sm:$0xff] }
 0x5a6   :  { %3230 = vmatpush1.bf16.msra.mxu0 %v7932_v0  ;;  %3273 = vmatpush1.bf16.msra.mxu1 %v7933_v23  ;;  %v7943_v0 = vld [vmem:[#allocation37_spill] sm:$0xff]  ;;  %v7944_v23 = vld [vmem:[#allocation38_spill] sm:$0xff] }
 0x5a7   :  { %3231 = vmatprep.subr.bf16.mxu0 %v7934_v55  ;;  %3274 = vmatprep.subr.bf16.mxu1 %v7935_v51  ;;  %v7945_v55 = vld [vmem:[#allocation39_spill] sm:$0xff]  ;;  %v7946_v51 = vld [vmem:[#allocation40_spill] sm:$0xff] }
 0x5aa   :  { %3232 = vmatpush1.bf16.msra.mxu0 %v7936_v52  ;;  %3275 = vmatpush1.bf16.msra.mxu1 %v7937_v6  ;;  %v7947_v52 = vld [vmem:[#allocation41_spill] sm:$0xff]  ;;  %v7948_v6 = vld [vmem:[#allocation42_spill] sm:$0xff] }
 0x5ab   :  { %3233 = vmatprep.subr.bf16.mxu0 %v7938_v7  ;;  %3276 = vmatprep.subr.bf16.mxu1 %v7939_v57  ;;  %v7949_v7 = vld [vmem:[#allocation43_spill] sm:$0xff]  ;;  %v7950_v57 = vld [vmem:[#allocation44_spill] sm:$0xff] }
 0x5ae   :  { %3234 = vmatpush1.bf16.msra.mxu0 %v7940_v49  ;;  %3277 = vmatpush1.bf16.msra.mxu1 %v7941_v1  ;;  %v7951_v49 = vld [vmem:[#allocation45_spill] sm:$0xff]  ;;  %v7952_v1 = vld [vmem:[#allocation46_spill] sm:$0xff] }
 0x5af   :  { %3235 = vmatprep.subr.bf16.mxu0 %v7942_v12  ;;  %3278 = vmatprep.subr.bf16.mxu1 %v7943_v0  ;;  %v7953_v12 = vld [vmem:[#allocation47_spill] sm:$0xff]  ;;  %v7954_v0 = vld [vmem:[#allocation48_spill] sm:$0xff] }
 0x5b2   :  { %3236 = vmatpush1.bf16.msra.mxu0 %v7944_v23  ;;  %3279 = vmatpush1.bf16.msra.mxu1 %v7945_v55  ;;  %v7955_v23 = vld [vmem:[#allocation49_spill] sm:$0xff]  ;;  %v7956_v55 = vld [vmem:[#allocation50_spill] sm:$0xff] }
 0x5b3   :  { %3237 = vmatprep.subr.bf16.mxu0 %v7946_v51  ;;  %3280 = vmatprep.subr.bf16.mxu1 %v7947_v52  ;;  %v7957_v51 = vld [vmem:[#allocation51_spill] sm:$0xff]  ;;  %v7958_v52 = vld [vmem:[#allocation52_spill] sm:$0xff] }
 0x5b6   :  { %3238 = vmatpush1.bf16.msra.mxu0 %v7948_v6  ;;  %3281 = vmatpush1.bf16.msra.mxu1 %v7949_v7  ;;  %v7959_v6 = vld [vmem:[#allocation53_spill] sm:$0xff]  ;;  %v7960_v7 = vld [vmem:[#allocation54_spill] sm:$0xff] }
 0x5b7   :  { %3239 = vmatprep.subr.bf16.mxu0 %v7950_v57  ;;  %3282 = vmatprep.subr.bf16.mxu1 %v7951_v49  ;;  %v7961_v57 = vld [vmem:[#allocation55_spill] sm:$0xff]  ;;  %v7962_v49 = vld [vmem:[#allocation56_spill] sm:$0xff] }
 0x5ba   :  { %3240 = vmatpush1.bf16.msra.mxu0 %v7952_v1  ;;  %3283 = vmatpush1.bf16.msra.mxu1 %v7953_v12  ;;  %v7963_v1 = vld [vmem:[#allocation57_spill] sm:$0xff]  ;;  %v7964_v12 = vld [vmem:[#allocation58_spill] sm:$0xff] }
 0x5bb   :  { %3241 = vmatprep.subr.bf16.mxu0 %v7954_v0  ;;  %3284 = vmatprep.subr.bf16.mxu1 %v7955_v23  ;;  %v7965_v0 = vld [vmem:[#allocation59_spill] sm:$0xff]  ;;  %v7966_v23 = vld [vmem:[#allocation60_spill] sm:$0xff] }
 0x5be   :  { %3242 = vmatpush1.bf16.msra.mxu0 %v7956_v55  ;;  %3285 = vmatpush1.bf16.msra.mxu1 %v7957_v51  ;;  %v7967_v55 = vld [vmem:[#allocation61_spill] sm:$0xff]  ;;  %v7968_v51 = vld [vmem:[#allocation62_spill] sm:$0xff] }
 0x5bf   :  { %3243 = vmatprep.subr.bf16.mxu0 %v7958_v52  ;;  %3286 = vmatprep.subr.bf16.mxu1 %v7959_v6  ;;  %v7969_v52 = vld [vmem:[#allocation63_spill] sm:$0xff]  ;;  %v7970_v6 = vld [vmem:[#allocation64_spill] sm:$0xff] }
 0x5c2   :  { %3244 = vmatpush1.bf16.msra.mxu0 %v7960_v7  ;;  %3287 = vmatpush1.bf16.msra.mxu1 %v7961_v57  ;;  %v7971_v7 = vld [vmem:[#allocation65_spill] sm:$0xff]  ;;  %v7972_v57 = vld [vmem:[#allocation66_spill] sm:$0xff] }
 0x5c3   :  { %3245 = vmatprep.subr.bf16.mxu0 %v7962_v49  ;;  %3288 = vmatprep.subr.bf16.mxu1 %v7963_v1  ;;  %v7973_v49 = vld [vmem:[#allocation67_spill] sm:$0xff]  ;;  %v7974_v1 = vld [vmem:[#allocation68_spill] sm:$0xff] }
 0x5c6   :  { %3246 = vmatpush1.bf16.msra.mxu0 %v7964_v12  ;;  %3289 = vmatpush1.bf16.msra.mxu1 %v7965_v0  ;;  %v7975_v12 = vld [vmem:[#allocation69_spill] sm:$0xff]  ;;  %v7976_v0 = vld [vmem:[#allocation70_spill] sm:$0xff] }
 0x5c7   :  { %3247 = vmatprep.subr.bf16.mxu0 %v7966_v23  ;;  %3290 = vmatprep.subr.bf16.mxu1 %v7967_v55  ;;  %v7977_v23 = vld [vmem:[#allocation71_spill] sm:$0xff]  ;;  %v7978_v55 = vld [vmem:[#allocation72_spill] sm:$0xff] }
 0x5ca   :  { %3248 = vmatpush1.bf16.msra.mxu0 %v7968_v51  ;;  %3291 = vmatpush1.bf16.msra.mxu1 %v7969_v52  ;;  %v7979_v51 = vld [vmem:[#allocation73_spill] sm:$0xff]  ;;  %v7980_v52 = vld [vmem:[#allocation74_spill] sm:$0xff] }
 0x5cb   :  { %3249 = vmatprep.subr.bf16.mxu0 %v7970_v6  ;;  %3292 = vmatprep.subr.bf16.mxu1 %v7971_v7  ;;  %v7981_v6 = vld [vmem:[#allocation75_spill] sm:$0xff]  ;;  %v7982_v7 = vld [vmem:[#allocation76_spill] sm:$0xff] }
 0x5ce   :  { %3250 = vmatpush1.bf16.msra.mxu0 %v7972_v57  ;;  %3293 = vmatpush1.bf16.msra.mxu1 %v7973_v49  ;;  %v7983_v57 = vld [vmem:[#allocation77_spill] sm:$0xff]  ;;  %v7984_v49 = vld [vmem:[#allocation78_spill] sm:$0xff] }
 0x5cf   :  { %3251 = vmatprep.subr.bf16.mxu0 %v7974_v1  ;;  %3294 = vmatprep.subr.bf16.mxu1 %v7975_v12  ;;  %v7985_v1 = vld [vmem:[#allocation79_spill] sm:$0xff]  ;;  %v7986_v12 = vld [vmem:[#allocation80_spill] sm:$0xff] }
 0x5d2   :  { %3252 = vmatpush1.bf16.msra.mxu0 %v7976_v0  ;;  %3295 = vmatpush1.bf16.msra.mxu1 %v7977_v23  ;;  %v7987_v0 = vld [vmem:[#allocation81_spill] sm:$0xff] }
 0x5d3   :  { %3253 = vmatprep.subr.bf16.mxu0 %v7978_v55  ;;  %3296 = vmatprep.subr.bf16.mxu1 %v7979_v51 }
 0x5d6   :  { %3254 = vmatpush1.bf16.msra.mxu0 %v7980_v52  ;;  %3297 = vmatpush1.bf16.msra.mxu1 %v7981_v6 }
 0x5d7   :  { %3255 = vmatprep.subr.bf16.mxu0 %v7982_v7  ;;  %3298 = vmatprep.subr.bf16.mxu1 %v7983_v57 }
 0x5da   :  { %3256 = vmatpush1.bf16.msra.mxu0 %v7984_v49  ;;  %3299 = vmatpush1.bf16.msra.mxu1 %v7985_v1 }
 0x5db   :  { %3311 = vmatprep.subr.bf16.mxu0 %v7986_v12  ;;  %3354 = vmatprep.subr.bf16.mxu1 %v7987_v0 }
 0x630   :  { %v2956_v23 = vpop.f32.mrb[16].mxu0  ;;  %v2999_v55 = vpop.f32.mrb[16].mxu1 }
 0x631   :  { %v2958_v13 = vpop.f32.mrb[17].mxu0  ;;  %v3001_v51 = vpop.f32.mrb[17].mxu1  ;;  %v4657_v7 = vadd.f32 %v2956_v23, %v7988_v5  ;;  %v4685_v57 = vadd.f32 %v2999_v55, %v7989_v56 }
 0x632   :  { %v2960_v41 = vpop.f32.mrb[18].mxu0  ;;  %v3003_v52 = vpop.f32.mrb[18].mxu1  ;;  %v4658_v49 = vadd.f32 %v2958_v13, %v7990_v48  ;;  %v4686_v1 = vadd.f32 %v3001_v51, %v7991_v4 }
 0x633   :  { %v2962_v31 = vpop.f32.mrb[19].mxu0  ;;  %v3005_v6 = vpop.f32.mrb[19].mxu1  ;;  %v4558_v43 = vmul.f32 -1.442695, %v4657_v7  ;;  %v4659_v12 = vadd.f32 %v2960_v41, %v7988_v5  ;;  %v4560_v0 = vmul.f32 -1.442695, %v4685_v57  ;;  %v4687_v2 = vadd.f32 %v3003_v52, %v7989_v56 }
 0x634   :  { %v4559_v44 = vmul.f32 -1.442695, %v4658_v49  ;;  %v4660_v50 = vadd.f32 %v2962_v31, %v7990_v48  ;;  %v4561_v29 = vmul.f32 -1.442695, %v4686_v1  ;;  %v4688_v61 = vadd.f32 %v3005_v6, %v7991_v4 }
 0x635   :  { %5145 = vpow2.f32 %v4558_v43  ;;  %v4564_v23 = vmul.f32 -1.442695, %v4659_v12  ;;  %v4566_v55 = vmul.f32 -1.442695, %v4687_v2 }
 0x636   :  { %5147 = vpow2.f32 %v4560_v0  ;;  %v4565_v13 = vmul.f32 -1.442695, %v4660_v50  ;;  %v4567_v51 = vmul.f32 -1.442695, %v4688_v61 }
 0x637   :  { %5149 = vpow2.f32 %v4559_v44 }
 0x638   :  { %5151 = vpow2.f32 %v4561_v29 }
 0x639   :  { %5153 = vpow2.f32 %v4564_v23 }
 0x63a   :  { %5155 = vpow2.f32 %v4566_v55 }
 0x63b   :  { %5157 = vpow2.f32 %v4565_v13  ;;  %v7992_v13 = vld [vmem:[#allocation86_spill] sm:$0xff] }
 0x63c   :  { %5159 = vpow2.f32 %v4567_v51 }
 0x63f   :  { %v5146_v41 = vpop.eup %5145 }
 0x640   :  { %v5148_v57 = vpop.eup %5147  ;;  %v3146_v31 = vadd.f32 1.0, %v5146_v41  ;;  %v7993_v41 = vld [vmem:[#allocation87_spill] sm:$0xff] }
 0x641   :  { %v5150_v49 = vpop.eup %5149  ;;  %v3148_v7 = vadd.f32 1.0, %v5148_v57 }
 0x642   :  { %v5152_v52 = vpop.eup %5151  ;;  %v3147_v43 = vadd.f32 1.0, %v5150_v49  ;;  %5161 = vrcp.f32 %v3146_v31  ;;  %v7994_v31 = vld [vmem:[#allocation88_spill] sm:$0xff] }
 0x643   :  { %v5154_v1 = vpop.eup %5153  ;;  %v3149_v0 = vadd.f32 1.0, %v5152_v52  ;;  %5163 = vrcp.f32 %v3148_v7  ;;  %v7995_v7 = vld [vmem:[#allocation89_spill] sm:$0xff] }
 0x644   :  { %v5156_v6 = vpop.eup %5155  ;;  %v3152_v50 = vadd.f32 1.0, %v5154_v1  ;;  %5165 = vrcp.f32 %v3147_v43 }
 0x645   :  { %v5158_v12 = vpop.eup %5157  ;;  %v3154_v61 = vadd.f32 1.0, %v5156_v6  ;;  %5167 = vrcp.f32 %v3149_v0 }
 0x646   :  { %v5160_v2 = vpop.eup %5159  ;;  %v3153_v29 = vadd.f32 1.0, %v5158_v12  ;;  %5169 = vrcp.f32 %v3152_v50 }
 0x647   :  { %v3155_v44 = vadd.f32 1.0, %v5160_v2  ;;  %5171 = vrcp.f32 %v3154_v61 }
 0x648   :  { %5173 = vrcp.f32 %v3153_v29 }
 0x649   :  { %5175 = vrcp.f32 %v3155_v44 }
 0x64c   :  { %v5162_v4 = vpop.eup %5161 }
 0x670   :  { %v3042_v23 = vpop.f32.mrb[48].mxu0  ;;  %v3085_v55 = vpop.f32.mrb[48].mxu1 }
 0x671   :  { %v4713_v51 = vadd.f32 %v3042_v23, %v7992_v13  ;;  %v4741_v57 = vadd.f32 %v3085_v55, %v7993_v41  ;;  %v3044_v49 = vpop.f32.mrb[49].mxu0  ;;  %v3087_v52 = vpop.f32.mrb[49].mxu1 }
 0x672   :  { %v4714_v1 = vadd.f32 %v3044_v49, %v7994_v31  ;;  %v4742_v6 = vadd.f32 %v3087_v52, %v7995_v7  ;;  %v3046_v43 = vpop.f32.mrb[50].mxu0  ;;  %v3089_v12 = vpop.f32.mrb[50].mxu1 }
 0x673   :  { %v4562_v0 = vmul.f32 -1.442695, %v4713_v51  ;;  %5177 = vtanh.f32 %v4741_v57  ;;  %v4715_v2 = vadd.f32 %v3046_v43, %v7992_v13  ;;  %v3048_v50 = vpop.f32.mrb[51].mxu0  ;;  %v3091_v61 = vpop.f32.mrb[51].mxu1  ;;  %v4743_v23 = vadd.f32 %v3089_v12, %v7993_v41 }
 0x674   :  { %v4563_v29 = vmul.f32 -1.442695, %v4714_v1  ;;  %5179 = vtanh.f32 %v4742_v6  ;;  %v4716_v55 = vadd.f32 %v3048_v50, %v7994_v31  ;;  %v5164_v49 = vpop.eup %5163  ;;  %v4744_v48 = vadd.f32 %v3091_v61, %v7995_v7 }
 0x675   :  { %5181 = vpow2.f32 %v4562_v0  ;;  %v4568_v44 = vmul.f32 -1.442695, %v4715_v2  ;;  %v5166_v51 = vpop.eup %5165  ;;  %v3186_v0 = vmul.f32 %v5164_v49, %v6564_v14 }
 0x676   :  { %5183 = vpow2.f32 %v4563_v29  ;;  %v4569_v52 = vmul.f32 -1.442695, %v4716_v55  ;;  %v5168_v57 = vpop.eup %5167 }
 0x677   :  { %5185 = vpow2.f32 %v4568_v44  ;;  %v5170_v43 = vpop.eup %5169  ;;  %v3187_v29 = vmul.f32 %v5168_v57, %v6566_v17 }
 0x678   :  { %5187 = vtanh.f32 %v4743_v23  ;;  %v5172_v1 = vpop.eup %5171 }
 0x679   :  { %5189 = vpow2.f32 %v4569_v52  ;;  %v5174_v6 = vpop.eup %5173  ;;  %v3188_v46 = vmul.f32 %v5172_v1, %v6572_v3 }
 0x67a   :  { %5191 = vtanh.f32 %v4744_v48  ;;  %v5176_v12 = vpop.eup %5175 }
 0x67d   :  { %v5178_v41 = vpop.eup %5177 }
 0x67e   :  { %v5180_v50 = vpop.eup %5179  ;;  %v3190_v2 = vmul.f32 %v5178_v41, %v5162_v4  ;;  %v3189_v41 = vmul.f32 %v5176_v12, %v6575_v62 }
 0x67f   :  { %v5182_v31 = vpop.eup %5181  ;;  %v3191_v55 = vmul.f32 %v5180_v50, %v5166_v51 }
 0x680   :  { %v5184_v61 = vpop.eup %5183  ;;  %v3150_v7 = vadd.f32 1.0, %v5182_v31  ;;  %v6730_v44 = vadd.f32 %v3190_v2, %v3186_v0  ;;  %v7996_v2 = vld [vmem:[#allocation126_spill] sm:$0xff] }
 0x681   :  { %v5186_v23 = vpop.eup %5185  ;;  %v3151_v13 = vadd.f32 1.0, %v5184_v61  ;;  %v6732_v52 = vadd.f32 %v3191_v55, %v3187_v29  ;;  %v7997_v29 = vld [vmem:[#allocation127_spill] sm:$0xff]  ;;  %v7998_v55 = vld [vmem:[#allocation128_spill] sm:$0xff]  ;;  %v7999_v61 = vld [vmem:[#allocation129_spill] sm:$0xff] }
 0x682   :  { %v5188_v48 = vpop.eup %5187  ;;  %5193 = vrcp.f32 %v3150_v7  ;;  %v3156_v56 = vadd.f32 1.0, %v5186_v23  ;;  %v8000_v23 = vld [vmem:[#allocation130_spill] sm:$0xff] }
 0x683   :  { %v5190_v5 = vpop.eup %5189  ;;  %5195 = vtanh.f32 %v6730_v44  ;;  %v3192_v14 = vmul.f32 %v5188_v48, %v5170_v43  ;;  %v8001_v48 = vld [vmem:[#allocation131_spill] sm:$0xff] }
 0x684   :  { %v5192_v4 = vpop.eup %5191  ;;  %5197 = vrcp.f32 %v3151_v13  ;;  %v3157_v17 = vadd.f32 1.0, %v5190_v5 }
 0x685   :  { %5199 = vtanh.f32 %v6732_v52  ;;  %v6738_v31 = vadd.f32 %v3192_v14, %v3188_v46  ;;  %v3193_v49 = vmul.f32 %v5192_v4, %v5174_v6  ;;  %v8002_v14 = vld [vmem:[#allocation132_spill] sm:$0xff]  ;;  %v8003_v4 = vld [vmem:[#allocation133_spill] sm:$0xff] }
 0x686   :  { %5201 = vrcp.f32 %v3156_v56 }
 0x687   :  { %5203 = vtanh.f32 %v6738_v31  ;;  %v6741_v7 = vadd.f32 %v3193_v49, %v3189_v41  ;;  %v8005_v41 = vld [vmem:[#allocation135_spill] sm:$0xff]  ;;  %v8006_v49 = vld [vmem:[#allocation136_spill] sm:$0xff] }
 0x688   :  { %5205 = vrcp.f32 %v3157_v17  ;;  %v8004_v17 = vld [vmem:[#allocation134_spill] sm:$0xff] }
 0x689   :  { %5207 = vtanh.f32 %v6741_v7 }
 0x68c   :  { %v5194_v3 = vpop.eup %5193 }
 0x68d   :  { %v5196_v51 = vpop.eup %5195 }
 0x68e   :  { %v5198_v57 = vpop.eup %5197  ;;  %v3202_v1 = vmul.f32 %v5196_v51, %v5194_v3  ;;  %v8007_v3 = vld [vmem:[#allocation137_spill] sm:$0xff]  ;;  %v8008_v51 = vld [vmem:[#allocation138_spill] sm:$0xff] }
 0x68f   :  { %v5200_v13 = vpop.eup %5199 }
 0x690   :  { %v5202_v5 = vpop.eup %5201  ;;  %v3203_v50 = vmul.f32 %v5200_v13, %v5198_v57  ;;  %v8009_v57 = vld [vmem:[#allocation139_spill] sm:$0xff]  ;;  %v8010_v13 = vld [vmem:[#allocation140_spill] sm:$0xff] }
 0x691   :  { %v5204_v43 = vpop.eup %5203 }
 0x692   :  { %v5206_v62 = vpop.eup %5205  ;;  %v3204_v12 = vmul.f32 %v5204_v43, %v5202_v5  ;;  %v8011_v5 = vld [vmem:[#allocation141_spill] sm:$0xff]  ;;  %v8012_v43 = vld [vmem:[#allocation142_spill] sm:$0xff] }
 0x693   :  { %v5208_v46 = vpop.eup %5207 }
 0x694   :  { %v3205_v6 = vmul.f32 %v5208_v46, %v5206_v62  ;;  %v6744_v56 = vpack.c.bf16 %v3204_v12, %v3202_v1  ;;  %v8013_v62 = vld [vmem:[#allocation143_spill] sm:$0xff]  ;;  %v8014_v1 = vld [vmem:[#allocation144_spill] sm:$0xff]  ;;  %v8015_v12 = vld [vmem:[#allocation145_spill] sm:$0xff] }
 0x695   :  { %v8016_v46 = vld [vmem:[#allocation146_spill] sm:$0xff] }
 0x696   :  { %v3224_v0 = vpack.c.bf16 %v3205_v6, %v3203_v50  ;;  %v8017_v50 = vld [vmem:[#allocation147_spill] sm:$0xff]  ;;  %v8018_v6 = vld [vmem:[#allocation148_spill] sm:$0xff] }
 0x698   :  { %3257 = vmatprep.mubr.bf16.mxu0 %v3224_v0  ;;  %3300 = vmatprep.mubr.bf16.mxu1 %v3224_v0 }
 0x699   :  { %3258 = vmatmul.mubr.bf16.vlgmr.msra.gmra.mrb[20].mxu0 %v6744_v56  ;;  %3301 = vmatmul.mubr.bf16.vlgmr.msra.gmra.mrb[20].mxu1 %v6744_v56 }
 0x69a   :  { %3312 = vmatpush1.bf16.msra.mxu0 %v5891_v27  ;;  %3355 = vmatpush1.bf16.msra.mxu1 %v5893_v42 }
 0x69b   :  { %3343 = vmatprep.mubr.bf16.mxu0 %v3224_v0  ;;  %3386 = vmatprep.mubr.bf16.mxu1 %v3224_v0  ;;  %v8019_v0 = vld [vmem:[#allocation149_spill] sm:$0xff] }
 0x69c   :  { %3313 = vmatprep.subr.bf16.mxu0 %v5954_v59  ;;  %3356 = vmatprep.subr.bf16.mxu1 %v7694_v18 }
 0x69e   :  { %3314 = vmatpush1.bf16.msra.mxu0 %v7695_v63  ;;  %3357 = vmatpush1.bf16.msra.mxu1 %v7696_v22 }
 0x69f   :  { %3315 = vmatprep.subr.bf16.mxu0 %v7697_v26  ;;  %3358 = vmatprep.subr.bf16.mxu1 %v7698_v33 }
 0x6a2   :  { %3316 = vmatpush1.bf16.msra.mxu0 %v7699_v24  ;;  %3359 = vmatpush1.bf16.msra.mxu1 %v7700_v36 }
 0x6a3   :  { %3317 = vmatprep.subr.bf16.mxu0 %v7701_v28  ;;  %3360 = vmatprep.subr.bf16.mxu1 %v7702_v58 }
 0x6a6   :  { %3318 = vmatpush1.bf16.msra.mxu0 %v7703_v11  ;;  %3361 = vmatpush1.bf16.msra.mxu1 %v7704_v60 }
 0x6a7   :  { %3319 = vmatprep.subr.bf16.mxu0 %v7705_v15  ;;  %3362 = vmatprep.subr.bf16.mxu1 %v7794_v16 }
 0x6aa   :  { %3320 = vmatpush1.bf16.msra.mxu0 %v7795_v8  ;;  %3363 = vmatpush1.bf16.msra.mxu1 %v7796_v39 }
 0x6ab   :  { %3321 = vmatprep.subr.bf16.mxu0 %v7797_v19  ;;  %3364 = vmatprep.subr.bf16.mxu1 %v7798_v38 }
 0x6ae   :  { %3322 = vmatpush1.bf16.msra.mxu0 %v7799_v25  ;;  %3365 = vmatpush1.bf16.msra.mxu1 %v7800_v21 }
 0x6af   :  { %3323 = vmatprep.subr.bf16.mxu0 %v7801_v35  ;;  %3366 = vmatprep.subr.bf16.mxu1 %v7802_v10 }
 0x6b2   :  { %3324 = vmatpush1.bf16.msra.mxu0 %v7803_v32  ;;  %3367 = vmatpush1.bf16.msra.mxu1 %v7804_v47 }
 0x6b3   :  { %3325 = vmatprep.subr.bf16.mxu0 %v7805_v34  ;;  %3368 = vmatprep.subr.bf16.mxu1 %v7806_v40 }
 0x6b6   :  { %3326 = vmatpush1.bf16.msra.mxu0 %v7807_v45  ;;  %3369 = vmatpush1.bf16.msra.mxu1 %v7808_v37 }
 0x6b7   :  { %3327 = vmatprep.subr.bf16.mxu0 %v7809_v30  ;;  %3370 = vmatprep.subr.bf16.mxu1 %v7810_v20 }
 0x6ba   :  { %3328 = vmatpush1.bf16.msra.mxu0 %v7811_v9  ;;  %3371 = vmatpush1.bf16.msra.mxu1 %v7812_v53 }
 0x6bb   :  { %3329 = vmatprep.subr.bf16.mxu0 %v7813_v54  ;;  %3372 = vmatprep.subr.bf16.mxu1 %v7996_v2 }
 0x6be   :  { %3330 = vmatpush1.bf16.msra.mxu0 %v7997_v29  ;;  %3373 = vmatpush1.bf16.msra.mxu1 %v7998_v55 }
 0x6bf   :  { %3331 = vmatprep.subr.bf16.mxu0 %v7999_v61  ;;  %3374 = vmatprep.subr.bf16.mxu1 %v8000_v23 }
 0x6c2   :  { %3332 = vmatpush1.bf16.msra.mxu0 %v8001_v48  ;;  %3375 = vmatpush1.bf16.msra.mxu1 %v8002_v14 }
 0x6c3   :  { %3333 = vmatprep.subr.bf16.mxu0 %v8003_v4  ;;  %3376 = vmatprep.subr.bf16.mxu1 %v8004_v17  ;;  %v8091_v17 = vld [vmem:[#allocation85_spill] sm:$0xff]  ;;  %v8092_v4 = vld [vmem:[#allocation83_spill] sm:$0xff] }
 0x6c6   :  { %3334 = vmatpush1.bf16.msra.mxu0 %v8005_v41  ;;  %3377 = vmatpush1.bf16.msra.mxu1 %v8006_v49  ;;  %v8089_v49 = vld [vmem:[#allocation84_spill] sm:$0xff]  ;;  %v8090_v41 = vld [vmem:[#allocation82_spill] sm:$0xff] }
 0x6c7   :  { %3335 = vmatprep.subr.bf16.mxu0 %v8007_v3  ;;  %3378 = vmatprep.subr.bf16.mxu1 %v8008_v51 }
 0x6ca   :  { %3336 = vmatpush1.bf16.msra.mxu0 %v8009_v57  ;;  %3379 = vmatpush1.bf16.msra.mxu1 %v8010_v13  ;;  %v8020_v57 = vld [vmem:[#allocation150_spill] sm:$0xff]  ;;  %v8021_v13 = vld [vmem:[#allocation151_spill] sm:$0xff] }
 0x6cb   :  { %3337 = vmatprep.subr.bf16.mxu0 %v8011_v5  ;;  %3380 = vmatprep.subr.bf16.mxu1 %v8012_v43  ;;  %v8022_v5 = vld [vmem:[#allocation152_spill] sm:$0xff] }
 0x6cc   :  { %v8023_v43 = vld [vmem:[#allocation16_spill] sm:$0xff] }
 0x6ce   :  { %3338 = vmatpush1.bf16.msra.mxu0 %v8013_v62  ;;  %3381 = vmatpush1.bf16.msra.mxu1 %v8014_v1  ;;  %v8024_v62 = vld [vmem:[#allocation18_spill] sm:$0xff] }
 0x6cf   :  { %3339 = vmatprep.subr.bf16.mxu0 %v8015_v12  ;;  %3382 = vmatprep.subr.bf16.mxu1 %v8016_v46  ;;  %v8025_v46 = vld [vmem:[#allocation17_spill] sm:$0xff]  ;;  %v8034_v12 = vld [vmem:[#allocation27_spill] sm:$0xff] }
 0x6d2   :  { %3340 = vmatpush1.bf16.msra.mxu0 %v8017_v50  ;;  %3383 = vmatpush1.bf16.msra.mxu1 %v8018_v6  ;;  %v8026_v50 = vld [vmem:[#allocation19_spill] sm:$0xff]  ;;  %v8027_v6 = vld [vmem:[#allocation20_spill] sm:$0xff] }
 0x6d3   :  { %3341 = vmatprep.subr.bf16.mxu0 %v8019_v0  ;;  %3384 = vmatprep.subr.bf16.mxu1 %v8020_v57  ;;  %v8028_v0 = vld [vmem:[#allocation21_spill] sm:$0xff]  ;;  %v8029_v57 = vld [vmem:[#allocation22_spill] sm:$0xff] }
 0x6d6   :  { %3342 = vmatpush1.bf16.msra.mxu0 %v8021_v13  ;;  %3385 = vmatpush1.bf16.msra.mxu1 %v8022_v5  ;;  %v8030_v13 = vld [vmem:[#allocation23_spill] sm:$0xff]  ;;  %v8031_v5 = vld [vmem:[#allocation24_spill] sm:$0xff] }
 0x6d7   :  { %3528 = vmatprep.subr.bf16.mxu0 %v8023_v43  ;;  %3571 = vmatprep.subr.bf16.mxu1 %v8024_v62  ;;  %v8032_v43 = vld [vmem:[#allocation25_spill] sm:$0xff]  ;;  %v8033_v62 = vld [vmem:[#allocation26_spill] sm:$0xff] }
 0x6d9   :  { %3344 = vmatmul.mubr.bf16.vlgmr.msra.gmra.mrb[52].mxu0 %v6744_v56  ;;  %3387 = vmatmul.mubr.bf16.vlgmr.msra.gmra.mrb[52].mxu1 %v6744_v56  ;;  %v8035_v56 = vld [vmem:[#allocation28_spill] sm:$0xff] }
 0x6da   :  { %3529 = vmatpush1.bf16.msra.mxu0 %v8025_v46  ;;  %3572 = vmatpush1.bf16.msra.mxu1 %v8026_v50  ;;  %v8036_v46 = vld [vmem:[#allocation29_spill] sm:$0xff]  ;;  %v8037_v50 = vld [vmem:[#allocation30_spill] sm:$0xff] }
 0x6db   :  { %3530 = vmatprep.subr.bf16.mxu0 %v8027_v6  ;;  %3573 = vmatprep.subr.bf16.mxu1 %v8028_v0  ;;  %v8038_v6 = vld [vmem:[#allocation31_spill] sm:$0xff]  ;;  %v8039_v0 = vld [vmem:[#allocation32_spill] sm:$0xff] }
 0x6de   :  { %3531 = vmatpush1.bf16.msra.mxu0 %v8029_v57  ;;  %3574 = vmatpush1.bf16.msra.mxu1 %v8030_v13  ;;  %v8040_v57 = vld [vmem:[#allocation33_spill] sm:$0xff]  ;;  %v8041_v13 = vld [vmem:[#allocation34_spill] sm:$0xff] }
 0x6df   :  { %3532 = vmatprep.subr.bf16.mxu0 %v8031_v5  ;;  %3575 = vmatprep.subr.bf16.mxu1 %v8032_v43  ;;  %v8042_v5 = vld [vmem:[#allocation35_spill] sm:$0xff]  ;;  %v8043_v43 = vld [vmem:[#allocation36_spill] sm:$0xff] }
 0x6e2   :  { %3533 = vmatpush1.bf16.msra.mxu0 %v8033_v62  ;;  %3576 = vmatpush1.bf16.msra.mxu1 %v8034_v12  ;;  %v8044_v62 = vld [vmem:[#allocation37_spill] sm:$0xff]  ;;  %v8045_v12 = vld [vmem:[#allocation38_spill] sm:$0xff] }
 0x6e3   :  { %3534 = vmatprep.subr.bf16.mxu0 %v8035_v56  ;;  %3577 = vmatprep.subr.bf16.mxu1 %v8036_v46  ;;  %v8046_v56 = vld [vmem:[#allocation39_spill] sm:$0xff]  ;;  %v8047_v46 = vld [vmem:[#allocation40_spill] sm:$0xff] }
 0x6e6   :  { %3535 = vmatpush1.bf16.msra.mxu0 %v8037_v50  ;;  %3578 = vmatpush1.bf16.msra.mxu1 %v8038_v6  ;;  %v8048_v50 = vld [vmem:[#allocation41_spill] sm:$0xff]  ;;  %v8049_v6 = vld [vmem:[#allocation42_spill] sm:$0xff] }
 0x6e7   :  { %3536 = vmatprep.subr.bf16.mxu0 %v8039_v0  ;;  %3579 = vmatprep.subr.bf16.mxu1 %v8040_v57  ;;  %v8050_v0 = vld [vmem:[#allocation43_spill] sm:$0xff]  ;;  %v8051_v57 = vld [vmem:[#allocation44_spill] sm:$0xff] }
 0x6ea   :  { %3537 = vmatpush1.bf16.msra.mxu0 %v8041_v13  ;;  %3580 = vmatpush1.bf16.msra.mxu1 %v8042_v5  ;;  %v8052_v13 = vld [vmem:[#allocation45_spill] sm:$0xff]  ;;  %v8053_v5 = vld [vmem:[#allocation46_spill] sm:$0xff] }
 0x6eb   :  { %3538 = vmatprep.subr.bf16.mxu0 %v8043_v43  ;;  %3581 = vmatprep.subr.bf16.mxu1 %v8044_v62  ;;  %v8054_v43 = vld [vmem:[#allocation47_spill] sm:$0xff]  ;;  %v8055_v62 = vld [vmem:[#allocation48_spill] sm:$0xff] }
 0x6ee   :  { %3539 = vmatpush1.bf16.msra.mxu0 %v8045_v12  ;;  %3582 = vmatpush1.bf16.msra.mxu1 %v8046_v56  ;;  %v8056_v12 = vld [vmem:[#allocation49_spill] sm:$0xff]  ;;  %v8057_v56 = vld [vmem:[#allocation50_spill] sm:$0xff] }
 0x6ef   :  { %3540 = vmatprep.subr.bf16.mxu0 %v8047_v46  ;;  %3583 = vmatprep.subr.bf16.mxu1 %v8048_v50  ;;  %v8058_v46 = vld [vmem:[#allocation51_spill] sm:$0xff]  ;;  %v8059_v50 = vld [vmem:[#allocation52_spill] sm:$0xff] }
 0x6f2   :  { %3541 = vmatpush1.bf16.msra.mxu0 %v8049_v6  ;;  %3584 = vmatpush1.bf16.msra.mxu1 %v8050_v0  ;;  %v8060_v6 = vld [vmem:[#allocation53_spill] sm:$0xff]  ;;  %v8061_v0 = vld [vmem:[#allocation54_spill] sm:$0xff] }
 0x6f3   :  { %3542 = vmatprep.subr.bf16.mxu0 %v8051_v57  ;;  %3585 = vmatprep.subr.bf16.mxu1 %v8052_v13  ;;  %v8062_v57 = vld [vmem:[#allocation55_spill] sm:$0xff]  ;;  %v8063_v13 = vld [vmem:[#allocation56_spill] sm:$0xff] }
 0x6f6   :  { %3543 = vmatpush1.bf16.msra.mxu0 %v8053_v5  ;;  %3586 = vmatpush1.bf16.msra.mxu1 %v8054_v43  ;;  %v8064_v5 = vld [vmem:[#allocation57_spill] sm:$0xff]  ;;  %v8065_v43 = vld [vmem:[#allocation58_spill] sm:$0xff] }
 0x6f7   :  { %3544 = vmatprep.subr.bf16.mxu0 %v8055_v62  ;;  %3587 = vmatprep.subr.bf16.mxu1 %v8056_v12  ;;  %v8066_v62 = vld [vmem:[#allocation59_spill] sm:$0xff]  ;;  %v8067_v12 = vld [vmem:[#allocation60_spill] sm:$0xff] }
 0x6fa   :  { %3545 = vmatpush1.bf16.msra.mxu0 %v8057_v56  ;;  %3588 = vmatpush1.bf16.msra.mxu1 %v8058_v46  ;;  %v8068_v56 = vld [vmem:[#allocation61_spill] sm:$0xff]  ;;  %v8069_v46 = vld [vmem:[#allocation62_spill] sm:$0xff] }
 0x6fb   :  { %3546 = vmatprep.subr.bf16.mxu0 %v8059_v50  ;;  %3589 = vmatprep.subr.bf16.mxu1 %v8060_v6  ;;  %v8070_v50 = vld [vmem:[#allocation63_spill] sm:$0xff]  ;;  %v8071_v6 = vld [vmem:[#allocation64_spill] sm:$0xff] }
 0x6fe   :  { %3547 = vmatpush1.bf16.msra.mxu0 %v8061_v0  ;;  %3590 = vmatpush1.bf16.msra.mxu1 %v8062_v57  ;;  %v8072_v0 = vld [vmem:[#allocation65_spill] sm:$0xff]  ;;  %v8073_v57 = vld [vmem:[#allocation66_spill] sm:$0xff] }
 0x6ff   :  { %3548 = vmatprep.subr.bf16.mxu0 %v8063_v13  ;;  %3591 = vmatprep.subr.bf16.mxu1 %v8064_v5  ;;  %v8074_v13 = vld [vmem:[#allocation67_spill] sm:$0xff]  ;;  %v8075_v5 = vld [vmem:[#allocation68_spill] sm:$0xff] }
 0x702   :  { %3549 = vmatpush1.bf16.msra.mxu0 %v8065_v43  ;;  %3592 = vmatpush1.bf16.msra.mxu1 %v8066_v62  ;;  %v8076_v43 = vld [vmem:[#allocation69_spill] sm:$0xff]  ;;  %v8077_v62 = vld [vmem:[#allocation70_spill] sm:$0xff] }
 0x703   :  { %3550 = vmatprep.subr.bf16.mxu0 %v8067_v12  ;;  %3593 = vmatprep.subr.bf16.mxu1 %v8068_v56  ;;  %v8078_v12 = vld [vmem:[#allocation71_spill] sm:$0xff]  ;;  %v8079_v56 = vld [vmem:[#allocation72_spill] sm:$0xff] }
 0x706   :  { %3551 = vmatpush1.bf16.msra.mxu0 %v8069_v46  ;;  %3594 = vmatpush1.bf16.msra.mxu1 %v8070_v50  ;;  %v8080_v46 = vld [vmem:[#allocation73_spill] sm:$0xff]  ;;  %v8081_v50 = vld [vmem:[#allocation74_spill] sm:$0xff] }
 0x707   :  { %3552 = vmatprep.subr.bf16.mxu0 %v8071_v6  ;;  %3595 = vmatprep.subr.bf16.mxu1 %v8072_v0  ;;  %v8082_v6 = vld [vmem:[#allocation75_spill] sm:$0xff]  ;;  %v8083_v0 = vld [vmem:[#allocation76_spill] sm:$0xff] }
 0x70a   :  { %3553 = vmatpush1.bf16.msra.mxu0 %v8073_v57  ;;  %3596 = vmatpush1.bf16.msra.mxu1 %v8074_v13  ;;  %v8084_v57 = vld [vmem:[#allocation77_spill] sm:$0xff]  ;;  %v8085_v13 = vld [vmem:[#allocation78_spill] sm:$0xff] }
 0x70b   :  { %3554 = vmatprep.subr.bf16.mxu0 %v8075_v5  ;;  %3597 = vmatprep.subr.bf16.mxu1 %v8076_v43  ;;  %v8086_v5 = vld [vmem:[#allocation79_spill] sm:$0xff]  ;;  %v8087_v43 = vld [vmem:[#allocation80_spill] sm:$0xff] }
 0x70e   :  { %3555 = vmatpush1.bf16.msra.mxu0 %v8077_v62  ;;  %3598 = vmatpush1.bf16.msra.mxu1 %v8078_v12  ;;  %v8088_v62 = vld [vmem:[#allocation81_spill] sm:$0xff] }
 0x70f   :  { %3556 = vmatprep.subr.bf16.mxu0 %v8079_v56  ;;  %3599 = vmatprep.subr.bf16.mxu1 %v8080_v46 }
 0x712   :  { %3557 = vmatpush1.bf16.msra.mxu0 %v8081_v50  ;;  %3600 = vmatpush1.bf16.msra.mxu1 %v8082_v6 }
 0x713   :  { %3558 = vmatprep.subr.bf16.mxu0 %v8083_v0  ;;  %3601 = vmatprep.subr.bf16.mxu1 %v8084_v57 }
 0x716   :  { %3559 = vmatpush1.bf16.msra.mxu0 %v8085_v13  ;;  %3602 = vmatpush1.bf16.msra.mxu1 %v8086_v5 }
 0x717   :  { %3614 = vmatprep.subr.bf16.mxu0 %v8087_v43  ;;  %3657 = vmatprep.subr.bf16.mxu1 %v8088_v62 }
 0x76c   :  { %v3259_v12 = vpop.f32.mrb[20].mxu0  ;;  %v3302_v56 = vpop.f32.mrb[20].mxu1 }
 0x76d   :  { %v3261_v1 = vpop.f32.mrb[21].mxu0  ;;  %v3304_v46 = vpop.f32.mrb[21].mxu1  ;;  %v4661_v0 = vadd.f32 %v3259_v12, %v8089_v49  ;;  %v4689_v57 = vadd.f32 %v3302_v56, %v8090_v41 }
 0x76e   :  { %v3263_v51 = vpop.f32.mrb[22].mxu0  ;;  %v3306_v50 = vpop.f32.mrb[22].mxu1  ;;  %v4662_v13 = vadd.f32 %v3261_v1, %v8091_v17  ;;  %v4690_v5 = vadd.f32 %v3304_v46, %v8092_v4 }
 0x76f   :  { %v3265_v3 = vpop.f32.mrb[23].mxu0  ;;  %v3308_v6 = vpop.f32.mrb[23].mxu1  ;;  %v4570_v14 = vmul.f32 -1.442695, %v4661_v0  ;;  %v4663_v43 = vadd.f32 %v3263_v51, %v8089_v49  ;;  %v4572_v62 = vmul.f32 -1.442695, %v4689_v57  ;;  %v4691_v48 = vadd.f32 %v3306_v50, %v8090_v41 }
 0x770   :  { %v4571_v23 = vmul.f32 -1.442695, %v4662_v13  ;;  %v4664_v61 = vadd.f32 %v3265_v3, %v8091_v17  ;;  %v4573_v55 = vmul.f32 -1.442695, %v4690_v5  ;;  %v4692_v29 = vadd.f32 %v3308_v6, %v8092_v4 }
 0x771   :  { %5209 = vpow2.f32 %v4570_v14  ;;  %v4576_v12 = vmul.f32 -1.442695, %v4663_v43  ;;  %v4578_v56 = vmul.f32 -1.442695, %v4691_v48 }
 0x772   :  { %5211 = vpow2.f32 %v4572_v62  ;;  %v4577_v1 = vmul.f32 -1.442695, %v4664_v61  ;;  %v4579_v46 = vmul.f32 -1.442695, %v4692_v29 }
 0x773   :  { %5213 = vpow2.f32 %v4571_v23 }
 0x774   :  { %5215 = vpow2.f32 %v4573_v55 }
 0x775   :  { %5217 = vpow2.f32 %v4576_v12 }
 0x776   :  { %5219 = vpow2.f32 %v4578_v56 }
 0x777   :  { %5221 = vpow2.f32 %v4577_v1  ;;  %v8093_v1 = vld [vmem:[#allocation86_spill] sm:$0xff] }
 0x778   :  { %5223 = vpow2.f32 %v4579_v46 }
 0x77b   :  { %v5210_v51 = vpop.eup %5209 }
 0x77c   :  { %v5212_v57 = vpop.eup %5211  ;;  %v3449_v3 = vadd.f32 1.0, %v5210_v51  ;;  %v8094_v51 = vld [vmem:[#allocation87_spill] sm:$0xff] }
 0x77d   :  { %v5214_v13 = vpop.eup %5213  ;;  %v3451_v0 = vadd.f32 1.0, %v5212_v57 }
 0x77e   :  { %v5216_v50 = vpop.eup %5215  ;;  %v3450_v14 = vadd.f32 1.0, %v5214_v13  ;;  %5225 = vrcp.f32 %v3449_v3  ;;  %v8095_v3 = vld [vmem:[#allocation88_spill] sm:$0xff] }
 0x77f   :  { %v5218_v5 = vpop.eup %5217  ;;  %v3452_v62 = vadd.f32 1.0, %v5216_v50  ;;  %5227 = vrcp.f32 %v3451_v0  ;;  %v8096_v0 = vld [vmem:[#allocation89_spill] sm:$0xff] }
 0x780   :  { %v5220_v6 = vpop.eup %5219  ;;  %v3455_v61 = vadd.f32 1.0, %v5218_v5  ;;  %5229 = vrcp.f32 %v3450_v14 }
 0x781   :  { %v5222_v43 = vpop.eup %5221  ;;  %v3457_v29 = vadd.f32 1.0, %v5220_v6  ;;  %5231 = vrcp.f32 %v3452_v62 }
 0x782   :  { %v5224_v48 = vpop.eup %5223  ;;  %v3456_v55 = vadd.f32 1.0, %v5222_v43  ;;  %5233 = vrcp.f32 %v3455_v61 }
 0x783   :  { %v3458_v23 = vadd.f32 1.0, %v5224_v48  ;;  %5235 = vrcp.f32 %v3457_v29 }
 0x784   :  { %5237 = vrcp.f32 %v3456_v55 }
 0x785   :  { %5239 = vrcp.f32 %v3458_v23 }
 0x788   :  { %v5226_v4 = vpop.eup %5225 }
 0x7ac   :  { %v3345_v12 = vpop.f32.mrb[52].mxu0  ;;  %v3388_v56 = vpop.f32.mrb[52].mxu1 }
 0x7ad   :  { %v4717_v46 = vadd.f32 %v3345_v12, %v8093_v1  ;;  %v4745_v57 = vadd.f32 %v3388_v56, %v8094_v51  ;;  %v3347_v13 = vpop.f32.mrb[53].mxu0  ;;  %v3390_v50 = vpop.f32.mrb[53].mxu1 }
 0x7ae   :  { %v4718_v5 = vadd.f32 %v3347_v13, %v8095_v3  ;;  %v4746_v6 = vadd.f32 %v3390_v50, %v8096_v0  ;;  %v3349_v14 = vpop.f32.mrb[54].mxu0  ;;  %v3392_v43 = vpop.f32.mrb[54].mxu1 }
 0x7af   :  { %v4574_v62 = vmul.f32 -1.442695, %v4717_v46  ;;  %5241 = vtanh.f32 %v4745_v57  ;;  %v4719_v48 = vadd.f32 %v3349_v14, %v8093_v1  ;;  %v3351_v61 = vpop.f32.mrb[55].mxu0  ;;  %v3394_v29 = vpop.f32.mrb[55].mxu1  ;;  %v4747_v12 = vadd.f32 %v3392_v43, %v8094_v51 }
 0x7b0   :  { %v4575_v55 = vmul.f32 -1.442695, %v4718_v5  ;;  %5243 = vtanh.f32 %v4746_v6  ;;  %v4720_v56 = vadd.f32 %v3351_v61, %v8095_v3  ;;  %v5228_v13 = vpop.eup %5227  ;;  %v4748_v17 = vadd.f32 %v3394_v29, %v8096_v0 }
 0x7b1   :  { %5245 = vpow2.f32 %v4574_v62  ;;  %v4580_v23 = vmul.f32 -1.442695, %v4719_v48  ;;  %v5230_v46 = vpop.eup %5229  ;;  %v3489_v62 = vmul.f32 %v5228_v13, %v6730_v44 }
 0x7b2   :  { %5247 = vpow2.f32 %v4575_v55  ;;  %v4581_v50 = vmul.f32 -1.442695, %v4720_v56  ;;  %v5232_v57 = vpop.eup %5231 }
 0x7b3   :  { %5249 = vpow2.f32 %v4580_v23  ;;  %v5234_v14 = vpop.eup %5233  ;;  %v3490_v55 = vmul.f32 %v5232_v57, %v6732_v52 }
 0x7b4   :  { %5251 = vtanh.f32 %v4747_v12  ;;  %v5236_v5 = vpop.eup %5235 }
 0x7b5   :  { %5253 = vpow2.f32 %v4581_v50  ;;  %v5238_v6 = vpop.eup %5237  ;;  %v3491_v2 = vmul.f32 %v5236_v5, %v6738_v31 }
 0x7b6   :  { %5255 = vtanh.f32 %v4748_v17  ;;  %v5240_v43 = vpop.eup %5239 }
 0x7b9   :  { %v5242_v51 = vpop.eup %5241 }
 0x7ba   :  { %v5244_v61 = vpop.eup %5243  ;;  %v3493_v48 = vmul.f32 %v5242_v51, %v5226_v4  ;;  %v3492_v51 = vmul.f32 %v5240_v43, %v6741_v7 }
 0x7bb   :  { %v5246_v3 = vpop.eup %5245  ;;  %v3494_v56 = vmul.f32 %v5244_v61, %v5230_v46 }
 0x7bc   :  { %v5248_v29 = vpop.eup %5247  ;;  %v3453_v0 = vadd.f32 1.0, %v5246_v3  ;;  %v6896_v23 = vadd.f32 %v3493_v48, %v3489_v62  ;;  %v8097_v48 = vld [vmem:[#allocation126_spill] sm:$0xff] }
 0x7bd   :  { %v5250_v12 = vpop.eup %5249  ;;  %v3454_v1 = vadd.f32 1.0, %v5248_v29  ;;  %v6898_v50 = vadd.f32 %v3494_v56, %v3490_v55  ;;  %v8098_v55 = vld [vmem:[#allocation127_spill] sm:$0xff]  ;;  %v8099_v56 = vld [vmem:[#allocation128_spill] sm:$0xff]  ;;  %v8100_v29 = vld [vmem:[#allocation129_spill] sm:$0xff] }
 0x7be   :  { %v5252_v17 = vpop.eup %5251  ;;  %5257 = vrcp.f32 %v3453_v0  ;;  %v3459_v41 = vadd.f32 1.0, %v5250_v12  ;;  %v8101_v12 = vld [vmem:[#allocation130_spill] sm:$0xff] }
 0x7bf   :  { %v5254_v49 = vpop.eup %5253  ;;  %5259 = vtanh.f32 %v6896_v23  ;;  %v3495_v44 = vmul.f32 %v5252_v17, %v5234_v14  ;;  %v8102_v17 = vld [vmem:[#allocation131_spill] sm:$0xff] }
 0x7c0   :  { %v5256_v4 = vpop.eup %5255  ;;  %5261 = vrcp.f32 %v3454_v1  ;;  %v3460_v52 = vadd.f32 1.0, %v5254_v49 }
 0x7c1   :  { %5263 = vtanh.f32 %v6898_v50  ;;  %v6904_v3 = vadd.f32 %v3495_v44, %v3491_v2  ;;  %v3496_v13 = vmul.f32 %v5256_v4, %v5238_v6  ;;  %v8103_v44 = vld [vmem:[#allocation132_spill] sm:$0xff]  ;;  %v8104_v4 = vld [vmem:[#allocation133_spill] sm:$0xff] }
 0x7c2   :  { %5265 = vrcp.f32 %v3459_v41 }
 0x7c3   :  { %5267 = vtanh.f32 %v6904_v3  ;;  %v6907_v0 = vadd.f32 %v3496_v13, %v3492_v51  ;;  %v8106_v51 = vld [vmem:[#allocation135_spill] sm:$0xff]  ;;  %v8107_v13 = vld [vmem:[#allocation136_spill] sm:$0xff] }
 0x7c4   :  { %5269 = vrcp.f32 %v3460_v52  ;;  %v8105_v52 = vld [vmem:[#allocation134_spill] sm:$0xff] }
 0x7c5   :  { %5271 = vtanh.f32 %v6907_v0 }
 0x7c8   :  { %v5258_v31 = vpop.eup %5257 }
 0x7c9   :  { %v5260_v46 = vpop.eup %5259 }
 0x7ca   :  { %v5262_v57 = vpop.eup %5261  ;;  %v3505_v5 = vmul.f32 %v5260_v46, %v5258_v31  ;;  %v8108_v31 = vld [vmem:[#allocation137_spill] sm:$0xff]  ;;  %v8109_v46 = vld [vmem:[#allocation138_spill] sm:$0xff] }
 0x7cb   :  { %v5264_v1 = vpop.eup %5263 }
 0x7cc   :  { %v5266_v49 = vpop.eup %5265  ;;  %v3506_v61 = vmul.f32 %v5264_v1, %v5262_v57  ;;  %v8110_v57 = vld [vmem:[#allocation139_spill] sm:$0xff]  ;;  %v8111_v1 = vld [vmem:[#allocation140_spill] sm:$0xff] }
 0x7cd   :  { %v5268_v14 = vpop.eup %5267 }
 0x7ce   :  { %v5270_v7 = vpop.eup %5269  ;;  %v3507_v43 = vmul.f32 %v5268_v14, %v5266_v49  ;;  %v8112_v49 = vld [vmem:[#allocation141_spill] sm:$0xff]  ;;  %v8113_v14 = vld [vmem:[#allocation142_spill] sm:$0xff] }
 0x7cf   :  { %v5272_v2 = vpop.eup %5271 }
 0x7d0   :  { %v3508_v6 = vmul.f32 %v5272_v2, %v5270_v7  ;;  %v6910_v41 = vpack.c.bf16 %v3507_v43, %v3505_v5  ;;  %v8114_v7 = vld [vmem:[#allocation143_spill] sm:$0xff]  ;;  %v8115_v5 = vld [vmem:[#allocation144_spill] sm:$0xff]  ;;  %v8116_v43 = vld [vmem:[#allocation145_spill] sm:$0xff] }
 0x7d1   :  { %v8117_v2 = vld [vmem:[#allocation146_spill] sm:$0xff] }
 0x7d2   :  { %v3527_v62 = vpack.c.bf16 %v3508_v6, %v3506_v61  ;;  %v8118_v61 = vld [vmem:[#allocation147_spill] sm:$0xff]  ;;  %v8119_v6 = vld [vmem:[#allocation148_spill] sm:$0xff] }
 0x7d4   :  { %3560 = vmatprep.mubr.bf16.mxu0 %v3527_v62  ;;  %3603 = vmatprep.mubr.bf16.mxu1 %v3527_v62 }
 0x7d5   :  { %3561 = vmatmul.mubr.bf16.vlgmr.msra.gmra.mrb[24].mxu0 %v6910_v41  ;;  %3604 = vmatmul.mubr.bf16.vlgmr.msra.gmra.mrb[24].mxu1 %v6910_v41 }
 0x7d6   :  { %3615 = vmatpush1.bf16.msra.mxu0 %v5891_v27  ;;  %3658 = vmatpush1.bf16.msra.mxu1 %v5893_v42 }
 0x7d7   :  { %3646 = vmatprep.mubr.bf16.mxu0 %v3527_v62  ;;  %3689 = vmatprep.mubr.bf16.mxu1 %v3527_v62  ;;  %v8120_v62 = vld [vmem:[#allocation149_spill] sm:$0xff] }
 0x7d8   :  { %3616 = vmatprep.subr.bf16.mxu0 %v5954_v59  ;;  %3659 = vmatprep.subr.bf16.mxu1 %v7694_v18 }
 0x7da   :  { %3617 = vmatpush1.bf16.msra.mxu0 %v7695_v63  ;;  %3660 = vmatpush1.bf16.msra.mxu1 %v7696_v22 }
 0x7db   :  { %3618 = vmatprep.subr.bf16.mxu0 %v7697_v26  ;;  %3661 = vmatprep.subr.bf16.mxu1 %v7698_v33 }
 0x7de   :  { %3619 = vmatpush1.bf16.msra.mxu0 %v7699_v24  ;;  %3662 = vmatpush1.bf16.msra.mxu1 %v7700_v36 }
 0x7df   :  { %3620 = vmatprep.subr.bf16.mxu0 %v7701_v28  ;;  %3663 = vmatprep.subr.bf16.mxu1 %v7702_v58 }
 0x7e2   :  { %3621 = vmatpush1.bf16.msra.mxu0 %v7703_v11  ;;  %3664 = vmatpush1.bf16.msra.mxu1 %v7704_v60 }
 0x7e3   :  { %3622 = vmatprep.subr.bf16.mxu0 %v7705_v15  ;;  %3665 = vmatprep.subr.bf16.mxu1 %v7794_v16 }
 0x7e6   :  { %3623 = vmatpush1.bf16.msra.mxu0 %v7795_v8  ;;  %3666 = vmatpush1.bf16.msra.mxu1 %v7796_v39 }
 0x7e7   :  { %3624 = vmatprep.subr.bf16.mxu0 %v7797_v19  ;;  %3667 = vmatprep.subr.bf16.mxu1 %v7798_v38 }
 0x7ea   :  { %3625 = vmatpush1.bf16.msra.mxu0 %v7799_v25  ;;  %3668 = vmatpush1.bf16.msra.mxu1 %v7800_v21 }
 0x7eb   :  { %3626 = vmatprep.subr.bf16.mxu0 %v7801_v35  ;;  %3669 = vmatprep.subr.bf16.mxu1 %v7802_v10 }
 0x7ee   :  { %3627 = vmatpush1.bf16.msra.mxu0 %v7803_v32  ;;  %3670 = vmatpush1.bf16.msra.mxu1 %v7804_v47 }
 0x7ef   :  { %3628 = vmatprep.subr.bf16.mxu0 %v7805_v34  ;;  %3671 = vmatprep.subr.bf16.mxu1 %v7806_v40 }
 0x7f2   :  { %3629 = vmatpush1.bf16.msra.mxu0 %v7807_v45  ;;  %3672 = vmatpush1.bf16.msra.mxu1 %v7808_v37 }
 0x7f3   :  { %3630 = vmatprep.subr.bf16.mxu0 %v7809_v30  ;;  %3673 = vmatprep.subr.bf16.mxu1 %v7810_v20 }
 0x7f6   :  { %3631 = vmatpush1.bf16.msra.mxu0 %v7811_v9  ;;  %3674 = vmatpush1.bf16.msra.mxu1 %v7812_v53 }
 0x7f7   :  { %3632 = vmatprep.subr.bf16.mxu0 %v7813_v54  ;;  %3675 = vmatprep.subr.bf16.mxu1 %v8097_v48 }
 0x7fa   :  { %3633 = vmatpush1.bf16.msra.mxu0 %v8098_v55  ;;  %3676 = vmatpush1.bf16.msra.mxu1 %v8099_v56 }
 0x7fb   :  { %3634 = vmatprep.subr.bf16.mxu0 %v8100_v29  ;;  %3677 = vmatprep.subr.bf16.mxu1 %v8101_v12 }
 0x7fe   :  { %3635 = vmatpush1.bf16.msra.mxu0 %v8102_v17  ;;  %3678 = vmatpush1.bf16.msra.mxu1 %v8103_v44 }
 0x7ff   :  { %3636 = vmatprep.subr.bf16.mxu0 %v8104_v4  ;;  %3679 = vmatprep.subr.bf16.mxu1 %v8105_v52  ;;  %v8192_v52 = vld [vmem:[#allocation85_spill] sm:$0xff]  ;;  %v8193_v4 = vld [vmem:[#allocation83_spill] sm:$0xff] }
 0x802   :  { %3637 = vmatpush1.bf16.msra.mxu0 %v8106_v51  ;;  %3680 = vmatpush1.bf16.msra.mxu1 %v8107_v13  ;;  %v8190_v13 = vld [vmem:[#allocation84_spill] sm:$0xff]  ;;  %v8191_v51 = vld [vmem:[#allocation82_spill] sm:$0xff] }
 0x803   :  { %3638 = vmatprep.subr.bf16.mxu0 %v8108_v31  ;;  %3681 = vmatprep.subr.bf16.mxu1 %v8109_v46 }
 0x806   :  { %3639 = vmatpush1.bf16.msra.mxu0 %v8110_v57  ;;  %3682 = vmatpush1.bf16.msra.mxu1 %v8111_v1  ;;  %v8121_v57 = vld [vmem:[#allocation150_spill] sm:$0xff]  ;;  %v8122_v1 = vld [vmem:[#allocation151_spill] sm:$0xff] }
 0x807   :  { %3640 = vmatprep.subr.bf16.mxu0 %v8112_v49  ;;  %3683 = vmatprep.subr.bf16.mxu1 %v8113_v14  ;;  %v8123_v49 = vld [vmem:[#allocation152_spill] sm:$0xff] }
 0x808   :  { %v8124_v14 = vld [vmem:[#allocation16_spill] sm:$0xff] }
 0x80a   :  { %3641 = vmatpush1.bf16.msra.mxu0 %v8114_v7  ;;  %3684 = vmatpush1.bf16.msra.mxu1 %v8115_v5  ;;  %v8125_v7 = vld [vmem:[#allocation18_spill] sm:$0xff] }
 0x80b   :  { %3642 = vmatprep.subr.bf16.mxu0 %v8116_v43  ;;  %3685 = vmatprep.subr.bf16.mxu1 %v8117_v2  ;;  %v8126_v2 = vld [vmem:[#allocation17_spill] sm:$0xff]  ;;  %v8135_v43 = vld [vmem:[#allocation27_spill] sm:$0xff] }
 0x80e   :  { %3643 = vmatpush1.bf16.msra.mxu0 %v8118_v61  ;;  %3686 = vmatpush1.bf16.msra.mxu1 %v8119_v6  ;;  %v8127_v61 = vld [vmem:[#allocation19_spill] sm:$0xff]  ;;  %v8128_v6 = vld [vmem:[#allocation20_spill] sm:$0xff] }
 0x80f   :  { %3644 = vmatprep.subr.bf16.mxu0 %v8120_v62  ;;  %3687 = vmatprep.subr.bf16.mxu1 %v8121_v57  ;;  %v8129_v62 = vld [vmem:[#allocation21_spill] sm:$0xff]  ;;  %v8130_v57 = vld [vmem:[#allocation22_spill] sm:$0xff] }
 0x812   :  { %3645 = vmatpush1.bf16.msra.mxu0 %v8122_v1  ;;  %3688 = vmatpush1.bf16.msra.mxu1 %v8123_v49  ;;  %v8131_v1 = vld [vmem:[#allocation23_spill] sm:$0xff]  ;;  %v8132_v49 = vld [vmem:[#allocation24_spill] sm:$0xff] }
 0x813   :  { %3831 = vmatprep.subr.bf16.mxu0 %v8124_v14  ;;  %3874 = vmatprep.subr.bf16.mxu1 %v8125_v7  ;;  %v8133_v14 = vld [vmem:[#allocation25_spill] sm:$0xff]  ;;  %v8134_v7 = vld [vmem:[#allocation26_spill] sm:$0xff] }
 0x815   :  { %3647 = vmatmul.mubr.bf16.vlgmr.msra.gmra.mrb[56].mxu0 %v6910_v41  ;;  %3690 = vmatmul.mubr.bf16.vlgmr.msra.gmra.mrb[56].mxu1 %v6910_v41  ;;  %v8136_v41 = vld [vmem:[#allocation28_spill] sm:$0xff] }
 0x816   :  { %3832 = vmatpush1.bf16.msra.mxu0 %v8126_v2  ;;  %3875 = vmatpush1.bf16.msra.mxu1 %v8127_v61  ;;  %v8137_v2 = vld [vmem:[#allocation29_spill] sm:$0xff]  ;;  %v8138_v61 = vld [vmem:[#allocation30_spill] sm:$0xff] }
 0x817   :  { %3833 = vmatprep.subr.bf16.mxu0 %v8128_v6  ;;  %3876 = vmatprep.subr.bf16.mxu1 %v8129_v62  ;;  %v8139_v6 = vld [vmem:[#allocation31_spill] sm:$0xff]  ;;  %v8140_v62 = vld [vmem:[#allocation32_spill] sm:$0xff] }
 0x81a   :  { %3834 = vmatpush1.bf16.msra.mxu0 %v8130_v57  ;;  %3877 = vmatpush1.bf16.msra.mxu1 %v8131_v1  ;;  %v8141_v57 = vld [vmem:[#allocation33_spill] sm:$0xff]  ;;  %v8142_v1 = vld [vmem:[#allocation34_spill] sm:$0xff] }
 0x81b   :  { %3835 = vmatprep.subr.bf16.mxu0 %v8132_v49  ;;  %3878 = vmatprep.subr.bf16.mxu1 %v8133_v14  ;;  %v8143_v49 = vld [vmem:[#allocation35_spill] sm:$0xff]  ;;  %v8144_v14 = vld [vmem:[#allocation36_spill] sm:$0xff] }
 0x81e   :  { %3836 = vmatpush1.bf16.msra.mxu0 %v8134_v7  ;;  %3879 = vmatpush1.bf16.msra.mxu1 %v8135_v43  ;;  %v8145_v7 = vld [vmem:[#allocation37_spill] sm:$0xff]  ;;  %v8146_v43 = vld [vmem:[#allocation38_spill] sm:$0xff] }
 0x81f   :  { %3837 = vmatprep.subr.bf16.mxu0 %v8136_v41  ;;  %3880 = vmatprep.subr.bf16.mxu1 %v8137_v2  ;;  %v8147_v41 = vld [vmem:[#allocation39_spill] sm:$0xff]  ;;  %v8148_v2 = vld [vmem:[#allocation40_spill] sm:$0xff] }
 0x822   :  { %3838 = vmatpush1.bf16.msra.mxu0 %v8138_v61  ;;  %3881 = vmatpush1.bf16.msra.mxu1 %v8139_v6  ;;  %v8149_v61 = vld [vmem:[#allocation41_spill] sm:$0xff]  ;;  %v8150_v6 = vld [vmem:[#allocation42_spill] sm:$0xff] }
 0x823   :  { %3839 = vmatprep.subr.bf16.mxu0 %v8140_v62  ;;  %3882 = vmatprep.subr.bf16.mxu1 %v8141_v57  ;;  %v8151_v62 = vld [vmem:[#allocation43_spill] sm:$0xff]  ;;  %v8152_v57 = vld [vmem:[#allocation44_spill] sm:$0xff] }
 0x826   :  { %3840 = vmatpush1.bf16.msra.mxu0 %v8142_v1  ;;  %3883 = vmatpush1.bf16.msra.mxu1 %v8143_v49  ;;  %v8153_v1 = vld [vmem:[#allocation45_spill] sm:$0xff]  ;;  %v8154_v49 = vld [vmem:[#allocation46_spill] sm:$0xff] }
 0x827   :  { %3841 = vmatprep.subr.bf16.mxu0 %v8144_v14  ;;  %3884 = vmatprep.subr.bf16.mxu1 %v8145_v7  ;;  %v8155_v14 = vld [vmem:[#allocation47_spill] sm:$0xff]  ;;  %v8156_v7 = vld [vmem:[#allocation48_spill] sm:$0xff] }
 0x82a   :  { %3842 = vmatpush1.bf16.msra.mxu0 %v8146_v43  ;;  %3885 = vmatpush1.bf16.msra.mxu1 %v8147_v41  ;;  %v8157_v43 = vld [vmem:[#allocation49_spill] sm:$0xff]  ;;  %v8158_v41 = vld [vmem:[#allocation50_spill] sm:$0xff] }
 0x82b   :  { %3843 = vmatprep.subr.bf16.mxu0 %v8148_v2  ;;  %3886 = vmatprep.subr.bf16.mxu1 %v8149_v61  ;;  %v8159_v2 = vld [vmem:[#allocation51_spill] sm:$0xff]  ;;  %v8160_v61 = vld [vmem:[#allocation52_spill] sm:$0xff] }
 0x82e   :  { %3844 = vmatpush1.bf16.msra.mxu0 %v8150_v6  ;;  %3887 = vmatpush1.bf16.msra.mxu1 %v8151_v62  ;;  %v8161_v6 = vld [vmem:[#allocation53_spill] sm:$0xff]  ;;  %v8162_v62 = vld [vmem:[#allocation54_spill] sm:$0xff] }
 0x82f   :  { %3845 = vmatprep.subr.bf16.mxu0 %v8152_v57  ;;  %3888 = vmatprep.subr.bf16.mxu1 %v8153_v1  ;;  %v8163_v57 = vld [vmem:[#allocation55_spill] sm:$0xff]  ;;  %v8164_v1 = vld [vmem:[#allocation56_spill] sm:$0xff] }
 0x832   :  { %3846 = vmatpush1.bf16.msra.mxu0 %v8154_v49  ;;  %3889 = vmatpush1.bf16.msra.mxu1 %v8155_v14  ;;  %v8165_v49 = vld [vmem:[#allocation57_spill] sm:$0xff]  ;;  %v8166_v14 = vld [vmem:[#allocation58_spill] sm:$0xff] }
 0x833   :  { %3847 = vmatprep.subr.bf16.mxu0 %v8156_v7  ;;  %3890 = vmatprep.subr.bf16.mxu1 %v8157_v43  ;;  %v8167_v7 = vld [vmem:[#allocation59_spill] sm:$0xff]  ;;  %v8168_v43 = vld [vmem:[#allocation60_spill] sm:$0xff] }
 0x836   :  { %3848 = vmatpush1.bf16.msra.mxu0 %v8158_v41  ;;  %3891 = vmatpush1.bf16.msra.mxu1 %v8159_v2  ;;  %v8169_v41 = vld [vmem:[#allocation61_spill] sm:$0xff]  ;;  %v8170_v2 = vld [vmem:[#allocation62_spill] sm:$0xff] }
 0x837   :  { %3849 = vmatprep.subr.bf16.mxu0 %v8160_v61  ;;  %3892 = vmatprep.subr.bf16.mxu1 %v8161_v6  ;;  %v8171_v61 = vld [vmem:[#allocation63_spill] sm:$0xff]  ;;  %v8172_v6 = vld [vmem:[#allocation64_spill] sm:$0xff] }
 0x83a   :  { %3850 = vmatpush1.bf16.msra.mxu0 %v8162_v62  ;;  %3893 = vmatpush1.bf16.msra.mxu1 %v8163_v57  ;;  %v8173_v62 = vld [vmem:[#allocation65_spill] sm:$0xff]  ;;  %v8174_v57 = vld [vmem:[#allocation66_spill] sm:$0xff] }
 0x83b   :  { %3851 = vmatprep.subr.bf16.mxu0 %v8164_v1  ;;  %3894 = vmatprep.subr.bf16.mxu1 %v8165_v49  ;;  %v8175_v1 = vld [vmem:[#allocation67_spill] sm:$0xff]  ;;  %v8176_v49 = vld [vmem:[#allocation68_spill] sm:$0xff] }
 0x83e   :  { %3852 = vmatpush1.bf16.msra.mxu0 %v8166_v14  ;;  %3895 = vmatpush1.bf16.msra.mxu1 %v8167_v7  ;;  %v8177_v14 = vld [vmem:[#allocation69_spill] sm:$0xff]  ;;  %v8178_v7 = vld [vmem:[#allocation70_spill] sm:$0xff] }
 0x83f   :  { %3853 = vmatprep.subr.bf16.mxu0 %v8168_v43  ;;  %3896 = vmatprep.subr.bf16.mxu1 %v8169_v41  ;;  %v8179_v43 = vld [vmem:[#allocation71_spill] sm:$0xff]  ;;  %v8180_v41 = vld [vmem:[#allocation72_spill] sm:$0xff] }
 0x842   :  { %3854 = vmatpush1.bf16.msra.mxu0 %v8170_v2  ;;  %3897 = vmatpush1.bf16.msra.mxu1 %v8171_v61  ;;  %v8181_v2 = vld [vmem:[#allocation73_spill] sm:$0xff]  ;;  %v8182_v61 = vld [vmem:[#allocation74_spill] sm:$0xff] }
 0x843   :  { %3855 = vmatprep.subr.bf16.mxu0 %v8172_v6  ;;  %3898 = vmatprep.subr.bf16.mxu1 %v8173_v62  ;;  %v8183_v6 = vld [vmem:[#allocation75_spill] sm:$0xff]  ;;  %v8184_v62 = vld [vmem:[#allocation76_spill] sm:$0xff] }
 0x846   :  { %3856 = vmatpush1.bf16.msra.mxu0 %v8174_v57  ;;  %3899 = vmatpush1.bf16.msra.mxu1 %v8175_v1  ;;  %v8185_v57 = vld [vmem:[#allocation77_spill] sm:$0xff]  ;;  %v8186_v1 = vld [vmem:[#allocation78_spill] sm:$0xff] }
 0x847   :  { %3857 = vmatprep.subr.bf16.mxu0 %v8176_v49  ;;  %3900 = vmatprep.subr.bf16.mxu1 %v8177_v14  ;;  %v8187_v49 = vld [vmem:[#allocation79_spill] sm:$0xff]  ;;  %v8188_v14 = vld [vmem:[#allocation80_spill] sm:$0xff] }
 0x84a   :  { %3858 = vmatpush1.bf16.msra.mxu0 %v8178_v7  ;;  %3901 = vmatpush1.bf16.msra.mxu1 %v8179_v43  ;;  %v8189_v7 = vld [vmem:[#allocation81_spill] sm:$0xff] }
 0x84b   :  { %3859 = vmatprep.subr.bf16.mxu0 %v8180_v41  ;;  %3902 = vmatprep.subr.bf16.mxu1 %v8181_v2 }
 0x84e   :  { %3860 = vmatpush1.bf16.msra.mxu0 %v8182_v61  ;;  %3903 = vmatpush1.bf16.msra.mxu1 %v8183_v6 }
 0x84f   :  { %3861 = vmatprep.subr.bf16.mxu0 %v8184_v62  ;;  %3904 = vmatprep.subr.bf16.mxu1 %v8185_v57 }
 0x852   :  { %3862 = vmatpush1.bf16.msra.mxu0 %v8186_v1  ;;  %3905 = vmatpush1.bf16.msra.mxu1 %v8187_v49 }
 0x853   :  { %3917 = vmatprep.subr.bf16.mxu0 %v8188_v14  ;;  %3960 = vmatprep.subr.bf16.mxu1 %v8189_v7 }
 0x8a8   :  { %v3562_v43 = vpop.f32.mrb[24].mxu0  ;;  %v3605_v41 = vpop.f32.mrb[24].mxu1 }
 0x8a9   :  { %v3564_v5 = vpop.f32.mrb[25].mxu0  ;;  %v3607_v2 = vpop.f32.mrb[25].mxu1  ;;  %v4665_v62 = vadd.f32 %v3562_v43, %v8190_v13  ;;  %v4693_v57 = vadd.f32 %v3605_v41, %v8191_v51 }
 0x8aa   :  { %v3566_v46 = vpop.f32.mrb[26].mxu0  ;;  %v3609_v61 = vpop.f32.mrb[26].mxu1  ;;  %v4666_v1 = vadd.f32 %v3564_v5, %v8192_v52  ;;  %v4694_v49 = vadd.f32 %v3607_v2, %v8193_v4 }
 0x8ab   :  { %v3568_v31 = vpop.f32.mrb[27].mxu0  ;;  %v3611_v6 = vpop.f32.mrb[27].mxu1  ;;  %v4582_v44 = vmul.f32 -1.442695, %v4665_v62  ;;  %v4667_v14 = vadd.f32 %v3566_v46, %v8190_v13  ;;  %v4584_v7 = vmul.f32 -1.442695, %v4693_v57  ;;  %v4695_v17 = vadd.f32 %v3609_v61, %v8191_v51 }
 0x8ac   :  { %v4583_v12 = vmul.f32 -1.442695, %v4666_v1  ;;  %v4668_v29 = vadd.f32 %v3568_v31, %v8192_v52  ;;  %v4585_v56 = vmul.f32 -1.442695, %v4694_v49  ;;  %v4696_v55 = vadd.f32 %v3611_v6, %v8193_v4 }
 0x8ad   :  { %5273 = vpow2.f32 %v4582_v44  ;;  %v4588_v43 = vmul.f32 -1.442695, %v4667_v14  ;;  %v4590_v41 = vmul.f32 -1.442695, %v4695_v17 }
 0x8ae   :  { %5275 = vpow2.f32 %v4584_v7  ;;  %v4589_v5 = vmul.f32 -1.442695, %v4668_v29  ;;  %v4591_v2 = vmul.f32 -1.442695, %v4696_v55 }
 0x8af   :  { %5277 = vpow2.f32 %v4583_v12 }
 0x8b0   :  { %5279 = vpow2.f32 %v4585_v56 }
 0x8b1   :  { %5281 = vpow2.f32 %v4588_v43 }
 0x8b2   :  { %5283 = vpow2.f32 %v4590_v41 }
 0x8b3   :  { %5285 = vpow2.f32 %v4589_v5  ;;  %v8194_v5 = vld [vmem:[#allocation86_spill] sm:$0xff] }
 0x8b4   :  { %5287 = vpow2.f32 %v4591_v2 }
 0x8b7   :  { %v5274_v46 = vpop.eup %5273 }
 0x8b8   :  { %v5276_v61 = vpop.eup %5275  ;;  %v3752_v31 = vadd.f32 1.0, %v5274_v46  ;;  %v8195_v46 = vld [vmem:[#allocation87_spill] sm:$0xff] }
 0x8b9   :  { %v5278_v62 = vpop.eup %5277  ;;  %v3754_v49 = vadd.f32 1.0, %v5276_v61 }
 0x8ba   :  { %v5280_v57 = vpop.eup %5279  ;;  %v3753_v44 = vadd.f32 1.0, %v5278_v62  ;;  %5289 = vrcp.f32 %v3752_v31  ;;  %v8196_v31 = vld [vmem:[#allocation88_spill] sm:$0xff] }
 0x8bb   :  { %v5282_v1 = vpop.eup %5281  ;;  %v3755_v7 = vadd.f32 1.0, %v5280_v57  ;;  %5291 = vrcp.f32 %v3754_v49  ;;  %v8197_v49 = vld [vmem:[#allocation89_spill] sm:$0xff] }
 0x8bc   :  { %v5284_v6 = vpop.eup %5283  ;;  %v3758_v29 = vadd.f32 1.0, %v5282_v1  ;;  %5293 = vrcp.f32 %v3753_v44 }
 0x8bd   :  { %v5286_v14 = vpop.eup %5285  ;;  %v3760_v55 = vadd.f32 1.0, %v5284_v6  ;;  %5295 = vrcp.f32 %v3755_v7 }
 0x8be   :  { %v5288_v17 = vpop.eup %5287  ;;  %v3759_v56 = vadd.f32 1.0, %v5286_v14  ;;  %5297 = vrcp.f32 %v3758_v29 }
 0x8bf   :  { %v3761_v12 = vadd.f32 1.0, %v5288_v17  ;;  %5299 = vrcp.f32 %v3760_v55 }
 0x8c0   :  { %5301 = vrcp.f32 %v3759_v56 }
 0x8c1   :  { %5303 = vrcp.f32 %v3761_v12 }
 0x8c4   :  { %v5290_v4 = vpop.eup %5289 }
 0x8e8   :  { %v3648_v43 = vpop.f32.mrb[56].mxu0  ;;  %v3691_v41 = vpop.f32.mrb[56].mxu1 }
 0x8e9   :  { %v4721_v2 = vadd.f32 %v3648_v43, %v8194_v5  ;;  %v4749_v61 = vadd.f32 %v3691_v41, %v8195_v46  ;;  %v3650_v62 = vpop.f32.mrb[57].mxu0  ;;  %v3693_v57 = vpop.f32.mrb[57].mxu1 }
 0x8ea   :  { %v4722_v1 = vadd.f32 %v3650_v62, %v8196_v31  ;;  %v4750_v6 = vadd.f32 %v3693_v57, %v8197_v49  ;;  %v3652_v44 = vpop.f32.mrb[58].mxu0  ;;  %v3695_v14 = vpop.f32.mrb[58].mxu1 }
 0x8eb   :  { %v4586_v7 = vmul.f32 -1.442695, %v4721_v2  ;;  %5305 = vtanh.f32 %v4749_v61  ;;  %v4723_v17 = vadd.f32 %v3652_v44, %v8194_v5  ;;  %v3654_v29 = vpop.f32.mrb[59].mxu0  ;;  %v3697_v55 = vpop.f32.mrb[59].mxu1  ;;  %v4751_v43 = vadd.f32 %v3695_v14, %v8195_v46 }
 0x8ec   :  { %v4587_v56 = vmul.f32 -1.442695, %v4722_v1  ;;  %5307 = vtanh.f32 %v4750_v6  ;;  %v4724_v41 = vadd.f32 %v3654_v29, %v8196_v31  ;;  %v5292_v62 = vpop.eup %5291  ;;  %v4752_v52 = vadd.f32 %v3697_v55, %v8197_v49 }
 0x8ed   :  { %5309 = vpow2.f32 %v4586_v7  ;;  %v4592_v12 = vmul.f32 -1.442695, %v4723_v17  ;;  %v5294_v2 = vpop.eup %5293  ;;  %v3792_v7 = vmul.f32 %v5292_v62, %v6896_v23 }
 0x8ee   :  { %5311 = vpow2.f32 %v4587_v56  ;;  %v4593_v57 = vmul.f32 -1.442695, %v4724_v41  ;;  %v5296_v61 = vpop.eup %5295 }
 0x8ef   :  { %5313 = vpow2.f32 %v4592_v12  ;;  %v5298_v44 = vpop.eup %5297  ;;  %v3793_v56 = vmul.f32 %v5296_v61, %v6898_v50 }
 0x8f0   :  { %5315 = vtanh.f32 %v4751_v43  ;;  %v5300_v1 = vpop.eup %5299 }
 0x8f1   :  { %5317 = vpow2.f32 %v4593_v57  ;;  %v5302_v6 = vpop.eup %5301  ;;  %v3794_v48 = vmul.f32 %v5300_v1, %v6904_v3 }
 0x8f2   :  { %5319 = vtanh.f32 %v4752_v52  ;;  %v5304_v14 = vpop.eup %5303 }
 0x8f5   :  { %v5306_v46 = vpop.eup %5305 }
 0x8f6   :  { %v5308_v29 = vpop.eup %5307  ;;  %v3796_v17 = vmul.f32 %v5306_v46, %v5290_v4  ;;  %v3795_v46 = vmul.f32 %v5304_v14, %v6907_v0 }
 0x8f7   :  { %v5310_v31 = vpop.eup %5309  ;;  %v3797_v41 = vmul.f32 %v5308_v29, %v5294_v2 }
 0x8f8   :  { %v5312_v55 = vpop.eup %5311  ;;  %v3756_v49 = vadd.f32 1.0, %v5310_v31  ;;  %v7062_v12 = vadd.f32 %v3796_v17, %v3792_v7  ;;  %v4897_v17 = vld [vmem:[#allocation9 + $0x60] sm:$0xff]  }
 0x8f9   :  { %v5314_v43 = vpop.eup %5313  ;;  %v3757_v5 = vadd.f32 1.0, %v5312_v55  ;;  %v7064_v57 = vadd.f32 %v3797_v41, %v3793_v56  ;;  %v4898_v56 = vld [vmem:[#allocation9 + $0x20] sm:$0xff]   ;;  %v4899_v41 = vld [vmem:[#allocation9 + $0x68] sm:$0xff]  }
 0x8fa   :  { %v5316_v52 = vpop.eup %5315  ;;  %5321 = vrcp.f32 %v3756_v49  ;;  %v3762_v51 = vadd.f32 1.0, %v5314_v43  ;;  %v4900_v55 = vld [vmem:[#allocation9 + $0x28] sm:$0xff]   ;;  %v4901_v43 = vld [vmem:[#allocation9 + $0x70] sm:$0xff]  }
 0x8fb   :  { %v5318_v13 = vpop.eup %5317  ;;  %5323 = vtanh.f32 %v7062_v12  ;;  %v3798_v23 = vmul.f32 %v5316_v52, %v5298_v44  ;;  %v4902_v52 = vld [vmem:[#allocation9 + $0x30] sm:$0xff]  }
 0x8fc   :  { %v5320_v4 = vpop.eup %5319  ;;  %5325 = vrcp.f32 %v3757_v5  ;;  %v3763_v50 = vadd.f32 1.0, %v5318_v13 }
 0x8fd   :  { %5327 = vtanh.f32 %v7064_v57  ;;  %v7070_v31 = vadd.f32 %v3798_v23, %v3794_v48  ;;  %v3799_v62 = vmul.f32 %v5320_v4, %v5302_v6  ;;  %v4903_v23 = vld [vmem:[#allocation9 + $0x78] sm:$0xff]  }
 0x8fe   :  { %5329 = vrcp.f32 %v3762_v51  ;;  %v4904_v4 = vld [vmem:[#allocation9 + $0x38] sm:$0xff]  }
 0x8ff   :  { %5331 = vtanh.f32 %v7070_v31  ;;  %v7073_v49 = vadd.f32 %v3799_v62, %v3795_v46 }
 0x900   :  { %5333 = vrcp.f32 %v3763_v50 }
 0x901   :  { %5335 = vtanh.f32 %v7073_v49 }
 0x904   :  { %v5322_v3 = vpop.eup %5321 }
 0x905   :  { %v5324_v2 = vpop.eup %5323 }
 0x906   :  { %v5326_v61 = vpop.eup %5325  ;;  %v3808_v1 = vmul.f32 %v5324_v2, %v5322_v3 }
 0x907   :  { %v5328_v5 = vpop.eup %5327 }
 0x908   :  { %v5330_v13 = vpop.eup %5329  ;;  %v3809_v29 = vmul.f32 %v5328_v5, %v5326_v61 }
 0x909   :  { %v5332_v44 = vpop.eup %5331 }
 0x90a   :  { %v5334_v0 = vpop.eup %5333  ;;  %v3810_v14 = vmul.f32 %v5332_v44, %v5330_v13  ;;  %v8225_v44 = vld [vmem:[#allocation84_spill] sm:$0xff] }
 0x90b   :  { %v5336_v48 = vpop.eup %5335 }
 0x90c   :  { %v3811_v6 = vmul.f32 %v5336_v48, %v5334_v0  ;;  %v7076_v51 = vpack.c.bf16 %v3810_v14, %v3808_v1  ;;  %v8226_v1 = vld [vmem:[#allocation82_spill] sm:$0xff]  ;;  %v8227_v48 = vld [vmem:[#allocation85_spill] sm:$0xff] }
 0x90e   :  { %v3830_v7 = vpack.c.bf16 %v3811_v6, %v3809_v29  ;;  %v8228_v6 = vld [vmem:[#allocation83_spill] sm:$0xff] }
 0x910   :  { %3863 = vmatprep.mubr.bf16.mxu0 %v3830_v7  ;;  %3906 = vmatprep.mubr.bf16.mxu1 %v3830_v7 }
 0x911   :  { %3864 = vmatmul.mubr.bf16.vlgmr.msra.gmra.mrb[28].mxu0 %v7076_v51  ;;  %3907 = vmatmul.mubr.bf16.vlgmr.msra.gmra.mrb[28].mxu1 %v7076_v51 }
 0x912   :  { %3918 = vmatpush1.bf16.msra.mxu0 %v5891_v27  ;;  %3961 = vmatpush1.bf16.msra.mxu1 %v5893_v42  ;;  %v8198_v42 = vld [vmem:[#allocation126_spill] sm:$0xff]  ;;  %v8199_v27 = vld [vmem:[#allocation127_spill] sm:$0xff] }
 0x913   :  { %3949 = vmatprep.mubr.bf16.mxu0 %v3830_v7  ;;  %3992 = vmatprep.mubr.bf16.mxu1 %v3830_v7 }
 0x914   :  { %3919 = vmatprep.subr.bf16.mxu0 %v5954_v59  ;;  %3962 = vmatprep.subr.bf16.mxu1 %v7694_v18  ;;  %v8200_v59 = vld [vmem:[#allocation128_spill] sm:$0xff]  ;;  %v8201_v18 = vld [vmem:[#allocation129_spill] sm:$0xff] }
 0x916   :  { %3920 = vmatpush1.bf16.msra.mxu0 %v7695_v63  ;;  %3963 = vmatpush1.bf16.msra.mxu1 %v7696_v22  ;;  %v8202_v63 = vld [vmem:[#allocation130_spill] sm:$0xff]  ;;  %v8203_v22 = vld [vmem:[#allocation131_spill] sm:$0xff] }
 0x917   :  { %3921 = vmatprep.subr.bf16.mxu0 %v7697_v26  ;;  %3964 = vmatprep.subr.bf16.mxu1 %v7698_v33  ;;  %v8204_v26 = vld [vmem:[#allocation132_spill] sm:$0xff]  ;;  %v8205_v33 = vld [vmem:[#allocation133_spill] sm:$0xff] }
 0x91a   :  { %3922 = vmatpush1.bf16.msra.mxu0 %v7699_v24  ;;  %3965 = vmatpush1.bf16.msra.mxu1 %v7700_v36  ;;  %v8206_v24 = vld [vmem:[#allocation134_spill] sm:$0xff]  ;;  %v8207_v36 = vld [vmem:[#allocation135_spill] sm:$0xff] }
 0x91b   :  { %3923 = vmatprep.subr.bf16.mxu0 %v7701_v28  ;;  %3966 = vmatprep.subr.bf16.mxu1 %v7702_v58  ;;  %v8208_v28 = vld [vmem:[#allocation136_spill] sm:$0xff]  ;;  %v8209_v58 = vld [vmem:[#allocation137_spill] sm:$0xff] }
 0x91e   :  { %3924 = vmatpush1.bf16.msra.mxu0 %v7703_v11  ;;  %3967 = vmatpush1.bf16.msra.mxu1 %v7704_v60  ;;  %v8210_v11 = vld [vmem:[#allocation138_spill] sm:$0xff]  ;;  %v8211_v60 = vld [vmem:[#allocation139_spill] sm:$0xff] }
 0x91f   :  { %3925 = vmatprep.subr.bf16.mxu0 %v7705_v15  ;;  %3968 = vmatprep.subr.bf16.mxu1 %v7794_v16  ;;  %v8212_v15 = vld [vmem:[#allocation140_spill] sm:$0xff]  ;;  %v8213_v16 = vld [vmem:[#allocation141_spill] sm:$0xff] }
 0x922   :  { %3926 = vmatpush1.bf16.msra.mxu0 %v7795_v8  ;;  %3969 = vmatpush1.bf16.msra.mxu1 %v7796_v39  ;;  %v8214_v8 = vld [vmem:[#allocation142_spill] sm:$0xff]  ;;  %v8215_v39 = vld [vmem:[#allocation143_spill] sm:$0xff] }
 0x923   :  { %3927 = vmatprep.subr.bf16.mxu0 %v7797_v19  ;;  %3970 = vmatprep.subr.bf16.mxu1 %v7798_v38  ;;  %v8216_v19 = vld [vmem:[#allocation144_spill] sm:$0xff]  ;;  %v8217_v38 = vld [vmem:[#allocation145_spill] sm:$0xff] }
 0x926   :  { %3928 = vmatpush1.bf16.msra.mxu0 %v7799_v25  ;;  %3971 = vmatpush1.bf16.msra.mxu1 %v7800_v21  ;;  %v8218_v25 = vld [vmem:[#allocation146_spill] sm:$0xff]  ;;  %v8219_v21 = vld [vmem:[#allocation147_spill] sm:$0xff] }
 0x927   :  { %3929 = vmatprep.subr.bf16.mxu0 %v7801_v35  ;;  %3972 = vmatprep.subr.bf16.mxu1 %v7802_v10  ;;  %v8220_v35 = vld [vmem:[#allocation148_spill] sm:$0xff]  ;;  %v8221_v10 = vld [vmem:[#allocation149_spill] sm:$0xff] }
 0x92a   :  { %3930 = vmatpush1.bf16.msra.mxu0 %v7803_v32  ;;  %3973 = vmatpush1.bf16.msra.mxu1 %v7804_v47  ;;  %v8222_v32 = vld [vmem:[#allocation150_spill] sm:$0xff]  ;;  %v8223_v47 = vld [vmem:[#allocation151_spill] sm:$0xff] }
 0x92b   :  { %3931 = vmatprep.subr.bf16.mxu0 %v7805_v34  ;;  %3974 = vmatprep.subr.bf16.mxu1 %v7806_v40  ;;  %v8224_v34 = vld [vmem:[#allocation152_spill] sm:$0xff]  ;;  %v4889_v40 = vld [vmem:[#allocation9 + $0x40] sm:$0xff]  }
 0x92e   :  { %3932 = vmatpush1.bf16.msra.mxu0 %v7807_v45  ;;  %3975 = vmatpush1.bf16.msra.mxu1 %v7808_v37  ;;  %v4890_v45 = vld [vmem:[#allocation9] sm:$0xff]   ;;  %v4891_v37 = vld [vmem:[#allocation9 + $0x48] sm:$0xff]  }
 0x92f   :  { %3933 = vmatprep.subr.bf16.mxu0 %v7809_v30  ;;  %3976 = vmatprep.subr.bf16.mxu1 %v7810_v20  ;;  %v4892_v30 = vld [vmem:[#allocation9 + $0x8] sm:$0xff]   ;;  %v4893_v20 = vld [vmem:[#allocation9 + $0x50] sm:$0xff]  }
 0x932   :  { %3934 = vmatpush1.bf16.msra.mxu0 %v7811_v9  ;;  %3977 = vmatpush1.bf16.msra.mxu1 %v7812_v53  ;;  %v4894_v9 = vld [vmem:[#allocation9 + $0x10] sm:$0xff]   ;;  %v4895_v53 = vld [vmem:[#allocation9 + $0x58] sm:$0xff]  }
 0x933   :  { %3935 = vmatprep.subr.bf16.mxu0 %v7813_v54  ;;  %3978 = vmatprep.subr.bf16.mxu1 %v8198_v42  ;;  %v4896_v54 = vld [vmem:[#allocation9 + $0x18] sm:$0xff]  }
 0x936   :  { %3936 = vmatpush1.bf16.msra.mxu0 %v8199_v27  ;;  %3979 = vmatpush1.bf16.msra.mxu1 %v8200_v59 }
 0x937   :  { %3937 = vmatprep.subr.bf16.mxu0 %v8201_v18  ;;  %3980 = vmatprep.subr.bf16.mxu1 %v8202_v63 }
 0x93a   :  { %3938 = vmatpush1.bf16.msra.mxu0 %v8203_v22  ;;  %3981 = vmatpush1.bf16.msra.mxu1 %v8204_v26 }
 0x93b   :  { %3939 = vmatprep.subr.bf16.mxu0 %v8205_v33  ;;  %3982 = vmatprep.subr.bf16.mxu1 %v8206_v24 }
 0x93e   :  { %3940 = vmatpush1.bf16.msra.mxu0 %v8207_v36  ;;  %3983 = vmatpush1.bf16.msra.mxu1 %v8208_v28 }
 0x93f   :  { %3941 = vmatprep.subr.bf16.mxu0 %v8209_v58  ;;  %3984 = vmatprep.subr.bf16.mxu1 %v8210_v11 }
 0x942   :  { %3942 = vmatpush1.bf16.msra.mxu0 %v8211_v60  ;;  %3985 = vmatpush1.bf16.msra.mxu1 %v8212_v15 }
 0x943   :  { %3943 = vmatprep.subr.bf16.mxu0 %v8213_v16  ;;  %3986 = vmatprep.subr.bf16.mxu1 %v8214_v8 }
 0x946   :  { %3944 = vmatpush1.bf16.msra.mxu0 %v8215_v39  ;;  %3987 = vmatpush1.bf16.msra.mxu1 %v8216_v19 }
 0x947   :  { %3945 = vmatprep.subr.bf16.mxu0 %v8217_v38  ;;  %3988 = vmatprep.subr.bf16.mxu1 %v8218_v25 }
 0x94a   :  { %3946 = vmatpush1.bf16.msra.mxu0 %v8219_v21  ;;  %3989 = vmatpush1.bf16.msra.mxu1 %v8220_v35 }
 0x94b   :  { %3947 = vmatprep.subr.bf16.mxu0 %v8221_v10  ;;  %3990 = vmatprep.subr.bf16.mxu1 %v8222_v32 }
 0x94e   :  { %3948 = vmatpush1.bf16.msra.mxu0 %v8223_v47  ;;  %3991 = vmatpush1.bf16.msra.mxu1 %v8224_v34 }
 0x94f   :  { %4623 = vmatprep.subr.bf16.mxu0 %v4889_v40 }
 0x951   :  { %3950 = vmatmul.mubr.bf16.vlgmr.msra.gmra.mrb[60].mxu0 %v7076_v51  ;;  %3993 = vmatmul.mubr.bf16.vlgmr.msra.gmra.mrb[60].mxu1 %v7076_v51 }
 0x952   :  { %4624 = vmatpush3.bf16.msra.mxu0 %v4890_v45 }
 0x953   :  { %4625 = vmatprep.subr.bf16.mxu0 %v4891_v37  ;;  %v8229_v37 = vld [vmem:[#allocation86_spill] sm:$0xff] }
 0x956   :  { %4626 = vmatpush3.bf16.msra.mxu0 %v4892_v30 }
 0x957   :  { %4627 = vmatprep.subr.bf16.mxu0 %v4893_v20  ;;  %v8230_v20 = vld [vmem:[#allocation87_spill] sm:$0xff] }
 0x95a   :  { %4628 = vmatpush3.bf16.msra.mxu0 %v4894_v9 }
 0x95b   :  { %4629 = vmatprep.subr.bf16.mxu0 %v4895_v53 }
 0x95e   :  { %4630 = vmatpush3.bf16.msra.mxu0 %v4896_v54 }
 0x95f   :  { %4631 = vmatprep.subr.bf16.mxu0 %v4897_v17  ;;  %v8231_v17 = vld [vmem:[#allocation88_spill] sm:$0xff] }
 0x962   :  { %4632 = vmatpush3.bf16.msra.mxu0 %v4898_v56 }
 0x963   :  { %4633 = vmatprep.subr.bf16.mxu0 %v4899_v41  ;;  %v8232_v41 = vld [vmem:[#allocation89_spill] sm:$0xff] }
 0x966   :  { %4634 = vmatpush3.bf16.msra.mxu0 %v4900_v55 }
 0x967   :  { %4635 = vmatprep.subr.bf16.mxu0 %v4901_v43 }
 0x96a   :  { %4636 = vmatpush3.bf16.msra.mxu0 %v4902_v52 }
 0x96b   :  { %4637 = vmatprep.subr.bf16.mxu0 %v4903_v23 }
 0x96e   :  { %4638 = vmatpush3.bf16.msra.mxu0 %v4904_v4 }
 0x9e4   :  { %v3865_v50 = vpop.f32.mrb[28].mxu0  ;;  %v3908_v46 = vpop.f32.mrb[28].mxu1 }
 0x9e5   :  { %v3867_v62 = vpop.f32.mrb[29].mxu0  ;;  %v3910_v3 = vpop.f32.mrb[29].mxu1  ;;  %v4669_v0 = vadd.f32 %v3865_v50, %v8225_v44  ;;  %v4697_v14 = vadd.f32 %v3908_v46, %v8226_v1 }
 0x9e6   :  { %v3869_v2 = vpop.f32.mrb[30].mxu0  ;;  %v3912_v61 = vpop.f32.mrb[30].mxu1  ;;  %v4670_v29 = vadd.f32 %v3867_v62, %v8227_v48  ;;  %v4698_v51 = vadd.f32 %v3910_v3, %v8228_v6 }
 0x9e7   :  { %v3871_v5 = vpop.f32.mrb[31].mxu0  ;;  %v3914_v13 = vpop.f32.mrb[31].mxu1  ;;  %v4594_v7 = vmul.f32 -1.442695, %v4669_v0  ;;  %v4671_v42 = vadd.f32 %v3869_v2, %v8225_v44  ;;  %v4596_v27 = vmul.f32 -1.442695, %v4697_v14  ;;  %v4699_v59 = vadd.f32 %v3912_v61, %v8226_v1 }
 0x9e8   :  { %v4595_v18 = vmul.f32 -1.442695, %v4670_v29  ;;  %v4672_v63 = vadd.f32 %v3871_v5, %v8227_v48  ;;  %v4597_v22 = vmul.f32 -1.442695, %v4698_v51  ;;  %v4700_v26 = vadd.f32 %v3914_v13, %v8228_v6 }
 0x9e9   :  { %5337 = vpow2.f32 %v4594_v7  ;;  %v4600_v33 = vmul.f32 -1.442695, %v4671_v42  ;;  %v4602_v24 = vmul.f32 -1.442695, %v4699_v59 }
 0x9ea   :  { %5339 = vpow2.f32 %v4596_v27  ;;  %v4601_v36 = vmul.f32 -1.442695, %v4672_v63  ;;  %v4603_v28 = vmul.f32 -1.442695, %v4700_v26 }
 0x9eb   :  { %5341 = vpow2.f32 %v4595_v18 }
 0x9ec   :  { %5343 = vpow2.f32 %v4597_v22 }
 0x9ed   :  { %5345 = vpow2.f32 %v4600_v33 }
 0x9ee   :  { %5347 = vpow2.f32 %v4602_v24 }
 0x9ef   :  { %5349 = vpow2.f32 %v4601_v36 }
 0x9f0   :  { %5351 = vpow2.f32 %v4603_v28 }
 0x9f3   :  { %v5338_v58 = vpop.eup %5337 }
 0x9f4   :  { %v5340_v11 = vpop.eup %5339  ;;  %v4055_v16 = vadd.f32 1.0, %v5338_v58 }
 0x9f5   :  { %v5342_v60 = vpop.eup %5341  ;;  %v4057_v39 = vadd.f32 1.0, %v5340_v11 }
 0x9f6   :  { %v5344_v15 = vpop.eup %5343  ;;  %v4056_v38 = vadd.f32 1.0, %v5342_v60  ;;  %5353 = vrcp.f32 %v4055_v16 }
 0x9f7   :  { %v5346_v8 = vpop.eup %5345  ;;  %v4058_v21 = vadd.f32 1.0, %v5344_v15  ;;  %5355 = vrcp.f32 %v4057_v39 }
 0x9f8   :  { %v5348_v19 = vpop.eup %5347  ;;  %v4061_v10 = vadd.f32 1.0, %v5346_v8  ;;  %5357 = vrcp.f32 %v4056_v38 }
 0x9f9   :  { %v5350_v25 = vpop.eup %5349  ;;  %v4063_v32 = vadd.f32 1.0, %v5348_v19  ;;  %5359 = vrcp.f32 %v4058_v21 }
 0x9fa   :  { %v5352_v35 = vpop.eup %5351  ;;  %v4062_v47 = vadd.f32 1.0, %v5350_v25  ;;  %5361 = vrcp.f32 %v4061_v10 }
 0x9fb   :  { %v4064_v34 = vadd.f32 1.0, %v5352_v35  ;;  %5363 = vrcp.f32 %v4063_v32 }
 0x9fc   :  { %5365 = vrcp.f32 %v4062_v47 }
 0x9fd   :  { %5367 = vrcp.f32 %v4064_v34 }
 0xa00   :  { %v5354_v61 = vpop.eup %5353 }
 0xa01   :  { %v5356_v13 = vpop.eup %5355 }
 0xa02   :  { %v5358_v1 = vpop.eup %5357  ;;  %v4095_v27 = vmul.f32 %v5356_v13, %v7062_v12 }
 0xa03   :  { %v5360_v14 = vpop.eup %5359 }
 0xa04   :  { %v5362_v48 = vpop.eup %5361  ;;  %v4096_v63 = vmul.f32 %v5360_v14, %v7064_v57 }
 0xa05   :  { %v5364_v29 = vpop.eup %5363 }
 0xa06   :  { %v5366_v6 = vpop.eup %5365  ;;  %v4097_v16 = vmul.f32 %v5364_v29, %v7070_v31 }
 0xa07   :  { %v5368_v51 = vpop.eup %5367 }
 0xa08   :  { %v4098_v57 = vmul.f32 %v5368_v51, %v7073_v49 }
 0xa24   :  { %v3951_v40 = vpop.f32.mrb[60].mxu0  ;;  %v3994_v45 = vpop.f32.mrb[60].mxu1 }
 0xa25   :  { %v4725_v30 = vadd.f32 %v3951_v40, %v8229_v37  ;;  %v4753_v9 = vadd.f32 %v3994_v45, %v8230_v20  ;;  %v3953_v53 = vpop.f32.mrb[61].mxu0  ;;  %v3996_v54 = vpop.f32.mrb[61].mxu1 }
 0xa26   :  { %v4726_v56 = vadd.f32 %v3953_v53, %v8231_v17  ;;  %v4754_v55 = vadd.f32 %v3996_v54, %v8232_v41  ;;  %v3955_v43 = vpop.f32.mrb[62].mxu0  ;;  %v3998_v52 = vpop.f32.mrb[62].mxu1  ;;  %v4606_v54 = vld [vmem:[%s7184_s5] ss:$0 sm:$0xff] }
 0xa27   :  { %v4598_v23 = vmul.f32 -1.442695, %v4725_v30  ;;  %5369 = vtanh.f32 %v4753_v9  ;;  %v4727_v4 = vadd.f32 %v3955_v43, %v8229_v37  ;;  %v3957_v50 = vpop.f32.mrb[63].mxu0  ;;  %v4000_v46 = vpop.f32.mrb[63].mxu1  ;;  %v4755_v3 = vadd.f32 %v3998_v52, %v8230_v20 }
 0xa28   :  { %v4599_v62 = vmul.f32 -1.442695, %v4726_v56  ;;  %5371 = vtanh.f32 %v4754_v55  ;;  %v4728_v2 = vadd.f32 %v3957_v50, %v8231_v17  ;;  %v4756_v0 = vadd.f32 %v4000_v46, %v8232_v41 }
 0xa29   :  { %5373 = vpow2.f32 %v4598_v23  ;;  %v4604_v5 = vmul.f32 -1.442695, %v4727_v4 }
 0xa2a   :  { %5375 = vpow2.f32 %v4599_v62  ;;  %v4605_v44 = vmul.f32 -1.442695, %v4728_v2 }
 0xa2b   :  { %5377 = vpow2.f32 %v4604_v5 }
 0xa2c   :  { %5379 = vtanh.f32 %v4755_v3 }
 0xa2d   :  { %5381 = vpow2.f32 %v4605_v44 }
 0xa2e   :  { %5383 = vtanh.f32 %v4756_v0 }
 0xa31   :  { %v5370_v7 = vpop.eup %5369 }
 0xa32   :  { %v5372_v42 = vpop.eup %5371  ;;  %v4099_v59 = vmul.f32 %v5370_v7, %v5354_v61 }
 0xa33   :  { %v5374_v18 = vpop.eup %5373  ;;  %v4100_v22 = vmul.f32 %v5372_v42, %v5358_v1 }
 0xa34   :  { %v5376_v26 = vpop.eup %5375  ;;  %v4059_v33 = vadd.f32 1.0, %v5374_v18  ;;  %v4103_v24 = vadd.f32 %v4099_v59, %v4095_v27 }
 0xa35   :  { %v5378_v36 = vpop.eup %5377  ;;  %v4060_v28 = vadd.f32 1.0, %v5376_v26  ;;  %v4104_v58 = vadd.f32 %v4100_v22, %v4096_v63 }
 0xa36   :  { %v5380_v11 = vpop.eup %5379  ;;  %5385 = vrcp.f32 %v4059_v33  ;;  %v4065_v60 = vadd.f32 1.0, %v5378_v36 }
 0xa37   :  { %v5382_v15 = vpop.eup %5381  ;;  %5387 = vtanh.f32 %v4103_v24  ;;  %v4101_v8 = vmul.f32 %v5380_v11, %v5362_v48 }
 0xa38   :  { %v5384_v12 = vpop.eup %5383  ;;  %5389 = vrcp.f32 %v4060_v28  ;;  %v4066_v39 = vadd.f32 1.0, %v5382_v15 }
 0xa39   :  { %5391 = vtanh.f32 %v4104_v58  ;;  %v4105_v19 = vadd.f32 %v4101_v8, %v4097_v16  ;;  %v4102_v38 = vmul.f32 %v5384_v12, %v5366_v6 }
 0xa3a   :  { %5393 = vrcp.f32 %v4065_v60 }
 0xa3b   :  { %5395 = vtanh.f32 %v4105_v19  ;;  %v4106_v25 = vadd.f32 %v4102_v38, %v4098_v57 }
 0xa3c   :  { %5397 = vrcp.f32 %v4066_v39 }
 0xa3d   :  { %5399 = vtanh.f32 %v4106_v25 }
 0xa40   :  { %v5386_v21 = vpop.eup %5385 }
 0xa41   :  { %v5388_v35 = vpop.eup %5387 }
 0xa42   :  { %v5390_v10 = vpop.eup %5389  ;;  %v4111_v32 = vmul.f32 %v5388_v35, %v5386_v21 }
 0xa43   :  { %v5392_v31 = vpop.eup %5391 }
 0xa44   :  { %v5394_v47 = vpop.eup %5393  ;;  %v4112_v34 = vmul.f32 %v5392_v31, %v5390_v10 }
 0xa45   :  { %v5396_v40 = vpop.eup %5395 }
 0xa46   :  { %v5398_v45 = vpop.eup %5397  ;;  %v4113_v37 = vmul.f32 %v5396_v40, %v5394_v47 }
 0xa47   :  { %v5400_v30 = vpop.eup %5399 }
 0xa48   :  { %v4114_v49 = vmul.f32 %v5400_v30, %v5398_v45  ;;  %v4115_v20 = vpack.c.bf16 %v4113_v37, %v4111_v32 }
 0xa4a   :  { %v4116_v9 = vpack.c.bf16 %v4114_v49, %v4112_v34 }
 0xa4c   :  { %4284 = vmatprep.mubr.bf16.mxu0 %v4116_v9 }
 0xa4d   :  { %4285 = vmatmul.mubr.bf16.vlgmr.msra.gmra.mrb[64].mxu0 %v4115_v20 }
 0xb20   :  { %v4639_v53 = vpop.f32.mrb[64].mxu0 }
 0xb21   :  { %v4640_v17 = vpop.f32.mrb[65].mxu0 }
 0xb22   :  { %v4641_v56 = vadd.f32 %v4640_v17, %v4639_v53  ;;  %v4642_v41 = vpop.f32.mrb[66].mxu0 }
 0xb23   :  { %v4643_v55 = vpop.f32.mrb[67].mxu0 }
 0xb24   :  { %v4287_v43 = vadd.f32 %v4641_v56, %v4606_v54  ;;  %v4644_v52 = vadd.f32 %v4643_v55, %v4642_v41 }
 0xb26   :  { %4293 = vst [vmem:[#allocation11] sm:$0xff] %v4287_v43  ;;  %v4290_v23 = vadd.f32 %v4644_v52, %v4606_v54 }
 0xb28   :  { %4294 = vst [vmem:[#allocation11 + $0x8] sm:$0xff] %v4290_v23 }
 0xb29   :  { %5500 = shalt.err (!%p5497_p8)
}
 0xb2a   :  { %s5501_s27 = scalar_lea.hbm %s7185_s6, 256 }
 0xb2b   :  { %p5502_p9 = scmp.ne.s32.totalorder %s7185_s6, %s5501_s27  ;;  %p5505_p10 = scmp.lt.u32.totalorder %s5501_s27, %s7185_s6 }
 0xb2d   :  { %p5507_p11 = pnand %p5505_p10, %p5502_p9 }
 0xb2f   :  { %5510 = shalt.err (!%p5507_p11)
}
 0xb30   :  { %s5529_s10 = smov 128   ;;  %s5530_s11 = smov 8  }
 0xb31   :  { %4306 = dma.vmem_to_hbm [thread:$0]  %s4301_s24, 256, %s7185_s6, [#allocation5], %s5529_s10, %s5529_s10, %s5530_s11  }
 0xb32   :  { %5517 = dma.done.wait [#allocation5], 256  }
 0xb33   :  { %5518 = vsyncadd [#allocation5], 4294967040 }
 0xb34   :  { %4310 = vsyncpa [#allocation4], 1 }
 0xb35   :  { %4311 = vsyncpa [#allocation7], 1 }
 0xb36   :  { %4312 = vsyncpa [#allocation10], 1 }
 0xb37   :  { %4313 = vsyncpa [#allocation5], 1 }

</bundles_post_ra>
